<compile_context>
chip_gen: v5e
topology: v5e:2x2
jax: 0.10.0
libtpu: 0.0.40
codegen_flags: <defaults>
</compile_context>

<pallas_src>
import functools

import jax
import jax.numpy as jnp
import numpy as np
from jax import lax
from jax.experimental import pallas as pl
from jax.experimental.pallas import tpu as pltpu

EPS = 1e-5        # PyTorch BatchNorm1d default eps
OUT_PAD = 128     # lane-dense output width (true output is 9)


def _round_up(x, m):
    return (x + m - 1) // m * m


def _padded_channels(c):
    return max(8, _round_up(c, 8))


def _make_kernel(batch, n_points, tile_m):
    """Build the kernel with static shapes closed over."""
    inv_rows = 1.0 / float(batch * n_points)   # bn1..3: stats over all B*N rows
    inv_b = 1.0 / float(batch)                 # bn4..5: stats over B rows

    def kernel(x_ref,
               w1, g1, be1,
               w2, g2, be2,
               w3, g3, be3,
               w4, g4, be4,
               w5, g5, be5,
               w6, b6,
               out_ref,
               s1, q1, s2, q2, s3, q3, rmax, rmin, h3max, h3min):
        p = pl.program_id(0)        # pass
        bidx = pl.program_id(1)     # batch element
        t = pl.program_id(2)        # point tile within batch element
        n_tiles = pl.num_programs(2)
        first = jnp.logical_and(bidx == 0, t == 0)
        last = jnp.logical_and(bidx == pl.num_programs(1) - 1, t == n_tiles - 1)

        xt = x_ref[...]             # (tile_m, CP) f32, batch dim squeezed

        # (1, tile_m) validity row: real points -> 1, edge-padded rows -> 0.
        # Only the BN sums need it (padded rows are duplicates of a real point,
        # so they can never change the max/min pooling).
        col = lax.broadcasted_iota(jnp.int32, (1, tile_m), 1)
        mrow = ((t * tile_m + col) < n_points).astype(jnp.float32)

        def scale_shift(s_ref, q_ref, g_ref, be_ref, inv_count):
            # Fused BN affine; rsqrt on (1, C) runs on the EUP slot.
            mean = s_ref[...] * inv_count
            var = q_ref[...] * inv_count - mean * mean
            scale = g_ref[...] * lax.rsqrt(var + EPS)
            shift = be_ref[...] - mean * scale
            return scale, shift

        # conv/fc biases before training-mode BN are dropped (absorbed by mean).
        def conv1(x_):
            return jnp.dot(x_, w1[...], preferred_element_type=jnp.float32)

        def act1(x_):
            sc, sh = scale_shift(s1, q1, g1, be1, inv_rows)
            return jnp.maximum(conv1(x_) * sc + sh, 0.0)

        def conv2(x_):
            return jnp.dot(act1(x_), w2[...], preferred_element_type=jnp.float32)

        def act2(x_):
            sc, sh = scale_shift(s2, q2, g2, be2, inv_rows)
            return jnp.maximum(conv2(x_) * sc + sh, 0.0)

        def conv3(x_):
            return jnp.dot(act2(x_), w3[...], preferred_element_type=jnp.float32)

        def acc_stats(s_ref, q_ref, h):
            # Row-sums on the MXU (mask folded into the (1, tile_m) row vector)
            # instead of VPU mask-multiplies + XLU cross-sublane reductions.
            s_ref[...] += jnp.dot(mrow, h, preferred_element_type=jnp.float32)
            q_ref[...] += jnp.dot(mrow, h * h, preferred_element_type=jnp.float32)

        @pl.when(jnp.logical_and(p == 0, first))
        def _init():
            s1[...] = jnp.zeros_like(s1); q1[...] = jnp.zeros_like(q1)
            s2[...] = jnp.zeros_like(s2); q2[...] = jnp.zeros_like(q2)
            s3[...] = jnp.zeros_like(s3); q3[...] = jnp.zeros_like(q3)
            h3max[...] = jnp.zeros_like(h3max)
            h3min[...] = jnp.zeros_like(h3min)

        @pl.when(p == 0)            # conv1 -> bn1 statistics
        def _p0():
            acc_stats(s1, q1, conv1(xt))

        @pl.when(p == 1)            # bn1+relu, conv2 -> bn2 statistics
        def _p1():
            acc_stats(s2, q2, conv2(xt))

        @pl.when(p == 2)            # bn2+relu, conv3 -> bn3 stats + running extrema
        def _p2():
            h3 = conv3(xt)                                    # (tile_m, 1024) pre-BN
            acc_stats(s3, q3, h3)
            tmax = jnp.max(h3, axis=0, keepdims=True)         # (1, 1024)
            tmin = jnp.min(h3, axis=0, keepdims=True)

            @pl.when(t == 0)
            def _reset():
                rmax[...] = tmax
                rmin[...] = tmin

            @pl.when(t > 0)
            def _update():
                rmax[...] = jnp.maximum(rmax[...], tmax)
                rmin[...] = jnp.minimum(rmin[...], tmin)

            @pl.when(t == n_tiles - 1)   # flush once per batch element
            def _flush():
                rowsel = lax.broadcasted_iota(jnp.int32, (batch, 1), 0) == bidx
                h3max[...] = jnp.where(rowsel, rmax[...], h3max[...])
                h3min[...] = jnp.where(rowsel, rmin[...], h3min[...])

        @pl.when(jnp.logical_and(p == 2, last))
        def _epilogue():            # bn3+relu on the extrema, max-pool, FC head
            sc3, sh3 = scale_shift(s3, q3, g3, be3, inv_rows)
            pooled = jnp.maximum(
                jnp.maximum(h3max[...] * sc3 + sh3, h3min[...] * sc3 + sh3), 0.0)

            def fc_bn_relu(x_, w_ref, g_ref, be_ref):
                h = jnp.dot(x_, w_ref[...], preferred_element_type=jnp.float32)
                mean = jnp.sum(h, axis=0, keepdims=True) * inv_b
                var = jnp.sum(h * h, axis=0, keepdims=True) * inv_b - mean * mean
                scale = g_ref[...] * lax.rsqrt(var + EPS)
                shift = be_ref[...] - mean * scale
                return jnp.maximum(h * scale + shift, 0.0)

            f = fc_bn_relu(pooled, w4, g4, be4)
            f = fc_bn_relu(f, w5, g5, be5)
            # fc3: weight/bias pre-padded to 128 lanes; the flattened 3x3
            # identity is already folded into b6 by the wrapper.
            out_ref[...] = jnp.dot(f, w6[...],
                                   preferred_element_type=jnp.float32) + b6[...]

    return kernel


def init_params(key, channel):
    """Deterministic PyTorch-style (uniform +/- 1/sqrt(fan_in)) f32 params."""
    dims = [(channel, 64), (64, 128), (128, 1024), (1024, 512), (512, 256), (256, 9)]
    ks = jax.random.split(key, len(dims))
    params = []
    for i, (fi, fo) in enumerate(dims):
        kw, kb = jax.random.split(ks[i])
        bound = 1.0 / float(fi) ** 0.5
        w = jax.random.uniform(kw, (fi, fo), jnp.float32, -bound, bound)
        b = jax.random.uniform(kb, (1, fo), jnp.float32, -bound, bound)
        params += [w, b]
        if i < 5:   # bn1..bn5: gamma=1, beta=0 (PyTorch default)
            params += [jnp.ones((1, fo), jnp.float32), jnp.zeros((1, fo), jnp.float32)]
    return params


def prepare_params(params, channel):
    """Pad the f32 params into the layout the kernel expects (drops b1..b5)."""
    (w1, b1, g1, be1, w2, b2, g2, be2, w3, b3, g3, be3,
     w4, b4, g4, be4, w5, b5, g5, be5, w6, b6) = params
    cp = _padded_channels(channel)
    w1p = jnp.zeros((cp, 64), jnp.float32).at[:channel].set(w1)
    # Lane-dense fc3: pad to 128 output lanes and fold the 3x3 identity into the bias.
    iden = jnp.array([1, 0, 0, 0, 1, 0, 0, 0, 1], jnp.float32).reshape(1, 9)
    w6p = jnp.zeros((256, OUT_PAD), jnp.float32).at[:, :9].set(w6)
    b6p = jnp.zeros((1, OUT_PAD), jnp.float32).at[:, :9].set(b6 + iden)
    # b1..b5 dropped: bias right before training-mode BN is absorbed by the mean.
    return [w1p, g1, be1, w2, g2, be2, w3, g3, be3,
            w4, g4, be4, w5, g5, be5, w6p, b6p]


@functools.partial(jax.jit, static_argnames=("tile_points",))
def stn3d_forward(x_ncw, kparams, *, tile_points=1024):
    """x_ncw: (B, channel, N) f32, same layout as the PyTorch module input.

    tile_points: point-tile size. ~2048 is good on v5e/v6e (128 MiB VMEM);
    keep <=1024 on v7x (64 MiB VMEM, 32 MiB scoped default).
    """
    B, C, N = x_ncw.shape
    cp = _padded_channels(C)
    x = jnp.transpose(x_ncw, (0, 2, 1)).astype(jnp.float32)        # (B, N, C)
    x = jnp.pad(x, ((0, 0), (0, 0), (0, cp - C)))                   # pad channels
    tm = min(_round_up(N, 8), _round_up(tile_points, 8))            # point tile (rows)
    n_pad = _round_up(N, tm)
    if n_pad != N:
        # Edge-pad the point axis: padded rows duplicate the last real point,
        # so they never affect the max/min pooling and need no in-kernel mask;
        # the BN sums exclude them via the (1, tm) mask row.
        x = jnp.pad(x, ((0, 0), (0, n_pad - N), (0, 0)), mode="edge")
    n_tiles = n_pad // tm

    kernel = _make_kernel(B, N, tm)

    const2d = lambda p, b, t: (0, 0)   # weights/params: resident, DMA'd once
    # TODO(synk): pipeline_mode=pl.Buffered(1) on these constant specs would free
    # ~half the resident-param VMEM on v7x.
    param_specs = [pl.BlockSpec(kp.shape, const2d) for kp in kparams]

    grid_spec = pltpu.PrefetchScalarGridSpec(
        num_scalar_prefetch=0,
        grid=(3, B, n_tiles),                                       # (pass, batch, tile)
        in_specs=[pl.BlockSpec((None, tm, cp), lambda p, b, t: (b, t, 0))]
                 + param_specs,
        out_specs=pl.BlockSpec((B, OUT_PAD), const2d),
        scratch_shapes=[
            pltpu.VMEM((1, 64), jnp.float32),   pltpu.VMEM((1, 64), jnp.float32),
            pltpu.VMEM((1, 128), jnp.float32),  pltpu.VMEM((1, 128), jnp.float32),
            pltpu.VMEM((1, 1024), jnp.float32), pltpu.VMEM((1, 1024), jnp.float32),
            pltpu.VMEM((1, 1024), jnp.float32),                     # running max (per batch elem)
            pltpu.VMEM((1, 1024), jnp.float32),                     # running min (per batch elem)
            pltpu.VMEM((B, 1024), jnp.float32),                     # pre-BN conv3 max
            pltpu.VMEM((B, 1024), jnp.float32),                     # pre-BN conv3 min
        ],
    )
    out = pl.pallas_call(
        kernel,
        out_shape=jax.ShapeDtypeStruct((B, OUT_PAD), jnp.float32),
        grid_spec=grid_spec,
        compiler_params=pltpu.CompilerParams(
            # All three axes carry sequential state (pass ordering, BN stats,
            # per-batch running extrema), so all are "arbitrary".
            dimension_semantics=("arbitrary", "arbitrary", "arbitrary"),
            vmem_limit_bytes=48 * 1024 * 1024,
        ),
    )(x, *kparams)
    return out[:, :9].reshape(B, 3, 3)


def stn3d_reference(x_ncw, params):
    """Pure-JAX f32 reference with the exact PyTorch STN3d forward semantics."""
    (w1, b1, g1, be1, w2, b2, g2, be2, w3, b3, g3, be3,
     w4, b4, g4, be4, w5, b5, g5, be5, w6, b6) = params
    B, C, N = x_ncw.shape
    x = jnp.transpose(x_ncw, (0, 2, 1)).reshape(B * N, C)

    def bn_relu(h, g, be):
        mean = jnp.mean(h, axis=0, keepdims=True)
        var = jnp.mean(jnp.square(h - mean), axis=0, keepdims=True)   # biased var
        return jnp.maximum(g * (h - mean) * lax.rsqrt(var + EPS) + be, 0.0)

    h = bn_relu(x @ w1 + b1, g1, be1)
    h = bn_relu(h @ w2 + b2, g2, be2)
    h = bn_relu(h @ w3 + b3, g3, be3)
    pooled = jnp.max(h.reshape(B, N, 1024), axis=1)
    f = bn_relu(pooled @ w4 + b4, g4, be4)
    f = bn_relu(f @ w5 + b5, g5, be5)
    out = f @ w6 + b6
    iden = jnp.array([1, 0, 0, 0, 1, 0, 0, 0, 1], jnp.float32).reshape(1, 9)
    return (out + iden).reshape(B, 3, 3)


if __name__ == "__main__":
    key = jax.random.PRNGKey(0)
    kx, kp = jax.random.split(key)
    # Small demo. B=4 (training-mode BN over the FC head is degenerate and
    # sign-discontinuous at B=2, which makes numerical comparison meaningless);
    # N=80 with tile_points=32 -> 3 point tiles incl. a ragged (edge-padded)
    # one, so the streamed stats / running-extrema / flush paths are exercised.
    B, C, N = 4, 3, 80
    x = jax.random.normal(kx, (B, C, N), jnp.float32)
    params = init_params(kp, C)
    kparams = prepare_params(params, C)

    out = stn3d_forward(x, kparams, tile_points=32)
    jax.block_until_ready(out)
    assert out.shape == (B, 3, 3) and out.dtype == jnp.float32

    ref = stn3d_reference(x, params)
    np.testing.assert_allclose(np.asarray(out), np.asarray(ref), atol=2e-2, rtol=2e-2)
    print("KERNEL_OK")
</pallas_src>

<mosaic_0001>
module attributes {stable_mosaic.version = 11 : i64} {
  func.func @kernel(%arg0: i32, %arg1: i32, %arg2: i32, %arg3: memref<1x32x8xf32, #tpu.memory_space<vmem>>, %arg4: memref<8x64xf32, #tpu.memory_space<vmem>>, %arg5: memref<1x64xf32, #tpu.memory_space<vmem>>, %arg6: memref<1x64xf32, #tpu.memory_space<vmem>>, %arg7: memref<64x128xf32, #tpu.memory_space<vmem>>, %arg8: memref<1x128xf32, #tpu.memory_space<vmem>>, %arg9: memref<1x128xf32, #tpu.memory_space<vmem>>, %arg10: memref<128x1024xf32, #tpu.memory_space<vmem>>, %arg11: memref<1x1024xf32, #tpu.memory_space<vmem>>, %arg12: memref<1x1024xf32, #tpu.memory_space<vmem>>, %arg13: memref<1024x512xf32, #tpu.memory_space<vmem>>, %arg14: memref<1x512xf32, #tpu.memory_space<vmem>>, %arg15: memref<1x512xf32, #tpu.memory_space<vmem>>, %arg16: memref<512x256xf32, #tpu.memory_space<vmem>>, %arg17: memref<1x256xf32, #tpu.memory_space<vmem>>, %arg18: memref<1x256xf32, #tpu.memory_space<vmem>>, %arg19: memref<256x128xf32, #tpu.memory_space<vmem>>, %arg20: memref<1x128xf32, #tpu.memory_space<vmem>>, %arg21: memref<4x128xf32, #tpu.memory_space<vmem>>, %arg22: memref<1x64xf32, #tpu.memory_space<vmem>>, %arg23: memref<1x64xf32, #tpu.memory_space<vmem>>, %arg24: memref<1x128xf32, #tpu.memory_space<vmem>>, %arg25: memref<1x128xf32, #tpu.memory_space<vmem>>, %arg26: memref<1x1024xf32, #tpu.memory_space<vmem>>, %arg27: memref<1x1024xf32, #tpu.memory_space<vmem>>, %arg28: memref<1x1024xf32, #tpu.memory_space<vmem>>, %arg29: memref<1x1024xf32, #tpu.memory_space<vmem>>, %arg30: memref<4x1024xf32, #tpu.memory_space<vmem>>, %arg31: memref<4x1024xf32, #tpu.memory_space<vmem>>) attributes {dimension_semantics = [#tpu.dimension_semantics<arbitrary>, #tpu.dimension_semantics<arbitrary>, #tpu.dimension_semantics<arbitrary>], iteration_bounds = array<i64: 3, 4, 3>, scalar_prefetch = 0 : i64, scratch_operands = 10 : i64, tpu.core_type = #tpu.core_type<tc>, window_params = [{transform_indices = @transform_0, window_bounds = array<i64: 1, 32, 8>}, {pipeline_mode = #tpu.pipeline_mode<synchronous>, transform_indices = @transform_1, window_bounds = array<i64: 8, 64>}, {pipeline_mode = #tpu.pipeline_mode<synchronous>, transform_indices = @transform_2, window_bounds = array<i64: 1, 64>}, {pipeline_mode = #tpu.pipeline_mode<synchronous>, transform_indices = @transform_3, window_bounds = array<i64: 1, 64>}, {pipeline_mode = #tpu.pipeline_mode<synchronous>, transform_indices = @transform_4, window_bounds = array<i64: 64, 128>}, {pipeline_mode = #tpu.pipeline_mode<synchronous>, transform_indices = @transform_5, window_bounds = array<i64: 1, 128>}, {pipeline_mode = #tpu.pipeline_mode<synchronous>, transform_indices = @transform_6, window_bounds = array<i64: 1, 128>}, {pipeline_mode = #tpu.pipeline_mode<synchronous>, transform_indices = @transform_7, window_bounds = array<i64: 128, 1024>}, {pipeline_mode = #tpu.pipeline_mode<synchronous>, transform_indices = @transform_8, window_bounds = array<i64: 1, 1024>}, {pipeline_mode = #tpu.pipeline_mode<synchronous>, transform_indices = @transform_9, window_bounds = array<i64: 1, 1024>}, {pipeline_mode = #tpu.pipeline_mode<synchronous>, transform_indices = @transform_10, window_bounds = array<i64: 1024, 512>}, {pipeline_mode = #tpu.pipeline_mode<synchronous>, transform_indices = @transform_11, window_bounds = array<i64: 1, 512>}, {pipeline_mode = #tpu.pipeline_mode<synchronous>, transform_indices = @transform_12, window_bounds = array<i64: 1, 512>}, {pipeline_mode = #tpu.pipeline_mode<synchronous>, transform_indices = @transform_13, window_bounds = array<i64: 512, 256>}, {pipeline_mode = #tpu.pipeline_mode<synchronous>, transform_indices = @transform_14, window_bounds = array<i64: 1, 256>}, {pipeline_mode = #tpu.pipeline_mode<synchronous>, transform_indices = @transform_15, window_bounds = array<i64: 1, 256>}, {pipeline_mode = #tpu.pipeline_mode<synchronous>, transform_indices = @transform_16, window_bounds = array<i64: 256, 128>}, {pipeline_mode = #tpu.pipeline_mode<synchronous>, transform_indices = @transform_17, window_bounds = array<i64: 1, 128>}, {pipeline_mode = #tpu.pipeline_mode<synchronous>, transform_indices = @transform_18, window_bounds = array<i64: 4, 128>}]} {
    %c0_i32 = arith.constant 0 : i32
    %0 = arith.cmpi eq, %arg1, %c0_i32 : i32
    %c0_i32_0 = arith.constant 0 : i32
    %1 = arith.cmpi eq, %arg2, %c0_i32_0 : i32
    %2 = arith.andi %0, %1 : i1
    %c3_i32 = arith.constant 3 : i32
    %3 = arith.cmpi eq, %arg1, %c3_i32 : i32
    %c2_i32 = arith.constant 2 : i32
    %4 = arith.cmpi eq, %arg2, %c2_i32 : i32
    %5 = arith.andi %3, %4 : i1
    %c0 = arith.constant 0 : index
    %c0_1 = arith.constant 0 : index
    %c0_2 = arith.constant 0 : index
    %6 = vector.load %arg3[%c0, %c0_1, %c0_2] : memref<1x32x8xf32, #tpu.memory_space<vmem>>, vector<1x32x8xf32>
    %7 = vector.shape_cast %6 : vector<1x32x8xf32> to vector<32x8xf32>
    %8 = tpu.iota {dimensions = array<i32: 1>} : vector<1x32xi32>
    %c32_i32 = arith.constant 32 : i32
    %9 = arith.muli %arg2, %c32_i32 : i32
    %10 = vector.broadcast %9 : i32 to vector<1x32xi32>
    %11 = arith.addi %10, %8 : vector<1x32xi32>
    %c80_i32 = arith.constant 80 : i32
    %12 = vector.broadcast %c80_i32 : i32 to vector<1x32xi32>
    %13 = arith.cmpi slt, %11, %12 : vector<1x32xi32>
    %14 = arith.extui %13 : vector<1x32xi1> to vector<1x32xi32>
    %15 = arith.sitofp %14 : vector<1x32xi32> to vector<1x32xf32>
    %c0_i32_3 = arith.constant 0 : i32
    %16 = arith.cmpi eq, %arg0, %c0_i32_3 : i32
    %17 = arith.andi %16, %2 : i1
    %18 = arith.extui %17 : i1 to i32
    %c0_i32_4 = arith.constant 0 : i32
    %19 = arith.cmpi ne, %18, %c0_i32_4 : i32
    scf.if %19 {
      %cst = arith.constant 0.000000e+00 : f32
      %33 = vector.broadcast %cst : f32 to vector<1x64xf32>
      %c0_12 = arith.constant 0 : index
      %c0_13 = arith.constant 0 : index
      %34 = vector.load %arg22[%c0_12, %c0_13] : memref<1x64xf32, #tpu.memory_space<vmem>>, vector<1x64xf32>
      tpu.vector_store %arg22[%c0_12, %c0_13], %33 {strides = array<i32>} : memref<1x64xf32, #tpu.memory_space<vmem>>, vector<1x64xf32>,
      %cst_14 = arith.constant 0.000000e+00 : f32
      %35 = vector.broadcast %cst_14 : f32 to vector<1x64xf32>
      %c0_15 = arith.constant 0 : index
      %c0_16 = arith.constant 0 : index
      %36 = vector.load %arg23[%c0_15, %c0_16] : memref<1x64xf32, #tpu.memory_space<vmem>>, vector<1x64xf32>
      tpu.vector_store %arg23[%c0_15, %c0_16], %35 {strides = array<i32>} : memref<1x64xf32, #tpu.memory_space<vmem>>, vector<1x64xf32>,
      %cst_17 = arith.constant 0.000000e+00 : f32
      %37 = vector.broadcast %cst_17 : f32 to vector<1x128xf32>
      %c0_18 = arith.constant 0 : index
      %c0_19 = arith.constant 0 : index
      %38 = vector.load %arg24[%c0_18, %c0_19] : memref<1x128xf32, #tpu.memory_space<vmem>>, vector<1x128xf32>
      tpu.vector_store %arg24[%c0_18, %c0_19], %37 {strides = array<i32>} : memref<1x128xf32, #tpu.memory_space<vmem>>, vector<1x128xf32>,
      %cst_20 = arith.constant 0.000000e+00 : f32
      %39 = vector.broadcast %cst_20 : f32 to vector<1x128xf32>
      %c0_21 = arith.constant 0 : index
      %c0_22 = arith.constant 0 : index
      %40 = vector.load %arg25[%c0_21, %c0_22] : memref<1x128xf32, #tpu.memory_space<vmem>>, vector<1x128xf32>
      tpu.vector_store %arg25[%c0_21, %c0_22], %39 {strides = array<i32>} : memref<1x128xf32, #tpu.memory_space<vmem>>, vector<1x128xf32>,
      %cst_23 = arith.constant 0.000000e+00 : f32
      %41 = vector.broadcast %cst_23 : f32 to vector<1x1024xf32>
      %c0_24 = arith.constant 0 : index
      %c0_25 = arith.constant 0 : index
      %42 = vector.load %arg26[%c0_24, %c0_25] : memref<1x1024xf32, #tpu.memory_space<vmem>>, vector<1x1024xf32>
      tpu.vector_store %arg26[%c0_24, %c0_25], %41 {strides = array<i32>} : memref<1x1024xf32, #tpu.memory_space<vmem>>, vector<1x1024xf32>,
      %cst_26 = arith.constant 0.000000e+00 : f32
      %43 = vector.broadcast %cst_26 : f32 to vector<1x1024xf32>
      %c0_27 = arith.constant 0 : index
      %c0_28 = arith.constant 0 : index
      %44 = vector.load %arg27[%c0_27, %c0_28] : memref<1x1024xf32, #tpu.memory_space<vmem>>, vector<1x1024xf32>
      tpu.vector_store %arg27[%c0_27, %c0_28], %43 {strides = array<i32>} : memref<1x1024xf32, #tpu.memory_space<vmem>>, vector<1x1024xf32>,
      %cst_29 = arith.constant 0.000000e+00 : f32
      %45 = vector.broadcast %cst_29 : f32 to vector<4x1024xf32>
      %c0_30 = arith.constant 0 : index
      %c0_31 = arith.constant 0 : index
      %46 = vector.load %arg30[%c0_30, %c0_31] : memref<4x1024xf32, #tpu.memory_space<vmem>>, vector<4x1024xf32>
      tpu.vector_store %arg30[%c0_30, %c0_31], %45 {strides = array<i32>} : memref<4x1024xf32, #tpu.memory_space<vmem>>, vector<4x1024xf32>,
      %cst_32 = arith.constant 0.000000e+00 : f32
      %47 = vector.broadcast %cst_32 : f32 to vector<4x1024xf32>
      %c0_33 = arith.constant 0 : index
      %c0_34 = arith.constant 0 : index
      %48 = vector.load %arg31[%c0_33, %c0_34] : memref<4x1024xf32, #tpu.memory_space<vmem>>, vector<4x1024xf32>
      tpu.vector_store %arg31[%c0_33, %c0_34], %47 {strides = array<i32>} : memref<4x1024xf32, #tpu.memory_space<vmem>>, vector<4x1024xf32>,
    } else {
    }
    %c0_i32_5 = arith.constant 0 : i32
    %20 = arith.cmpi eq, %arg0, %c0_i32_5 : i32
    %21 = arith.extui %20 : i1 to i32
    %c0_i32_6 = arith.constant 0 : i32
    %22 = arith.cmpi ne, %21, %c0_i32_6 : i32
    scf.if %22 {
      %c0_12 = arith.constant 0 : index
      %c0_13 = arith.constant 0 : index
      %33 = vector.load %arg4[%c0_12, %c0_13] : memref<8x64xf32, #tpu.memory_space<vmem>>, vector<8x64xf32>
      %cst = arith.constant dense<0.000000e+00> : vector<32x64xf32>
      %34 = tpu.matmul %7, %33, %cst {dimension_numbers = #tpu.dot_dimension_numbers<[1], [0], [0], [1], [0, 0, 1, 1], [], []>} : vector<32x8xf32>, vector<8x64xf32>, vector<32x64xf32> -> vector<32x64xf32>
      %c0_14 = arith.constant 0 : index
      %c0_15 = arith.constant 0 : index
      %35 = vector.load %arg22[%c0_14, %c0_15] : memref<1x64xf32, #tpu.memory_space<vmem>>, vector<1x64xf32>
      %cst_16 = arith.constant dense<0.000000e+00> : vector<1x64xf32>
      %36 = tpu.matmul %15, %34, %cst_16 {dimension_numbers = #tpu.dot_dimension_numbers<[1], [0], [0], [1], [0, 0, 1, 1], [], []>} : vector<1x32xf32>, vector<32x64xf32>, vector<1x64xf32> -> vector<1x64xf32>
      %37 = arith.addf %35, %36 : vector<1x64xf32>
      %c0_17 = arith.constant 0 : index
      %c0_18 = arith.constant 0 : index
      %38 = vector.load %arg22[%c0_17, %c0_18] : memref<1x64xf32, #tpu.memory_space<vmem>>, vector<1x64xf32>
      tpu.vector_store %arg22[%c0_17, %c0_18], %37 {strides = array<i32>} : memref<1x64xf32, #tpu.memory_space<vmem>>, vector<1x64xf32>,
      %c0_19 = arith.constant 0 : index
      %c0_20 = arith.constant 0 : index
      %39 = vector.load %arg23[%c0_19, %c0_20] : memref<1x64xf32, #tpu.memory_space<vmem>>, vector<1x64xf32>
      %40 = arith.mulf %34, %34 : vector<32x64xf32>
      %cst_21 = arith.constant dense<0.000000e+00> : vector<1x64xf32>
      %41 = tpu.matmul %15, %40, %cst_21 {dimension_numbers = #tpu.dot_dimension_numbers<[1], [0], [0], [1], [0, 0, 1, 1], [], []>} : vector<1x32xf32>, vector<32x64xf32>, vector<1x64xf32> -> vector<1x64xf32>
      %42 = arith.addf %39, %41 : vector<1x64xf32>
      %c0_22 = arith.constant 0 : index
      %c0_23 = arith.constant 0 : index
      %43 = vector.load %arg23[%c0_22, %c0_23] : memref<1x64xf32, #tpu.memory_space<vmem>>, vector<1x64xf32>
      tpu.vector_store %arg23[%c0_22, %c0_23], %42 {strides = array<i32>} : memref<1x64xf32, #tpu.memory_space<vmem>>, vector<1x64xf32>,
    } else {
    }
    %c1_i32 = arith.constant 1 : i32
    %23 = arith.cmpi eq, %arg0, %c1_i32 : i32
    %24 = arith.extui %23 : i1 to i32
    %c0_i32_7 = arith.constant 0 : i32
    %25 = arith.cmpi ne, %24, %c0_i32_7 : i32
    scf.if %25 {
      %c0_12 = arith.constant 0 : index
      %c0_13 = arith.constant 0 : index
      %33 = vector.load %arg22[%c0_12, %c0_13] : memref<1x64xf32, #tpu.memory_space<vmem>>, vector<1x64xf32>
      %cst = arith.constant 3.125000e-03 : f32
      %34 = vector.broadcast %cst : f32 to vector<1x64xf32>
      %35 = arith.mulf %33, %34 : vector<1x64xf32>
      %c0_14 = arith.constant 0 : index
      %c0_15 = arith.constant 0 : index
      %36 = vector.load %arg23[%c0_14, %c0_15] : memref<1x64xf32, #tpu.memory_space<vmem>>, vector<1x64xf32>
      %cst_16 = arith.constant 3.125000e-03 : f32
      %37 = vector.broadcast %cst_16 : f32 to vector<1x64xf32>
      %38 = arith.mulf %36, %37 : vector<1x64xf32>
      %39 = arith.mulf %35, %35 : vector<1x64xf32>
      %40 = arith.subf %38, %39 : vector<1x64xf32>
      %c0_17 = arith.constant 0 : index
      %c0_18 = arith.constant 0 : index
      %41 = vector.load %arg5[%c0_17, %c0_18] : memref<1x64xf32, #tpu.memory_space<vmem>>, vector<1x64xf32>
      %cst_19 = arith.constant 9.99999974E-6 : f32
      %42 = vector.broadcast %cst_19 : f32 to vector<1x64xf32>
      %43 = arith.addf %40, %42 : vector<1x64xf32>
      %44 = math.rsqrt %43 : vector<1x64xf32>
      %45 = arith.mulf %41, %44 : vector<1x64xf32>
      %c0_20 = arith.constant 0 : index
      %c0_21 = arith.constant 0 : index
      %46 = vector.load %arg6[%c0_20, %c0_21] : memref<1x64xf32, #tpu.memory_space<vmem>>, vector<1x64xf32>
      %47 = arith.mulf %35, %45 : vector<1x64xf32>
      %48 = arith.subf %46, %47 : vector<1x64xf32>
      %c0_22 = arith.constant 0 : index
      %c0_23 = arith.constant 0 : index
      %49 = vector.load %arg4[%c0_22, %c0_23] : memref<8x64xf32, #tpu.memory_space<vmem>>, vector<8x64xf32>
      %cst_24 = arith.constant dense<0.000000e+00> : vector<32x64xf32>
      %50 = tpu.matmul %7, %49, %cst_24 {dimension_numbers = #tpu.dot_dimension_numbers<[1], [0], [0], [1], [0, 0, 1, 1], [], []>} : vector<32x8xf32>, vector<8x64xf32>, vector<32x64xf32> -> vector<32x64xf32>
      %51 = vector.broadcast %45 : vector<1x64xf32> to vector<32x64xf32>
      %52 = arith.mulf %50, %51 : vector<32x64xf32>
      %53 = vector.broadcast %48 : vector<1x64xf32> to vector<32x64xf32>
      %54 = arith.addf %52, %53 : vector<32x64xf32>
      %cst_25 = arith.constant 0.000000e+00 : f32
      %55 = vector.broadcast %cst_25 : f32 to vector<32x64xf32>
      %56 = arith.maximumf %54, %55 : vector<32x64xf32>
      %c0_26 = arith.constant 0 : index
      %c0_27 = arith.constant 0 : index
      %57 = vector.load %arg7[%c0_26, %c0_27] : memref<64x128xf32, #tpu.memory_space<vmem>>, vector<64x128xf32>
      %cst_28 = arith.constant dense<0.000000e+00> : vector<32x128xf32>
      %58 = tpu.matmul %56, %57, %cst_28 {dimension_numbers = #tpu.dot_dimension_numbers<[1], [0], [0], [1], [0, 0, 1, 1], [], []>} : vector<32x64xf32>, vector<64x128xf32>, vector<32x128xf32> -> vector<32x128xf32>
      %c0_29 = arith.constant 0 : index
      %c0_30 = arith.constant 0 : index
      %59 = vector.load %arg24[%c0_29, %c0_30] : memref<1x128xf32, #tpu.memory_space<vmem>>, vector<1x128xf32>
      %cst_31 = arith.constant dense<0.000000e+00> : vector<1x128xf32>
      %60 = tpu.matmul %15, %58, %cst_31 {dimension_numbers = #tpu.dot_dimension_numbers<[1], [0], [0], [1], [0, 0, 1, 1], [], []>} : vector<1x32xf32>, vector<32x128xf32>, vector<1x128xf32> -> vector<1x128xf32>
      %61 = arith.addf %59, %60 : vector<1x128xf32>
      %c0_32 = arith.constant 0 : index
      %c0_33 = arith.constant 0 : index
      %62 = vector.load %arg24[%c0_32, %c0_33] : memref<1x128xf32, #tpu.memory_space<vmem>>, vector<1x128xf32>
      tpu.vector_store %arg24[%c0_32, %c0_33], %61 {strides = array<i32>} : memref<1x128xf32, #tpu.memory_space<vmem>>, vector<1x128xf32>,
      %c0_34 = arith.constant 0 : index
      %c0_35 = arith.constant 0 : index
      %63 = vector.load %arg25[%c0_34, %c0_35] : memref<1x128xf32, #tpu.memory_space<vmem>>, vector<1x128xf32>
      %64 = arith.mulf %58, %58 : vector<32x128xf32>
      %cst_36 = arith.constant dense<0.000000e+00> : vector<1x128xf32>
      %65 = tpu.matmul %15, %64, %cst_36 {dimension_numbers = #tpu.dot_dimension_numbers<[1], [0], [0], [1], [0, 0, 1, 1], [], []>} : vector<1x32xf32>, vector<32x128xf32>, vector<1x128xf32> -> vector<1x128xf32>
      %66 = arith.addf %63, %65 : vector<1x128xf32>
      %c0_37 = arith.constant 0 : index
      %c0_38 = arith.constant 0 : index
      %67 = vector.load %arg25[%c0_37, %c0_38] : memref<1x128xf32, #tpu.memory_space<vmem>>, vector<1x128xf32>
      tpu.vector_store %arg25[%c0_37, %c0_38], %66 {strides = array<i32>} : memref<1x128xf32, #tpu.memory_space<vmem>>, vector<1x128xf32>,
    } else {
    }
    %c2_i32_8 = arith.constant 2 : i32
    %26 = arith.cmpi eq, %arg0, %c2_i32_8 : i32
    %27 = arith.extui %26 : i1 to i32
    %c0_i32_9 = arith.constant 0 : i32
    %28 = arith.cmpi ne, %27, %c0_i32_9 : i32
    scf.if %28 {
      %c0_12 = arith.constant 0 : index
      %c0_13 = arith.constant 0 : index
      %33 = vector.load %arg24[%c0_12, %c0_13] : memref<1x128xf32, #tpu.memory_space<vmem>>, vector<1x128xf32>
      %cst = arith.constant 3.125000e-03 : f32
      %34 = vector.broadcast %cst : f32 to vector<1x128xf32>
      %35 = arith.mulf %33, %34 : vector<1x128xf32>
      %c0_14 = arith.constant 0 : index
      %c0_15 = arith.constant 0 : index
      %36 = vector.load %arg25[%c0_14, %c0_15] : memref<1x128xf32, #tpu.memory_space<vmem>>, vector<1x128xf32>
      %cst_16 = arith.constant 3.125000e-03 : f32
      %37 = vector.broadcast %cst_16 : f32 to vector<1x128xf32>
      %38 = arith.mulf %36, %37 : vector<1x128xf32>
      %39 = arith.mulf %35, %35 : vector<1x128xf32>
      %40 = arith.subf %38, %39 : vector<1x128xf32>
      %c0_17 = arith.constant 0 : index
      %c0_18 = arith.constant 0 : index
      %41 = vector.load %arg8[%c0_17, %c0_18] : memref<1x128xf32, #tpu.memory_space<vmem>>, vector<1x128xf32>
      %cst_19 = arith.constant 9.99999974E-6 : f32
      %42 = vector.broadcast %cst_19 : f32 to vector<1x128xf32>
      %43 = arith.addf %40, %42 : vector<1x128xf32>
      %44 = math.rsqrt %43 : vector<1x128xf32>
      %45 = arith.mulf %41, %44 : vector<1x128xf32>
      %c0_20 = arith.constant 0 : index
      %c0_21 = arith.constant 0 : index
      %46 = vector.load %arg9[%c0_20, %c0_21] : memref<1x128xf32, #tpu.memory_space<vmem>>, vector<1x128xf32>
      %47 = arith.mulf %35, %45 : vector<1x128xf32>
      %48 = arith.subf %46, %47 : vector<1x128xf32>
      %c0_22 = arith.constant 0 : index
      %c0_23 = arith.constant 0 : index
      %49 = vector.load %arg22[%c0_22, %c0_23] : memref<1x64xf32, #tpu.memory_space<vmem>>, vector<1x64xf32>
      %cst_24 = arith.constant 3.125000e-03 : f32
      %50 = vector.broadcast %cst_24 : f32 to vector<1x64xf32>
      %51 = arith.mulf %49, %50 : vector<1x64xf32>
      %c0_25 = arith.constant 0 : index
      %c0_26 = arith.constant 0 : index
      %52 = vector.load %arg23[%c0_25, %c0_26] : memref<1x64xf32, #tpu.memory_space<vmem>>, vector<1x64xf32>
      %cst_27 = arith.constant 3.125000e-03 : f32
      %53 = vector.broadcast %cst_27 : f32 to vector<1x64xf32>
      %54 = arith.mulf %52, %53 : vector<1x64xf32>
      %55 = arith.mulf %51, %51 : vector<1x64xf32>
      %56 = arith.subf %54, %55 : vector<1x64xf32>
      %c0_28 = arith.constant 0 : index
      %c0_29 = arith.constant 0 : index
      %57 = vector.load %arg5[%c0_28, %c0_29] : memref<1x64xf32, #tpu.memory_space<vmem>>, vector<1x64xf32>
      %cst_30 = arith.constant 9.99999974E-6 : f32
      %58 = vector.broadcast %cst_30 : f32 to vector<1x64xf32>
      %59 = arith.addf %56, %58 : vector<1x64xf32>
      %60 = math.rsqrt %59 : vector<1x64xf32>
      %61 = arith.mulf %57, %60 : vector<1x64xf32>
      %c0_31 = arith.constant 0 : index
      %c0_32 = arith.constant 0 : index
      %62 = vector.load %arg6[%c0_31, %c0_32] : memref<1x64xf32, #tpu.memory_space<vmem>>, vector<1x64xf32>
      %63 = arith.mulf %51, %61 : vector<1x64xf32>
      %64 = arith.subf %62, %63 : vector<1x64xf32>
      %c0_33 = arith.constant 0 : index
      %c0_34 = arith.constant 0 : index
      %65 = vector.load %arg4[%c0_33, %c0_34] : memref<8x64xf32, #tpu.memory_space<vmem>>, vector<8x64xf32>
      %cst_35 = arith.constant dense<0.000000e+00> : vector<32x64xf32>
      %66 = tpu.matmul %7, %65, %cst_35 {dimension_numbers = #tpu.dot_dimension_numbers<[1], [0], [0], [1], [0, 0, 1, 1], [], []>} : vector<32x8xf32>, vector<8x64xf32>, vector<32x64xf32> -> vector<32x64xf32>
      %67 = vector.broadcast %61 : vector<1x64xf32> to vector<32x64xf32>
      %68 = arith.mulf %66, %67 : vector<32x64xf32>
      %69 = vector.broadcast %64 : vector<1x64xf32> to vector<32x64xf32>
      %70 = arith.addf %68, %69 : vector<32x64xf32>
      %cst_36 = arith.constant 0.000000e+00 : f32
      %71 = vector.broadcast %cst_36 : f32 to vector<32x64xf32>
      %72 = arith.maximumf %70, %71 : vector<32x64xf32>
      %c0_37 = arith.constant 0 : index
      %c0_38 = arith.constant 0 : index
      %73 = vector.load %arg7[%c0_37, %c0_38] : memref<64x128xf32, #tpu.memory_space<vmem>>, vector<64x128xf32>
      %cst_39 = arith.constant dense<0.000000e+00> : vector<32x128xf32>
      %74 = tpu.matmul %72, %73, %cst_39 {dimension_numbers = #tpu.dot_dimension_numbers<[1], [0], [0], [1], [0, 0, 1, 1], [], []>} : vector<32x64xf32>, vector<64x128xf32>, vector<32x128xf32> -> vector<32x128xf32>
      %75 = vector.broadcast %45 : vector<1x128xf32> to vector<32x128xf32>
      %76 = arith.mulf %74, %75 : vector<32x128xf32>
      %77 = vector.broadcast %48 : vector<1x128xf32> to vector<32x128xf32>
      %78 = arith.addf %76, %77 : vector<32x128xf32>
      %cst_40 = arith.constant 0.000000e+00 : f32
      %79 = vector.broadcast %cst_40 : f32 to vector<32x128xf32>
      %80 = arith.maximumf %78, %79 : vector<32x128xf32>
      %c0_41 = arith.constant 0 : index
      %c0_42 = arith.constant 0 : index
      %81 = vector.load %arg10[%c0_41, %c0_42] : memref<128x1024xf32, #tpu.memory_space<vmem>>, vector<128x1024xf32>
      %cst_43 = arith.constant dense<0.000000e+00> : vector<32x1024xf32>
      %82 = tpu.matmul %80, %81, %cst_43 {dimension_numbers = #tpu.dot_dimension_numbers<[1], [0], [0], [1], [0, 0, 1, 1], [], []>} : vector<32x128xf32>, vector<128x1024xf32>, vector<32x1024xf32> -> vector<32x1024xf32>
      %c0_44 = arith.constant 0 : index
      %c0_45 = arith.constant 0 : index
      %83 = vector.load %arg26[%c0_44, %c0_45] : memref<1x1024xf32, #tpu.memory_space<vmem>>, vector<1x1024xf32>
      %cst_46 = arith.constant dense<0.000000e+00> : vector<1x1024xf32>
      %84 = tpu.matmul %15, %82, %cst_46 {dimension_numbers = #tpu.dot_dimension_numbers<[1], [0], [0], [1], [0, 0, 1, 1], [], []>} : vector<1x32xf32>, vector<32x1024xf32>, vector<1x1024xf32> -> vector<1x1024xf32>
      %85 = arith.addf %83, %84 : vector<1x1024xf32>
      %c0_47 = arith.constant 0 : index
      %c0_48 = arith.constant 0 : index
      %86 = vector.load %arg26[%c0_47, %c0_48] : memref<1x1024xf32, #tpu.memory_space<vmem>>, vector<1x1024xf32>
      tpu.vector_store %arg26[%c0_47, %c0_48], %85 {strides = array<i32>} : memref<1x1024xf32, #tpu.memory_space<vmem>>, vector<1x1024xf32>,
      %c0_49 = arith.constant 0 : index
      %c0_50 = arith.constant 0 : index
      %87 = vector.load %arg27[%c0_49, %c0_50] : memref<1x1024xf32, #tpu.memory_space<vmem>>, vector<1x1024xf32>
      %88 = arith.mulf %82, %82 : vector<32x1024xf32>
      %cst_51 = arith.constant dense<0.000000e+00> : vector<1x1024xf32>
      %89 = tpu.matmul %15, %88, %cst_51 {dimension_numbers = #tpu.dot_dimension_numbers<[1], [0], [0], [1], [0, 0, 1, 1], [], []>} : vector<1x32xf32>, vector<32x1024xf32>, vector<1x1024xf32> -> vector<1x1024xf32>
      %90 = arith.addf %87, %89 : vector<1x1024xf32>
      %c0_52 = arith.constant 0 : index
      %c0_53 = arith.constant 0 : index
      %91 = vector.load %arg27[%c0_52, %c0_53] : memref<1x1024xf32, #tpu.memory_space<vmem>>, vector<1x1024xf32>
      tpu.vector_store %arg27[%c0_52, %c0_53], %90 {strides = array<i32>} : memref<1x1024xf32, #tpu.memory_space<vmem>>, vector<1x1024xf32>,
      %cst_54 = arith.constant dense<0xFF800000> : vector<1024xf32>
      %92 = vector.multi_reduction <maximumf>, %82, %cst_54 [0] : vector<32x1024xf32> to vector<1024xf32>
      %93 = vector.shape_cast %92 : vector<1024xf32> to vector<1x1024xf32>
      %cst_55 = arith.constant dense<0x7F800000> : vector<1024xf32>
      %94 = vector.multi_reduction <minimumf>, %82, %cst_55 [0] : vector<32x1024xf32> to vector<1024xf32>
      %95 = vector.shape_cast %94 : vector<1024xf32> to vector<1x1024xf32>
      %c0_i32_56 = arith.constant 0 : i32
      %96 = arith.cmpi eq, %arg2, %c0_i32_56 : i32
      %97 = arith.extui %96 : i1 to i32
      %c0_i32_57 = arith.constant 0 : i32
      %98 = arith.cmpi ne, %97, %c0_i32_57 : i32
      scf.if %98 {
        %c0_62 = arith.constant 0 : index
        %c0_63 = arith.constant 0 : index
        %105 = vector.load %arg28[%c0_62, %c0_63] : memref<1x1024xf32, #tpu.memory_space<vmem>>, vector<1x1024xf32>
        tpu.vector_store %arg28[%c0_62, %c0_63], %93 {strides = array<i32>} : memref<1x1024xf32, #tpu.memory_space<vmem>>, vector<1x1024xf32>,
        %c0_64 = arith.constant 0 : index
        %c0_65 = arith.constant 0 : index
        %106 = vector.load %arg29[%c0_64, %c0_65] : memref<1x1024xf32, #tpu.memory_space<vmem>>, vector<1x1024xf32>
        tpu.vector_store %arg29[%c0_64, %c0_65], %95 {strides = array<i32>} : memref<1x1024xf32, #tpu.memory_space<vmem>>, vector<1x1024xf32>,
      } else {
      }
      %c0_i32_58 = arith.constant 0 : i32
      %99 = arith.cmpi sgt, %arg2, %c0_i32_58 : i32
      %100 = arith.extui %99 : i1 to i32
      %c0_i32_59 = arith.constant 0 : i32
      %101 = arith.cmpi ne, %100, %c0_i32_59 : i32
      scf.if %101 {
        %c0_62 = arith.constant 0 : index
        %c0_63 = arith.constant 0 : index
        %105 = vector.load %arg28[%c0_62, %c0_63] : memref<1x1024xf32, #tpu.memory_space<vmem>>, vector<1x1024xf32>
        %106 = arith.maximumf %105, %93 : vector<1x1024xf32>
        %c0_64 = arith.constant 0 : index
        %c0_65 = arith.constant 0 : index
        %107 = vector.load %arg28[%c0_64, %c0_65] : memref<1x1024xf32, #tpu.memory_space<vmem>>, vector<1x1024xf32>
        tpu.vector_store %arg28[%c0_64, %c0_65], %106 {strides = array<i32>} : memref<1x1024xf32, #tpu.memory_space<vmem>>, vector<1x1024xf32>,
        %c0_66 = arith.constant 0 : index
        %c0_67 = arith.constant 0 : index
        %108 = vector.load %arg29[%c0_66, %c0_67] : memref<1x1024xf32, #tpu.memory_space<vmem>>, vector<1x1024xf32>
        %109 = arith.minimumf %108, %95 : vector<1x1024xf32>
        %c0_68 = arith.constant 0 : index
        %c0_69 = arith.constant 0 : index
        %110 = vector.load %arg29[%c0_68, %c0_69] : memref<1x1024xf32, #tpu.memory_space<vmem>>, vector<1x1024xf32>
        tpu.vector_store %arg29[%c0_68, %c0_69], %109 {strides = array<i32>} : memref<1x1024xf32, #tpu.memory_space<vmem>>, vector<1x1024xf32>,
      } else {
      }
      %c2_i32_60 = arith.constant 2 : i32
      %102 = arith.cmpi eq, %arg2, %c2_i32_60 : i32
      %103 = arith.extui %102 : i1 to i32
      %c0_i32_61 = arith.constant 0 : i32
      %104 = arith.cmpi ne, %103, %c0_i32_61 : i32
      scf.if %104 {
        %105 = tpu.iota {dimensions = array<i32: 0>} : vector<4x1xi32>
        %106 = vector.broadcast %arg1 : i32 to vector<4x1xi32>
        %107 = arith.cmpi eq, %105, %106 : vector<4x1xi32>
        %c0_62 = arith.constant 0 : index
        %c0_63 = arith.constant 0 : index
        %108 = vector.load %arg28[%c0_62, %c0_63] : memref<1x1024xf32, #tpu.memory_space<vmem>>, vector<1x1024xf32>
        %c0_64 = arith.constant 0 : index
        %c0_65 = arith.constant 0 : index
        %109 = vector.load %arg30[%c0_64, %c0_65] : memref<4x1024xf32, #tpu.memory_space<vmem>>, vector<4x1024xf32>
        %110 = vector.shape_cast %107 : vector<4x1xi1> to vector<4x1xi1>
        %111 = vector.broadcast %110 : vector<4x1xi1> to vector<4x1024xi1>
        %112 = vector.shape_cast %108 : vector<1x1024xf32> to vector<1x1024xf32>
        %113 = vector.broadcast %112 : vector<1x1024xf32> to vector<4x1024xf32>
        %114 = arith.select %111, %113, %109 : vector<4x1024xi1>, vector<4x1024xf32>
        %c0_66 = arith.constant 0 : index
        %c0_67 = arith.constant 0 : index
        %115 = vector.load %arg30[%c0_66, %c0_67] : memref<4x1024xf32, #tpu.memory_space<vmem>>, vector<4x1024xf32>
        tpu.vector_store %arg30[%c0_66, %c0_67], %114 {strides = array<i32>} : memref<4x1024xf32, #tpu.memory_space<vmem>>, vector<4x1024xf32>,
        %c0_68 = arith.constant 0 : index
        %c0_69 = arith.constant 0 : index
        %116 = vector.load %arg29[%c0_68, %c0_69] : memref<1x1024xf32, #tpu.memory_space<vmem>>, vector<1x1024xf32>
        %c0_70 = arith.constant 0 : index
        %c0_71 = arith.constant 0 : index
        %117 = vector.load %arg31[%c0_70, %c0_71] : memref<4x1024xf32, #tpu.memory_space<vmem>>, vector<4x1024xf32>
        %118 = vector.shape_cast %107 : vector<4x1xi1> to vector<4x1xi1>
        %119 = vector.broadcast %118 : vector<4x1xi1> to vector<4x1024xi1>
        %120 = vector.shape_cast %116 : vector<1x1024xf32> to vector<1x1024xf32>
        %121 = vector.broadcast %120 : vector<1x1024xf32> to vector<4x1024xf32>
        %122 = arith.select %119, %121, %117 : vector<4x1024xi1>, vector<4x1024xf32>
        %c0_72 = arith.constant 0 : index
        %c0_73 = arith.constant 0 : index
        %123 = vector.load %arg31[%c0_72, %c0_73] : memref<4x1024xf32, #tpu.memory_space<vmem>>, vector<4x1024xf32>
        tpu.vector_store %arg31[%c0_72, %c0_73], %122 {strides = array<i32>} : memref<4x1024xf32, #tpu.memory_space<vmem>>, vector<4x1024xf32>,
      } else {
      }
    } else {
    }
    %c2_i32_10 = arith.constant 2 : i32
    %29 = arith.cmpi eq, %arg0, %c2_i32_10 : i32
    %30 = arith.andi %29, %5 : i1
    %31 = arith.extui %30 : i1 to i32
    %c0_i32_11 = arith.constant 0 : i32
    %32 = arith.cmpi ne, %31, %c0_i32_11 : i32
    scf.if %32 {
      %c0_12 = arith.constant 0 : index
      %c0_13 = arith.constant 0 : index
      %33 = vector.load %arg26[%c0_12, %c0_13] : memref<1x1024xf32, #tpu.memory_space<vmem>>, vector<1x1024xf32>
      %cst = arith.constant 3.125000e-03 : f32
      %34 = vector.broadcast %cst : f32 to vector<1x1024xf32>
      %35 = arith.mulf %33, %34 : vector<1x1024xf32>
      %c0_14 = arith.constant 0 : index
      %c0_15 = arith.constant 0 : index
      %36 = vector.load %arg27[%c0_14, %c0_15] : memref<1x1024xf32, #tpu.memory_space<vmem>>, vector<1x1024xf32>
      %cst_16 = arith.constant 3.125000e-03 : f32
      %37 = vector.broadcast %cst_16 : f32 to vector<1x1024xf32>
      %38 = arith.mulf %36, %37 : vector<1x1024xf32>
      %39 = arith.mulf %35, %35 : vector<1x1024xf32>
      %40 = arith.subf %38, %39 : vector<1x1024xf32>
      %c0_17 = arith.constant 0 : index
      %c0_18 = arith.constant 0 : index
      %41 = vector.load %arg11[%c0_17, %c0_18] : memref<1x1024xf32, #tpu.memory_space<vmem>>, vector<1x1024xf32>
      %cst_19 = arith.constant 9.99999974E-6 : f32
      %42 = vector.broadcast %cst_19 : f32 to vector<1x1024xf32>
      %43 = arith.addf %40, %42 : vector<1x1024xf32>
      %44 = math.rsqrt %43 : vector<1x1024xf32>
      %45 = arith.mulf %41, %44 : vector<1x1024xf32>
      %c0_20 = arith.constant 0 : index
      %c0_21 = arith.constant 0 : index
      %46 = vector.load %arg12[%c0_20, %c0_21] : memref<1x1024xf32, #tpu.memory_space<vmem>>, vector<1x1024xf32>
      %47 = arith.mulf %35, %45 : vector<1x1024xf32>
      %48 = arith.subf %46, %47 : vector<1x1024xf32>
      %c0_22 = arith.constant 0 : index
      %c0_23 = arith.constant 0 : index
      %49 = vector.load %arg30[%c0_22, %c0_23] : memref<4x1024xf32, #tpu.memory_space<vmem>>, vector<4x1024xf32>
      %50 = vector.broadcast %45 : vector<1x1024xf32> to vector<4x1024xf32>
      %51 = arith.mulf %49, %50 : vector<4x1024xf32>
      %52 = vector.broadcast %48 : vector<1x1024xf32> to vector<4x1024xf32>
      %53 = arith.addf %51, %52 : vector<4x1024xf32>
      %c0_24 = arith.constant 0 : index
      %c0_25 = arith.constant 0 : index
      %54 = vector.load %arg31[%c0_24, %c0_25] : memref<4x1024xf32, #tpu.memory_space<vmem>>, vector<4x1024xf32>
      %55 = vector.broadcast %45 : vector<1x1024xf32> to vector<4x1024xf32>
      %56 = arith.mulf %54, %55 : vector<4x1024xf32>
      %57 = vector.broadcast %48 : vector<1x1024xf32> to vector<4x1024xf32>
      %58 = arith.addf %56, %57 : vector<4x1024xf32>
      %59 = arith.maximumf %53, %58 : vector<4x1024xf32>
      %cst_26 = arith.constant 0.000000e+00 : f32
      %60 = vector.broadcast %cst_26 : f32 to vector<4x1024xf32>
      %61 = arith.maximumf %59, %60 : vector<4x1024xf32>
      %c0_27 = arith.constant 0 : index
      %c0_28 = arith.constant 0 : index
      %62 = vector.load %arg13[%c0_27, %c0_28] : memref<1024x512xf32, #tpu.memory_space<vmem>>, vector<1024x512xf32>
      %cst_29 = arith.constant dense<0.000000e+00> : vector<4x512xf32>
      %63 = tpu.matmul %61, %62, %cst_29 {dimension_numbers = #tpu.dot_dimension_numbers<[1], [0], [0], [1], [0, 0, 1, 1], [], []>} : vector<4x1024xf32>, vector<1024x512xf32>, vector<4x512xf32> -> vector<4x512xf32>
      %cst_30 = arith.constant dense<0.000000e+00> : vector<512xf32>
      %64 = vector.multi_reduction <add>, %63, %cst_30 [0] : vector<4x512xf32> to vector<512xf32>
      %65 = vector.shape_cast %64 : vector<512xf32> to vector<1x512xf32>
      %cst_31 = arith.constant 2.500000e-01 : f32
      %66 = vector.broadcast %cst_31 : f32 to vector<1x512xf32>
      %67 = arith.mulf %65, %66 : vector<1x512xf32>
      %68 = arith.mulf %63, %63 : vector<4x512xf32>
      %cst_32 = arith.constant dense<0.000000e+00> : vector<512xf32>
      %69 = vector.multi_reduction <add>, %68, %cst_32 [0] : vector<4x512xf32> to vector<512xf32>
      %70 = vector.shape_cast %69 : vector<512xf32> to vector<1x512xf32>
      %cst_33 = arith.constant 2.500000e-01 : f32
      %71 = vector.broadcast %cst_33 : f32 to vector<1x512xf32>
      %72 = arith.mulf %70, %71 : vector<1x512xf32>
      %73 = arith.mulf %67, %67 : vector<1x512xf32>
      %74 = arith.subf %72, %73 : vector<1x512xf32>
      %c0_34 = arith.constant 0 : index
      %c0_35 = arith.constant 0 : index
      %75 = vector.load %arg14[%c0_34, %c0_35] : memref<1x512xf32, #tpu.memory_space<vmem>>, vector<1x512xf32>
      %cst_36 = arith.constant 9.99999974E-6 : f32
      %76 = vector.broadcast %cst_36 : f32 to vector<1x512xf32>
      %77 = arith.addf %74, %76 : vector<1x512xf32>
      %78 = math.rsqrt %77 : vector<1x512xf32>
      %79 = arith.mulf %75, %78 : vector<1x512xf32>
      %c0_37 = arith.constant 0 : index
      %c0_38 = arith.constant 0 : index
      %80 = vector.load %arg15[%c0_37, %c0_38] : memref<1x512xf32, #tpu.memory_space<vmem>>, vector<1x512xf32>
      %81 = arith.mulf %67, %79 : vector<1x512xf32>
      %82 = arith.subf %80, %81 : vector<1x512xf32>
      %83 = vector.broadcast %79 : vector<1x512xf32> to vector<4x512xf32>
      %84 = arith.mulf %63, %83 : vector<4x512xf32>
      %85 = vector.broadcast %82 : vector<1x512xf32> to vector<4x512xf32>
      %86 = arith.addf %84, %85 : vector<4x512xf32>
      %cst_39 = arith.constant 0.000000e+00 : f32
      %87 = vector.broadcast %cst_39 : f32 to vector<4x512xf32>
      %88 = arith.maximumf %86, %87 : vector<4x512xf32>
      %c0_40 = arith.constant 0 : index
      %c0_41 = arith.constant 0 : index
      %89 = vector.load %arg16[%c0_40, %c0_41] : memref<512x256xf32, #tpu.memory_space<vmem>>, vector<512x256xf32>
      %cst_42 = arith.constant dense<0.000000e+00> : vector<4x256xf32>
      %90 = tpu.matmul %88, %89, %cst_42 {dimension_numbers = #tpu.dot_dimension_numbers<[1], [0], [0], [1], [0, 0, 1, 1], [], []>} : vector<4x512xf32>, vector<512x256xf32>, vector<4x256xf32> -> vector<4x256xf32>
      %cst_43 = arith.constant dense<0.000000e+00> : vector<256xf32>
      %91 = vector.multi_reduction <add>, %90, %cst_43 [0] : vector<4x256xf32> to vector<256xf32>
      %92 = vector.shape_cast %91 : vector<256xf32> to vector<1x256xf32>
      %cst_44 = arith.constant 2.500000e-01 : f32
      %93 = vector.broadcast %cst_44 : f32 to vector<1x256xf32>
      %94 = arith.mulf %92, %93 : vector<1x256xf32>
      %95 = arith.mulf %90, %90 : vector<4x256xf32>
      %cst_45 = arith.constant dense<0.000000e+00> : vector<256xf32>
      %96 = vector.multi_reduction <add>, %95, %cst_45 [0] : vector<4x256xf32> to vector<256xf32>
      %97 = vector.shape_cast %96 : vector<256xf32> to vector<1x256xf32>
      %cst_46 = arith.constant 2.500000e-01 : f32
      %98 = vector.broadcast %cst_46 : f32 to vector<1x256xf32>
      %99 = arith.mulf %97, %98 : vector<1x256xf32>
      %100 = arith.mulf %94, %94 : vector<1x256xf32>
      %101 = arith.subf %99, %100 : vector<1x256xf32>
      %c0_47 = arith.constant 0 : index
      %c0_48 = arith.constant 0 : index
      %102 = vector.load %arg17[%c0_47, %c0_48] : memref<1x256xf32, #tpu.memory_space<vmem>>, vector<1x256xf32>
      %cst_49 = arith.constant 9.99999974E-6 : f32
      %103 = vector.broadcast %cst_49 : f32 to vector<1x256xf32>
      %104 = arith.addf %101, %103 : vector<1x256xf32>
      %105 = math.rsqrt %104 : vector<1x256xf32>
      %106 = arith.mulf %102, %105 : vector<1x256xf32>
      %c0_50 = arith.constant 0 : index
      %c0_51 = arith.constant 0 : index
      %107 = vector.load %arg18[%c0_50, %c0_51] : memref<1x256xf32, #tpu.memory_space<vmem>>, vector<1x256xf32>
      %108 = arith.mulf %94, %106 : vector<1x256xf32>
      %109 = arith.subf %107, %108 : vector<1x256xf32>
      %110 = vector.broadcast %106 : vector<1x256xf32> to vector<4x256xf32>
      %111 = arith.mulf %90, %110 : vector<4x256xf32>
      %112 = vector.broadcast %109 : vector<1x256xf32> to vector<4x256xf32>
      %113 = arith.addf %111, %112 : vector<4x256xf32>
      %cst_52 = arith.constant 0.000000e+00 : f32
      %114 = vector.broadcast %cst_52 : f32 to vector<4x256xf32>
      %115 = arith.maximumf %113, %114 : vector<4x256xf32>
      %c0_53 = arith.constant 0 : index
      %c0_54 = arith.constant 0 : index
      %116 = vector.load %arg19[%c0_53, %c0_54] : memref<256x128xf32, #tpu.memory_space<vmem>>, vector<256x128xf32>
      %cst_55 = arith.constant dense<0.000000e+00> : vector<4x128xf32>
      %117 = tpu.matmul %115, %116, %cst_55 {dimension_numbers = #tpu.dot_dimension_numbers<[1], [0], [0], [1], [0, 0, 1, 1], [], []>} : vector<4x256xf32>, vector<256x128xf32>, vector<4x128xf32> -> vector<4x128xf32>
      %c0_56 = arith.constant 0 : index
      %c0_57 = arith.constant 0 : index
      %118 = vector.load %arg20[%c0_56, %c0_57] : memref<1x128xf32, #tpu.memory_space<vmem>>, vector<1x128xf32>
      %119 = vector.broadcast %118 : vector<1x128xf32> to vector<4x128xf32>
      %120 = arith.addf %117, %119 : vector<4x128xf32>
      %c0_58 = arith.constant 0 : index
      %c0_59 = arith.constant 0 : index
      %121 = vector.load %arg21[%c0_58, %c0_59] : memref<4x128xf32, #tpu.memory_space<vmem>>, vector<4x128xf32>
      tpu.vector_store %arg21[%c0_58, %c0_59], %120 {strides = array<i32>} : memref<4x128xf32, #tpu.memory_space<vmem>>, vector<4x128xf32>,
    } else {
    }
    return
  }
  func.func @transform_0(%arg0: i32, %arg1: i32, %arg2: i32) -> (i32, i32, i32) {
    %c0_i32 = arith.constant 0 : i32
    %c0_i32_0 = arith.constant 0 : i32
    return %arg1, %arg2, %c0_i32 : i32, i32, i32
  }
  func.func @transform_1(%arg0: i32, %arg1: i32, %arg2: i32) -> (i32, i32) {
    %c0_i32 = arith.constant 0 : i32
    %c0_i32_0 = arith.constant 0 : i32
    %c0_i32_1 = arith.constant 0 : i32
    return %c0_i32, %c0_i32_0 : i32, i32
  }
  func.func @transform_2(%arg0: i32, %arg1: i32, %arg2: i32) -> (i32, i32) {
    %c0_i32 = arith.constant 0 : i32
    %c0_i32_0 = arith.constant 0 : i32
    %c0_i32_1 = arith.constant 0 : i32
    return %c0_i32, %c0_i32_0 : i32, i32
  }
  func.func @transform_3(%arg0: i32, %arg1: i32, %arg2: i32) -> (i32, i32) {
    %c0_i32 = arith.constant 0 : i32
    %c0_i32_0 = arith.constant 0 : i32
    %c0_i32_1 = arith.constant 0 : i32
    return %c0_i32, %c0_i32_0 : i32, i32
  }
  func.func @transform_4(%arg0: i32, %arg1: i32, %arg2: i32) -> (i32, i32) {
    %c0_i32 = arith.constant 0 : i32
    %c0_i32_0 = arith.constant 0 : i32
    %c0_i32_1 = arith.constant 0 : i32
    return %c0_i32, %c0_i32_0 : i32, i32
  }
  func.func @transform_5(%arg0: i32, %arg1: i32, %arg2: i32) -> (i32, i32) {
    %c0_i32 = arith.constant 0 : i32
    %c0_i32_0 = arith.constant 0 : i32
    %c0_i32_1 = arith.constant 0 : i32
    return %c0_i32, %c0_i32_0 : i32, i32
  }
  func.func @transform_6(%arg0: i32, %arg1: i32, %arg2: i32) -> (i32, i32) {
    %c0_i32 = arith.constant 0 : i32
    %c0_i32_0 = arith.constant 0 : i32
    %c0_i32_1 = arith.constant 0 : i32
    return %c0_i32, %c0_i32_0 : i32, i32
  }
  func.func @transform_7(%arg0: i32, %arg1: i32, %arg2: i32) -> (i32, i32) {
    %c0_i32 = arith.constant 0 : i32
    %c0_i32_0 = arith.constant 0 : i32
    %c0_i32_1 = arith.constant 0 : i32
    return %c0_i32, %c0_i32_0 : i32, i32
  }
  func.func @transform_8(%arg0: i32, %arg1: i32, %arg2: i32) -> (i32, i32) {
    %c0_i32 = arith.constant 0 : i32
    %c0_i32_0 = arith.constant 0 : i32
    %c0_i32_1 = arith.constant 0 : i32
    return %c0_i32, %c0_i32_0 : i32, i32
  }
  func.func @transform_9(%arg0: i32, %arg1: i32, %arg2: i32) -> (i32, i32) {
    %c0_i32 = arith.constant 0 : i32
    %c0_i32_0 = arith.constant 0 : i32
    %c0_i32_1 = arith.constant 0 : i32
    return %c0_i32, %c0_i32_0 : i32, i32
  }
  func.func @transform_10(%arg0: i32, %arg1: i32, %arg2: i32) -> (i32, i32) {
    %c0_i32 = arith.constant 0 : i32
    %c0_i32_0 = arith.constant 0 : i32
    %c0_i32_1 = arith.constant 0 : i32
    return %c0_i32, %c0_i32_0 : i32, i32
  }
  func.func @transform_11(%arg0: i32, %arg1: i32, %arg2: i32) -> (i32, i32) {
    %c0_i32 = arith.constant 0 : i32
    %c0_i32_0 = arith.constant 0 : i32
    %c0_i32_1 = arith.constant 0 : i32
    return %c0_i32, %c0_i32_0 : i32, i32
  }
  func.func @transform_12(%arg0: i32, %arg1: i32, %arg2: i32) -> (i32, i32) {
    %c0_i32 = arith.constant 0 : i32
    %c0_i32_0 = arith.constant 0 : i32
    %c0_i32_1 = arith.constant 0 : i32
    return %c0_i32, %c0_i32_0 : i32, i32
  }
  func.func @transform_13(%arg0: i32, %arg1: i32, %arg2: i32) -> (i32, i32) {
    %c0_i32 = arith.constant 0 : i32
    %c0_i32_0 = arith.constant 0 : i32
    %c0_i32_1 = arith.constant 0 : i32
    return %c0_i32, %c0_i32_0 : i32, i32
  }
  func.func @transform_14(%arg0: i32, %arg1: i32, %arg2: i32) -> (i32, i32) {
    %c0_i32 = arith.constant 0 : i32
    %c0_i32_0 = arith.constant 0 : i32
    %c0_i32_1 = arith.constant 0 : i32
    return %c0_i32, %c0_i32_0 : i32, i32
  }
  func.func @transform_15(%arg0: i32, %arg1: i32, %arg2: i32) -> (i32, i32) {
    %c0_i32 = arith.constant 0 : i32
    %c0_i32_0 = arith.constant 0 : i32
    %c0_i32_1 = arith.constant 0 : i32
    return %c0_i32, %c0_i32_0 : i32, i32
  }
  func.func @transform_16(%arg0: i32, %arg1: i32, %arg2: i32) -> (i32, i32) {
    %c0_i32 = arith.constant 0 : i32
    %c0_i32_0 = arith.constant 0 : i32
    %c0_i32_1 = arith.constant 0 : i32
    return %c0_i32, %c0_i32_0 : i32, i32
  }
  func.func @transform_17(%arg0: i32, %arg1: i32, %arg2: i32) -> (i32, i32) {
    %c0_i32 = arith.constant 0 : i32
    %c0_i32_0 = arith.constant 0 : i32
    %c0_i32_1 = arith.constant 0 : i32
    return %c0_i32, %c0_i32_0 : i32, i32
  }
  func.func @transform_18(%arg0: i32, %arg1: i32, %arg2: i32) -> (i32, i32) {
    %c0_i32 = arith.constant 0 : i32
    %c0_i32_0 = arith.constant 0 : i32
    %c0_i32_1 = arith.constant 0 : i32
    return %c0_i32, %c0_i32_0 : i32, i32
  }
}

</mosaic_0001>

<bundles_post_ra>
// kernel: stn3d_forward.1
= control target key start
LH: loop header
LB: loop body
LE: loop exit
PB: predicated region body
PF: predicated region fallthrough
CT: control target
= control target key end

     0   :  { %s6769_s0 = inlined_call_operand.vmem [shape: f32[4,96,8], index: 0, kind: input, shape index: {}]   ;;  %s6770_s1 = inlined_call_operand.hbm [shape: f32[8,64], index: 1, kind: input, shape index: {}]   ;;  %s6771_s2 = inlined_call_operand.hbm [shape: f32[1,64], index: 2, kind: input, shape index: {}]   ;;  %s6772_s3 = inlined_call_operand.hbm [shape: f32[1,64], index: 3, kind: input, shape index: {}]   ;;  %s6773_s4 = inlined_call_operand.hbm [shape: f32[64,128], index: 4, kind: input, shape index: {}]   ;;  %s6774_s5 = inlined_call_operand.hbm [shape: f32[1,128], index: 5, kind: input, shape index: {}]   ;;  %s6775_s6 = inlined_call_operand.hbm [shape: f32[1,128], index: 6, kind: input, shape index: {}]   ;;  %s6776_s7 = inlined_call_operand.hbm [shape: f32[128,1024], index: 7, kind: input, shape index: {}]   ;;  %s6777_s8 = inlined_call_operand.hbm [shape: f32[1,1024], index: 8, kind: input, shape index: {}]   ;;  %s6778_s9 = inlined_call_operand.hbm [shape: f32[1,1024], index: 9, kind: input, shape index: {}]   ;;  %s6779_s10 = inlined_call_operand.hbm [shape: f32[1024,512], index: 10, kind: input, shape index: {}]   ;;  %s6780_s11 = inlined_call_operand.hbm [shape: f32[1,512], index: 11, kind: input, shape index: {}]   ;;  %s6781_s12 = inlined_call_operand.hbm [shape: f32[1,512], index: 12, kind: input, shape index: {}]   ;;  %s6782_s13 = inlined_call_operand.hbm [shape: f32[512,256], index: 13, kind: input, shape index: {}]   ;;  %s6783_s14 = inlined_call_operand.hbm [shape: f32[1,256], index: 14, kind: input, shape index: {}]   ;;  %s6784_s15 = inlined_call_operand.hbm [shape: f32[1,256], index: 15, kind: input, shape index: {}]   ;;  %s6785_s16 = inlined_call_operand.hbm [shape: f32[256,128], index: 16, kind: input, shape index: {}]   ;;  %s6786_s17 = inlined_call_operand.hbm [shape: f32[1,128], index: 17, kind: input, shape index: {}]   ;;  %s6787_s18 = inlined_call_operand.vmem [shape: f32[4,128], index: 18, kind: output, shape index: {}]  }
   0x1   :  { %6796 = sst [smem:[#allocation55_spill]] %s6769_s0 }
   0x2   :  { %6797 = sst [smem:[#allocation56_spill]] %s6770_s1 }
   0x3   :  { %6798 = sst [smem:[#allocation57_spill]] %s6771_s2 }
   0x4   :  { %6799 = sst [smem:[#allocation58_spill]] %s6772_s3 }
   0x5   :  { %6800 = sst [smem:[#allocation59_spill]] %s6773_s4 }
   0x6   :  { %6801 = sst [smem:[#allocation60_spill]] %s6774_s5 }
   0x7   :  { %6802 = sst [smem:[#allocation61_spill]] %s6775_s6 }
   0x8   :  { %6803 = sst [smem:[#allocation62_spill]] %s6776_s7 }
   0x9   :  { %6804 = sst [smem:[#allocation63_spill]] %s6786_s17 }
   0xa   :  { %6805 = sst [smem:[#allocation64_spill]] %s6787_s18 }
   0xb   :  { %23 = vsyncpa [#allocation13], 0 }
   0xc   :  { %24 = vsyncpa [#allocation15], 0 }
   0xd   :  { %25 = vsyncpa [#allocation18], 0 }
   0xe   :  { %26 = vsyncpa [#allocation21], 0 }
   0xf   :  { %27 = vsyncpa [#allocation24], 0 }
  0x10   :  { %28 = vsyncpa [#allocation27], 0 }
  0x11   :  { %29 = vsyncpa [#allocation30], 0 }
  0x12   :  { %30 = vsyncpa [#allocation33], 0 }
  0x13   :  { %31 = vsyncpa [#allocation36], 0  ;;  %s5793_s27 = smov 0   ;;  %s5795_s28 = smov 0  }
  0x14   :  { %s5797_s29 = smov 0   ;;  %s5799_s30 = smov 0  }
  0x15   :  { %s5801_s0 = smov 0   ;;  %s5803_s19 = smov 0  }
  0x16   :  { %s5805_s1 = smov 0  }
  0x17 LB: > { %6806 = sst [smem:[#allocation47_spill]] %s5645_s27  ;;  %s4695_s23 = sadd.s32 4294967295, %s5669_s1   ;;  %s5669_s1 = sphi %s5805_s1, %s6865_s1   ;;  %s5665_s19 = sphi %s5803_s19, %s6864_s19   ;;  %s5661_s0 = sphi %s5801_s0, %s6863_s0   ;;  %s5657_s30 = sphi %s5799_s30, %s6862_s30   ;;  %s5653_s29 = sphi %s5797_s29, %s6861_s29   ;;  %s5649_s28 = sphi %s5795_s28, %s6860_s28   ;;  %s5645_s27 = sphi %s5793_s27, %s6859_s27  }
  0x18   : > { %6807 = sst [smem:[#allocation48_spill]] %s5649_s28  ;;  %p4696_p0 = scmp.ge.s32.totalorder %s5669_s1, 1 }
  0x19   : > { %6808 = sst [smem:[#allocation49_spill]] %s5653_s29  ;;  %p467_p1 = scmp.lt.s32.totalorder %s5669_s1, 37 }
  0x1a   : > { %6809 = sst [smem:[#allocation50_spill]] %s5669_s1  ;;  %p5834_p2 = scmp.eq.s32.totalorder %s4695_s23, 0 }
  0x1b   : > { %s6810_s22 = sld [smem:[#allocation57_spill]]  ;;  %p5838_p3 = pnand %p4696_p0, %p467_p1 }
  0x1c   : > { %s6811_s24 = scalar_select %p5834_p2, 1, 0 }
  0x1d   : > { %s6813_s25 = scalar_select %p5838_p3, 1, 0 }
  0x1e   : > { %6812 = sst [smem:[#allocation51_spill]] %s6811_s24  ;;  %s5671_s26 = smov [#allocation14]  }
  0x1f   : > { %6814 = sst [smem:[#allocation52_spill]] %s6813_s25  ;;  %s493_s20 = sshll.u32 %s5671_s26, 4  ;;  %s494_s20 = int_to_ptr.vmem [resolvable:$true] %s493_s20 }
  0x20   : > { %s6815_s4 = sld [smem:[#allocation59_spill]]  ;;  %p4871_p4 = pneg %p5838_p3 }
  0x21   : > { %s491_s2 = sshll.u32 %s6810_s22, 4  ;;  %s5672_s1 = smov [#allocation17]   ;;  %s492_s2 = int_to_ptr.hbm [resolvable:$true] %s491_s2 }
  0x22   : > { %p5849_p5 = pnand %p5834_p2, %p4871_p4  ;;  %s516_s29 = sshll.u32 %s5672_s1, 4  ;;  %s517_s29 = int_to_ptr.vmem [resolvable:$true] %s516_s29 }
  0x23   : > { %s6817_s6 = sld [smem:[#allocation61_spill]]  ;;  %s5673_s18 = smov 128  }
  0x24   : > { %4877 = dma.hbm_to_vmem [thread:$0]  (!%p5849_p5), %s492_s2, 16, %s494_s20, [#allocation15]  }
  0x25   : > { %s5674_s21 = smov 8   ;;  %s567_s17 = sshll.u32 %s6777_s8, 4  ;;  %s568_s17 = int_to_ptr.hbm [resolvable:$true] %s567_s17 }
  0x26   : > { %s514_s22 = sshll.u32 %s6815_s4, 4  ;;  %s5675_s4 = smov [#allocation20]   ;;  %s515_s22 = int_to_ptr.hbm [resolvable:$true] %s514_s22 }
  0x27   : > { %4883 = dma.hbm_to_vmem [thread:$0]  (!%p5849_p5), %s515_s22, 1024, %s517_s29, [#allocation18], %s5673_s18, %s5673_s18, %s5674_s21  }
  0x28   : > { %s543_s24 = sshll.u32 %s5675_s4, 4  ;;  %s590_s20 = sshll.u32 %s6779_s10, 4  ;;  %s544_s24 = int_to_ptr.vmem [resolvable:$true] %s543_s24  ;;  %s591_s20 = int_to_ptr.hbm [resolvable:$true] %s590_s20 }
  0x29   : > { %s541_s27 = sshll.u32 %s6817_s6, 4  ;;  %s5676_s26 = smov [#allocation23]   ;;  %s542_s27 = int_to_ptr.hbm [resolvable:$true] %s541_s27 }
  0x2a   : > { %4889 = dma.hbm_to_vmem [thread:$0]  (!%p5849_p5), %s542_s27, 16, %s544_s24, [#allocation21]  }
  0x2b   : > { %s569_s6 = sshll.u32 %s5676_s26, 4  ;;  %s5677_s4 = smov [#allocation26]   ;;  %s570_s6 = int_to_ptr.vmem [resolvable:$true] %s569_s6 }
  0x2c   : > { %4895 = dma.hbm_to_vmem [thread:$0]  (!%p5849_p5), %s568_s17, 128, %s570_s6, [#allocation24]  }
  0x2d   : > { %s592_s29 = sshll.u32 %s5677_s4, 4  ;;  %s5678_s25 = smov 512   ;;  %s593_s29 = int_to_ptr.vmem [resolvable:$true] %s592_s29 }
  0x2e   : > { %s5679_s22 = smov 32   ;;  %s617_s1 = sshll.u32 %s6781_s12, 4  ;;  %s618_s1 = int_to_ptr.hbm [resolvable:$true] %s617_s1 }
  0x2f   : > { %4901 = dma.hbm_to_vmem [thread:$0]  (!%p5849_p5), %s591_s20, 65536, %s593_s29, [#allocation27], %s5678_s25, %s5678_s25, %s5679_s22  }
  0x30   : > { %s5680_s28 = smov [#allocation29]   ;;  %s643_s17 = sshll.u32 %s6783_s14, 4  ;;  %s644_s17 = int_to_ptr.hbm [resolvable:$true] %s643_s17 }
  0x31   : > { %s619_s2 = sshll.u32 %s5680_s28, 4  ;;  %s5681_s20 = smov [#allocation32]   ;;  %s620_s2 = int_to_ptr.vmem [resolvable:$true] %s619_s2 }
  0x32   : > { %4907 = dma.hbm_to_vmem [thread:$0]  (!%p5849_p5), %s618_s1, 64, %s620_s2, [#allocation30]  }
  0x33   : > { %s645_s4 = sshll.u32 %s5681_s20, 4  ;;  %s666_s22 = sshll.u32 %s6785_s16, 4  ;;  %s646_s4 = int_to_ptr.vmem [resolvable:$true] %s645_s4  ;;  %s667_s22 = int_to_ptr.hbm [resolvable:$true] %s666_s22 }
  0x34   : > { %4913 = dma.hbm_to_vmem [thread:$0]  (!%p5849_p5), %s644_s17, 32, %s646_s4, [#allocation33]  }
  0x35   : > { %s5682_s27 = smov [#allocation35]   ;;  %s49_s1 = sadd.s32 1, %s5657_s30 }
  0x36   : > { %s668_s24 = sshll.u32 %s5682_s27, 4  ;;  %p50_p6 = scmp.ge.s32.totalorder %s49_s1, 3  ;;  %s669_s24 = int_to_ptr.vmem [resolvable:$true] %s668_s24 }
  0x37   : > { %4919 = dma.hbm_to_vmem [thread:$0]  (!%p5849_p5), %s667_s22, 4096, %s669_s24, [#allocation36], %s5673_s18, %s5673_s18, %s5674_s21  }
  0x38   : > { %s52_s28 = sadd.s32 1, %s5661_s0  ;;  %s56_s2 = sadd.s32 1, %s5665_s19 }
  0x39   : > { %s6818_s20 = sld [smem:[#allocation56_spill]]  ;;  %s6867_s1 = smov (%p50_p6, %s49_s1), 0 }
  0x3a   : > { %s6869_s28 = smov (!%p50_p6, %s52_s28), %s5661_s0  ;;  %s5683_s17 = smov [#allocation12]  }
  0x3b   : > { %p54_p7 = scmp.ge.s32.totalorder %s6869_s28, 4  ;;  %s481_s4 = sshll.u32 %s5683_s17, 4  ;;  %s482_s4 = int_to_ptr.vmem [resolvable:$true] %s481_s4 }
  0x3c   : > { %s6819_s3 = sld [smem:[#allocation58_spill]]  ;;  %s5684_s26 = smov [#allocation16]  }
  0x3d   : > { %s6871_s28 = smov (%p54_p7, %s6869_s28), 0  ;;  %s6873_s2 = smov (!%p54_p7, %s56_s2), %s5665_s19 }
  0x3e   : > { %p58_p8 = scmp.ge.s32.totalorder %s6873_s2, 3  ;;  %s6820_s5 = sld [smem:[#allocation60_spill]] }
  0x3f   : > { %s479_s29 = sshll.u32 %s6818_s20, 4  ;;  %s505_s6 = sshll.u32 %s5684_s26, 4  ;;  %s480_s29 = int_to_ptr.hbm [resolvable:$true] %s479_s29  ;;  %s506_s6 = int_to_ptr.vmem [resolvable:$true] %s505_s6 }
  0x40   : > { %4874 = dma.hbm_to_vmem [thread:$0]  (!%p5849_p5), %s480_s29, 128, %s482_s4, [#allocation13]  }
  0x41   : > { %s6875_s2 = smov (%p58_p8, %s6873_s2), 0  ;;  %s5685_s20 = smov [#allocation19]  }
  0x42   : > { %s503_s21 = sshll.u32 %s6819_s3, 4  ;;  %s531_s17 = sshll.u32 %s5685_s20, 4  ;;  %s504_s21 = int_to_ptr.hbm [resolvable:$true] %s503_s21  ;;  %s532_s17 = int_to_ptr.vmem [resolvable:$true] %s531_s17 }
  0x43   : > { %4880 = dma.hbm_to_vmem [thread:$0]  (!%p5849_p5), %s504_s21, 16, %s506_s6, [#allocation15]  }
  0x44   : > { %s529_s24 = sshll.u32 %s6820_s5, 4  ;;  %s6821_s7 = sld [smem:[#allocation62_spill]]  ;;  %s530_s24 = int_to_ptr.hbm [resolvable:$true] %s529_s24 }
  0x45   : > { %4886 = dma.hbm_to_vmem [thread:$0]  (!%p5849_p5), %s530_s24, 16, %s532_s17, [#allocation18]  }
  0x46   : > { %s5686_s4 = smov [#allocation22]   ;;  %s579_s3 = sshll.u32 %s6778_s9, 4  ;;  %s580_s3 = int_to_ptr.hbm [resolvable:$true] %s579_s3 }
  0x47   : > { %s554_s22 = sshll.u32 %s5686_s4, 4  ;;  %s5687_s21 = smov 1024   ;;  %s555_s22 = int_to_ptr.vmem [resolvable:$true] %s554_s22 }
  0x48   : > { %s5688_s6 = smov 64   ;;  %s5689_s20 = smov [#allocation25]  }
  0x49   : > { %s581_s25 = sshll.u32 %s5689_s20, 4  ;;  %s605_s24 = sshll.u32 %s6780_s11, 4  ;;  %s582_s25 = int_to_ptr.vmem [resolvable:$true] %s581_s25  ;;  %s606_s24 = int_to_ptr.hbm [resolvable:$true] %s605_s24 }
  0x4a   : > { %s552_s29 = sshll.u32 %s6821_s7, 4  ;;  %s628_s27 = sshll.u32 %s6782_s13, 4  ;;  %s553_s29 = int_to_ptr.hbm [resolvable:$true] %s552_s29  ;;  %s629_s27 = int_to_ptr.hbm [resolvable:$true] %s628_s27 }
  0x4b   : > { %4892 = dma.hbm_to_vmem [thread:$0]  (!%p5849_p5), %s553_s29, 16384, %s555_s22, [#allocation21], %s5687_s21, %s5687_s21, %s5688_s6  }
  0x4c   : > { %4898 = dma.hbm_to_vmem [thread:$0]  (!%p5849_p5), %s580_s3, 128, %s582_s25, [#allocation24]  }
  0x4d   : > { %s5690_s26 = smov [#allocation28]   ;;  %s5691_s29 = smov [#allocation31]  }
  0x4e   : > { %s607_s7 = sshll.u32 %s5690_s26, 4  ;;  %s630_s22 = sshll.u32 %s5691_s29, 4  ;;  %s608_s7 = int_to_ptr.vmem [resolvable:$true] %s607_s7  ;;  %s631_s22 = int_to_ptr.vmem [resolvable:$true] %s630_s22 }
  0x4f   : > { %4904 = dma.hbm_to_vmem [thread:$0]  (!%p5849_p5), %s606_s24, 64, %s608_s7, [#allocation27]  }
  0x50   : > { %s5692_s5 = smov 256   ;;  %s5693_s21 = smov 16  }
  0x51   : > { %4910 = dma.hbm_to_vmem [thread:$0]  (!%p5849_p5), %s629_s27, 16384, %s631_s22, [#allocation30], %s5692_s5, %s5692_s5, %s5693_s21  }
  0x52   : > { %s655_s20 = sshll.u32 %s6784_s15, 4  ;;  %s5694_s25 = smov [#allocation34]   ;;  %s656_s20 = int_to_ptr.hbm [resolvable:$true] %s655_s20 }
  0x53   : > { %s657_s18 = sshll.u32 %s5694_s25, 4  ;;  %s6822_s26 = sld [smem:[#allocation63_spill]]  ;;  %s658_s18 = int_to_ptr.vmem [resolvable:$true] %s657_s18 }
  0x54   : > { %4916 = dma.hbm_to_vmem [thread:$0]  (!%p5849_p5), %s656_s20, 32, %s658_s18, [#allocation33]  }
  0x55   : > { %s5695_s24 = smov [#allocation37]  }
  0x56   : > { %s683_s29 = sshll.u32 %s5695_s24, 4  ;;  %709 = sbr.rel (%p5838_p3) target bundleno = 2552 (0x9f8), region = 92  ;;  %s684_s29 = int_to_ptr.vmem [resolvable:$true] %s683_s29 }
  0x59   : > { %s681_s7 = sshll.u32 %s6822_s26, 4  ;;  %s682_s7 = int_to_ptr.hbm [resolvable:$true] %s681_s7 }
  0x5a   : > { %4922 = dma.hbm_to_vmem [thread:$0]  (!%p5849_p5), %s682_s7, 16, %s684_s29, [#allocation36]  }
  0x5b   : > { %5608 = dma.done.wait (%p5834_p2), [#allocation13], 128  }
  0x5c   : > { %5610 = vsyncadd (%p5834_p2), [#allocation13], 4294967168 }
  0x5d   : > { %5612 = dma.done.wait (%p5834_p2), [#allocation15], 32  }
  0x5e   : > { %5614 = vsyncadd (%p5834_p2), [#allocation15], 4294967264 }
  0x5f   : > { %5616 = dma.done.wait (%p5834_p2), [#allocation18], 1040  }
  0x60   : > { %5618 = vsyncadd (%p5834_p2), [#allocation18], 4294966256 }
  0x61   : > { %5620 = dma.done.wait (%p5834_p2), [#allocation21], 16400  }
  0x62   : > { %5622 = vsyncadd (%p5834_p2), [#allocation21], 4294950896 }
  0x63   : > { %5624 = dma.done.wait (%p5834_p2), [#allocation24], 256  }
  0x64   : > { %5626 = vsyncadd (%p5834_p2), [#allocation24], 4294967040 }
  0x65   : > { %5628 = dma.done.wait (%p5834_p2), [#allocation27], 65600  }
  0x66   : > { %5630 = vsyncadd (%p5834_p2), [#allocation27], 4294901696 }
  0x67   : > { %5632 = dma.done.wait (%p5834_p2), [#allocation30], 16448  }
  0x68   : > { %5634 = vsyncadd (%p5834_p2), [#allocation30], 4294950848 }
  0x69   : > { %5636 = dma.done.wait (%p5834_p2), [#allocation33], 64  }
  0x6a   : > { %5638 = vsyncadd (%p5834_p2), [#allocation33], 4294967232 }
  0x6b   : > { %5640 = dma.done.wait (%p5834_p2), [#allocation36], 4112  }
  0x6c   : > { %5642 = vsyncadd (%p5834_p2), [#allocation36], 4294963184  ;;  %s6825_s23 = sld [smem:[#allocation47_spill]]  ;;  %v6795_v0 = vlaneseq  ;;  %v5696_v8 = vmov 0.0  }
  0x6d   : > { %s6826_s5 = sld [smem:[#allocation48_spill]] }
  0x6e   : > { %s6827_s20 = sld [smem:[#allocation49_spill]]  ;;  %v866_v1 = vand.u32 127, %v6795_v0 }
  0x6f   : > { %s6830_s24 = sld [smem:[#allocation55_spill]] }
  0x72   : > { %s4733_s21 = sshll.u32 %s6825_s23, 2  ;;  %p854_p12 = scmp.eq.s32.totalorder %s6825_s23, 0 }
  0x73   : > { %p844_p9 = scmp.lt.s32.totalorder %s6826_s5, 3  ;;  %p846_p10 = scmp.lt.s32.totalorder %s4733_s21, 11 }
  0x74   : > { %p853_p11 = scmp.eq.s32.totalorder %s6826_s5, 0  ;;  %p857_p13 = scmp.eq.s32.totalorder %s6826_s5, 3 }
  0x75   : > { %s845_s3 = scalar_select %p844_p9, %s6826_s5, 3 }
  0x76   : > { %s6877_s21 = smov (!%p846_p10, %s4733_s21), 11  ;;  %p858_p0 = scmp.eq.s32.totalorder %s6825_s23, 2 }
  0x77   : > { %s4802_s6 = smul.u32 12, %s845_s3  ;;  %p5994_p1 = pnand %p854_p12, %p853_p11 }
  0x78   : > { %p5998_p2 = pnand %p858_p0, %p857_p13  ;;  %s4735_s27 = sshll.u32 %s6825_s23, 5 }
  0x79   : > { %s849_s25 = sadd.s32 %s4802_s6, %s6877_s21  ;;  %p856_p3 = pneg %p5994_p1  ;;  %v868_v6 = vstv %s4735_s27 }
  0x7a   : > { %s4734_s17 = sshll.u32 %s849_s25, 3  ;;  %p860_p4 = pneg %p5998_p2  ;;  %v869_v7 = vadd.s32 %v868_v6, %v866_v1 }
  0x7b   : > { %s851_s29 = scalar_lea.vmem %s6830_s24, %s4734_s17  ;;  %p873_p5 = scmp.eq.s32.totalorder %s6827_s20, 0 }
  0x7c   : > { %v6008_v2 = vld [vmem:[%s851_s29] sm:$0xff]  ;;  %v6010_v3 = vld [vmem:[%s851_s29 + $0x8] sm:$0xff]  ;;  %v6012_v4 = vld [vmem:[%s851_s29 + $0x10] sm:$0xff]  ;;  %vm870_vm0 = vcmp.lt.s32.totalorder %v869_v7, 80 }
  0x7d   : > { %v6017_v5 = vld [vmem:[%s851_s29 + $0x18] sm:$0xff]  ;;  %p874_p6 = pnand %p873_p5, %p856_p3  ;;  %v6020_v9 = vsel %vm870_vm0, 1.0, %v5696_v8 }
  0x7f   : > { %877 = sbr.rel (%p874_p6) target bundleno = 147 (0x93), region = 164 }
  0x84   : > { %vm878_vm1 = vcmask 516096   ;;  %v5697_v10 = vmov 0.0  }
  0x85   : > { %879 = vst.msk [vmem:[#allocation2] sm:$0x1] %vm878_vm1, %v5697_v10 }
  0x86   : > { %880 = vst.msk [vmem:[#allocation3] sm:$0x1] %vm878_vm1, %v5697_v10 }
  0x87   : > { %881 = vst [vmem:[#allocation4] sm:$0x1] %v5697_v10 }
  0x88   : > { %882 = vst [vmem:[#allocation5] sm:$0x1] %v5697_v10 }
  0x89   : > { %883 = vst [vmem:[#allocation6] sm:$0xff] %v5697_v10 }
  0x8a   : > { %884 = vst [vmem:[#allocation7] sm:$0xff] %v5697_v10 }
  0x8b   : > { %885 = vst [vmem:[#allocation10 + $0x10] sm:$0xff] %v5697_v10 }
  0x8c   : > { %886 = vst [vmem:[#allocation10] sm:$0xff] %v5697_v10 }
  0x8d   : > { %887 = vst [vmem:[#allocation10 + $0x18] sm:$0xff] %v5697_v10 }
  0x8e   : > { %888 = vst [vmem:[#allocation10 + $0x8] sm:$0xff] %v5697_v10 }
  0x8f   : > { %889 = vst [vmem:[#allocation11] sm:$0xff] %v5697_v10 }
  0x90   : > { %890 = vst [vmem:[#allocation11 + $0x18] sm:$0xff] %v5697_v10 }
  0x91   : > { %891 = vst [vmem:[#allocation11 + $0x8] sm:$0xff] %v5697_v10 }
  0x92   : > { %892 = vst [vmem:[#allocation11 + $0x10] sm:$0xff] %v5697_v10 }
  0x93 PF: > { %s6831_s22 = sld [smem:[#allocation49_spill]] }
  0x99   : > { %p4737_p7 = scmp.ne.s32.totalorder %s6831_s22, 0 }
  0x9b   : > { %895 = sbr.rel (%p4737_p7) target bundleno = 446 (0x1be), region = 168 }
  0xa0   : > { %v896_v11 = vld [vmem:[#allocation12] sm:$0xff]  ;;  %vm897_vm2 = vcmask 64512   ;;  %vm940_vm3 = vcmask 261120   ;;  %v939_v20 = vld [vmem:[#allocation2] sm:$0x1]  ;;  %vm965_vm4 = vcmask 516096  }
  0xa1   : > { %4785 = vmatpush.msra.mxu3 %v896_v11  ;;  %925 = vmatpush.msra.mxu0 %v896_v11  ;;  %v967_v23 = vld [vmem:[#allocation3] sm:$0x1] }
  0xa2   : > { %4740 = vmatmul.msk.f32.vlgmr.msra.gmra.mxu3 %vm897_vm2, %v6012_v4  ;;  %4738 = vmatmul.msk.f32.vlgmr.msra.gmra.mxu0 %vm897_vm2, %v6008_v2 }
  0xaa   : > { %4741 = vmatmul.msk.f32.gmra.mxu3 %vm897_vm2, %v6017_v5  ;;  %4739 = vmatmul.msk.f32.gmra.mxu0 %vm897_vm2, %v6010_v3 }
 0x11f   : > { %v927_v12 = vpop.f32.mrf.mxu0 }
 0x120   : > { %v968_v19 = vmul.f32 %v927_v12, %v927_v12 }
 0x125   : > { %v933_v13 = vpop.f32.mrf.mxu3 }
 0x126   : > { %v970_v18 = vmul.f32 %v933_v13, %v933_v13 }
 0x127   : > { %v930_v15 = vpop.f32.mrf.mxu0 }
 0x128   : > { %v969_v17 = vmul.f32 %v930_v15, %v930_v15 }
 0x12d   : > { %v936_v14 = vpop.f32.mrf.mxu3 }
 0x12e   : > { %956 = vmatpush.msra.mxu1 %v936_v14  ;;  %v971_v16 = vmul.f32 %v936_v14, %v936_v14 }
 0x130   : > { %957 = vmatpush.msra.mxu1 %v933_v13  ;;  %984 = vmatpush.msra.mxu2 %v971_v16 }
 0x132   : > { %958 = vmatpush.msra.mxu1 %v930_v15  ;;  %985 = vmatpush.msra.mxu2 %v970_v18 }
 0x134   : > { %959 = vmatpush.msra.mxu1 %v927_v12  ;;  %986 = vmatpush.msra.mxu2 %v969_v17 }
 0x135   : > { %4742 = vmatmul.msk.f32.vlgmr.msra.gmra.mxu1 %vm940_vm3, %v6020_v9 }
 0x136   : > { %987 = vmatpush.msra.mxu2 %v968_v19 }
 0x137   : > { %4743 = vmatmul.msk.f32.vlgmr.msra.gmra.mxu2 %vm940_vm3, %v6020_v9 }
 0x1b2   : > { %v961_v21 = vpop.f32.mrf.mxu1 }
 0x1b3   : > { %v964_v22 = vadd.f32 %v961_v21, %v939_v20 }
 0x1b5   : > { %966 = vst.msk [vmem:[#allocation2] sm:$0x1] %vm965_vm4, %v964_v22 }
 0x1ba   : > { %v989_v24 = vpop.f32.mrf.mxu2 }
 0x1bb   : > { %v992_v25 = vadd.f32 %v989_v24, %v967_v23 }
 0x1bd   : > { %993 = vst.msk [vmem:[#allocation3] sm:$0x1] %vm965_vm4, %v992_v25 }
 0x1be PF: > { %s6832_s23 = sld [smem:[#allocation49_spill]] }
 0x1c4   : > { %p4744_p8 = scmp.ne.s32.totalorder %s6832_s23, 1 }
 0x1c6   : > { %997 = sbr.rel (%p4744_p8) target bundleno = 893 (0x37d), region = 172 }
 0x1cb   : > { %v1020_v26 = vld [vmem:[#allocation12] sm:$0xff]  ;;  %vm1021_vm5 = vcmask 64512   ;;  %v1086_v29 = vld [vmem:[#allocation17 + $0x28] sm:$0xff]  ;;  %v1085_v30 = vld [vmem:[#allocation17 + $0x20] sm:$0xff]  ;;  %vm1089_vm9 = vcmask 523264   ;;  %vm1132_vm10 = vcmask 261120  }
 0x1cc   : > { %v1088_v27 = vld [vmem:[#allocation17 + $0x38] sm:$0xff]  ;;  %v1087_v28 = vld [vmem:[#allocation17 + $0x30] sm:$0xff]  ;;  %1049 = vmatpush.msra.mxu0 %v1020_v26  ;;  %v1082_v43 = vld [vmem:[#allocation17 + $0x8] sm:$0xff] }
 0x1cd   : > { %1110 = vmatpush.msra.mxu1 %v1088_v27  ;;  %4745 = vmatmul.msk.f32.vlgmr.msra.gmra.mxu0 %vm1021_vm5, %v6008_v2  ;;  %v998_v31 = vld [vmem:[#allocation2] sm:$0x1]  ;;  %v1000_v33 = vld [vmem:[#allocation3] sm:$0x1]  ;;  %v1084_v40 = vld [vmem:[#allocation17 + $0x18] sm:$0xff] }
 0x1ce   : > { %4786 = vmatpush.msra.mxu2 %v1088_v27  ;;  %4787 = vmatpush.msra.mxu3 %v1088_v27  ;;  %v999_v32 = vmul.f32 0.003125, %v998_v31  ;;  %v1001_v34 = vmul.f32 0.003125, %v1000_v33  ;;  %v1083_v42 = vld [vmem:[#allocation17 + $0x10] sm:$0xff]  ;;  %v1081_v45 = vld [vmem:[#allocation17] sm:$0xff] }
 0x1cf   : > { %1111 = vmatpush.msra.mxu1 %v1087_v28  ;;  %v1004_v48 = vld [vmem:[#allocation14] sm:$0x1]  ;;  %v1017_v52 = vld [vmem:[#allocation16] sm:$0x1]  ;;  %v1131_v22 = vld [vmem:[#allocation4] sm:$0x1] }
 0x1d0   : > { %4788 = vmatpush.msra.mxu2 %v1087_v28  ;;  %4789 = vmatpush.msra.mxu3 %v1087_v28  ;;  %v1002_v35 = vmul.f32 %v999_v32, %v999_v32  ;;  %v1158_v24 = vld [vmem:[#allocation5] sm:$0x1] }
 0x1d1   : > { %1112 = vmatpush.msra.mxu1 %v1086_v29 }
 0x1d2   : > { %4790 = vmatpush.msra.mxu2 %v1086_v29  ;;  %4791 = vmatpush.msra.mxu3 %v1086_v29  ;;  %v1003_v36 = vsub.f32 %v1001_v34, %v1002_v35 }
 0x1d3   : > { %1113 = vmatpush.msra.mxu1 %v1085_v30 }
 0x1d4   : > { %4792 = vmatpush.msra.mxu2 %v1085_v30  ;;  %4793 = vmatpush.msra.mxu3 %v1085_v30  ;;  %v1005_v37 = vadd.f32 1e-05, %v1003_v36 }
 0x1d5   : > { %4746 = vmatmul.msk.f32.gmra.mxu0 %vm1021_vm5, %v6010_v3  ;;  %1114 = vmatpush.msra.mxu1 %v1084_v40 }
 0x1d6   : > { %5040 = vrsqrt.f32 %v1005_v37  ;;  %4794 = vmatpush.msra.mxu2 %v1084_v40  ;;  %4795 = vmatpush.msra.mxu3 %v1084_v40  ;;  %vm1012_vm6 = vweird.f32 %v1005_v37 }
 0x1d7   : > { %1115 = vmatpush.msra.mxu1 %v1083_v42 }
 0x1d8   : > { %4796 = vmatpush.msra.mxu2 %v1083_v42  ;;  %4797 = vmatpush.msra.mxu3 %v1083_v42 }
 0x1d9   : > { %1116 = vmatpush.msra.mxu1 %v1082_v43 }
 0x1da   : > { %4798 = vmatpush.msra.mxu2 %v1082_v43  ;;  %4799 = vmatpush.msra.mxu3 %v1082_v43 }
 0x1db   : > { %1117 = vmatpush.msra.mxu1 %v1081_v45 }
 0x1dc   : > { %v5041_v38 = vpop.eup %5040  ;;  %4800 = vmatpush.msra.mxu2 %v1081_v45  ;;  %4801 = vmatpush.msra.mxu3 %v1081_v45 }
 0x1dd   : > { %4747 = vmatmul.msk.f32.gmra.mxu0 %vm1021_vm5, %v6012_v4  ;;  %v1007_v39 = vmul.f32 %v5041_v38, %v1005_v37  ;;  %vm1013_vm7 = vweird.f32 %v5041_v38 }
 0x1de   : > { %vm1014_vm8 = vmor %vm1012_vm6, %vm1013_vm7 }
 0x1df   : > { %v1008_v41 = vmul.f32 %v5041_v38, %v1007_v39 }
 0x1e1   : > { %v1009_v44 = vmul.f32 0.5, %v1008_v41 }
 0x1e3   : > { %v1010_v46 = vsub.f32 1.5, %v1009_v44 }
 0x1e5   : > { %4748 = vmatmul.msk.f32.gmra.mxu0 %vm1021_vm5, %v6017_v5  ;;  %v1011_v47 = vmul.f32 %v5041_v38, %v1010_v46 }
 0x1e7   : > { %v1015_v49 = vsel %vm1014_vm8, %v5041_v38, %v1011_v47 }
 0x1e8   : > { %v1016_v50 = vmul.f32 %v1015_v49, %v1004_v48 }
 0x1ea   : > { %v1018_v51 = vmul.f32 %v1016_v50, %v999_v32  ;;  %v1064_v54 = vperm.slane %v1016_v50, 0 }
 0x1ec   : > { %v1019_v53 = vsub.f32 %v1017_v52, %v1018_v51 }
 0x1ee   : > { %v1071_v55 = vperm.slane %v1019_v53, 0 }
 0x24a   : > { %v1051_v56 = vpop.f32.mrf.mxu0 }
 0x24b   : > { %v1066_v57 = vmul.f32 %v1064_v54, %v1051_v56 }
 0x24d   : > { %v1073_v58 = vadd.f32 %v1071_v55, %v1066_v57 }
 0x24f   : > { %v1077_v59 = vmax.f32 %v1073_v58, 0.0 }
 0x251   : > { %4749 = vmatmul.msk.f32.vlgmr.msra.gmra.mxu1 %vm1089_vm9, %v1077_v59 }
 0x252   : > { %v1054_v60 = vpop.f32.mrf.mxu0 }
 0x253   : > { %v1067_v61 = vmul.f32 %v1064_v54, %v1054_v60 }
 0x255   : > { %v1074_v62 = vadd.f32 %v1071_v55, %v1067_v61 }
 0x257   : > { %v1078_v63 = vmax.f32 %v1074_v62, 0.0 }
 0x259   : > { %4750 = vmatmul.msk.f32.gmra.mxu1 %vm1089_vm9, %v1078_v63 }
 0x25a   : > { %v1057_v1 = vpop.f32.mrf.mxu0 }
 0x25b   : > { %v1068_v6 = vmul.f32 %v1064_v54, %v1057_v1 }
 0x25d   : > { %v1075_v7 = vadd.f32 %v1071_v55, %v1068_v6 }
 0x25f   : > { %v1079_v8 = vmax.f32 %v1075_v7, 0.0 }
 0x261   : > { %4751 = vmatmul.msk.f32.vlgmr.msra.gmra.mxu2 %vm1089_vm9, %v1079_v8 }
 0x262   : > { %v1060_v10 = vpop.f32.mrf.mxu0 }
 0x263   : > { %v1069_v11 = vmul.f32 %v1064_v54, %v1060_v10 }
 0x265   : > { %v1076_v12 = vadd.f32 %v1071_v55, %v1069_v11 }
 0x267   : > { %v1080_v13 = vmax.f32 %v1076_v12, 0.0 }
 0x269   : > { %4752 = vmatmul.msk.f32.vlgmr.msra.gmra.mxu3 %vm1089_vm9, %v1080_v13 }
 0x2ce   : > { %v1119_v14 = vpop.f32.mrf.mxu1 }
 0x2cf   : > { %v1159_v21 = vmul.f32 %v1119_v14, %v1119_v14 }
 0x2d6   : > { %v1122_v18 = vpop.f32.mrf.mxu1 }
 0x2d7   : > { %v1160_v20 = vmul.f32 %v1122_v18, %v1122_v18 }
 0x2e4   : > { %v1125_v15 = vpop.f32.mrf.mxu2 }
 0x2e5   : > { %v1161_v19 = vmul.f32 %v1125_v15, %v1125_v15 }
 0x2ec   : > { %v1128_v16 = vpop.f32.mrf.mxu3 }
 0x2ed   : > { %1148 = vmatpush.msrb.mxu2 %v1128_v16  ;;  %v1162_v17 = vmul.f32 %v1128_v16, %v1128_v16 }
 0x2ef   : > { %1149 = vmatpush.msrb.mxu2 %v1125_v15  ;;  %1175 = vmatpush.msrb.mxu3 %v1162_v17 }
 0x2f1   : > { %1150 = vmatpush.msrb.mxu2 %v1122_v18  ;;  %1176 = vmatpush.msrb.mxu3 %v1161_v19 }
 0x2f3   : > { %1151 = vmatpush.msrb.mxu2 %v1119_v14  ;;  %1177 = vmatpush.msrb.mxu3 %v1160_v20 }
 0x2f4   : > { %4753 = vmatmul.msk.f32.vlgmr.msrb.gmra.mxu2 %vm1132_vm10, %v6020_v9 }
 0x2f5   : > { %1178 = vmatpush.msrb.mxu3 %v1159_v21 }
 0x2f6   : > { %4754 = vmatmul.msk.f32.vlgmr.msrb.gmra.mxu3 %vm1132_vm10, %v6020_v9 }
 0x377   : > { %v1153_v23 = vpop.f32.mrf.mxu2 }
 0x378   : > { %v1156_v25 = vadd.f32 %v1153_v23, %v1131_v22 }
 0x379   : > { %v1180_v26 = vpop.f32.mrf.mxu3 }
 0x37a   : > { %1157 = vst [vmem:[#allocation4] sm:$0x1] %v1156_v25  ;;  %v1183_v27 = vadd.f32 %v1180_v26, %v1158_v24 }
 0x37c   : > { %1184 = vst [vmem:[#allocation5] sm:$0x1] %v1183_v27 }
 0x37d PF: > { %s6833_s5 = sld [smem:[#allocation49_spill]] }
 0x383   : > { %p1185_p9 = scmp.eq.s32.totalorder %s6833_s5, 2  ;;  %p4755_p10 = scmp.ne.s32.totalorder %s6833_s5, 2 }
 0x385   : > { %1188 = sbr.rel (%p4755_p10) target bundleno = 1606 (0x646), region = 176 }
 0x38a   : > { %v1233_v28 = vld [vmem:[#allocation12] sm:$0xff]  ;;  %vm1234_vm11 = vcmask 64512   ;;  %v1299_v31 = vld [vmem:[#allocation17 + $0x28] sm:$0xff]  ;;  %v1298_v32 = vld [vmem:[#allocation17 + $0x20] sm:$0xff]  ;;  %vm1302_vm15 = vcmask 523264   ;;  %vm1723_vm3 = vcmask 261120  }
 0x38b   : > { %v1301_v29 = vld [vmem:[#allocation17 + $0x38] sm:$0xff]  ;;  %v1300_v30 = vld [vmem:[#allocation17 + $0x30] sm:$0xff]  ;;  %1262 = vmatpush.msra.mxu0 %v1233_v28  ;;  %v1482_v54 = vld [vmem:[#allocation22 + $0x3c0] sm:$0xff]  ;;  %vm1902_vm4 = vcmask 1040384   ;;  %vm1904_vm5 = vcmask 1042434   ;;  %vm1910_vm6 = vcmask 1046534  }
 0x38c   : > { %1323 = vmatpush.msra.mxu1 %v1301_v29  ;;  %4756 = vmatmul.msk.f32.vlgmr.msra.gmra.mxu0 %vm1234_vm11, %v6008_v2  ;;  %v1211_v33 = vld [vmem:[#allocation2] sm:$0x1]  ;;  %v1213_v35 = vld [vmem:[#allocation3] sm:$0x1]  ;;  %v1297_v41 = vld [vmem:[#allocation17 + $0x18] sm:$0xff]  ;;  %vm1906_vm7 = vcmask 1041408  }
 0x38d   : > { %v1212_v34 = vmul.f32 0.003125, %v1211_v33  ;;  %v1214_v36 = vmul.f32 0.003125, %v1213_v35  ;;  %v1296_v43 = vld [vmem:[#allocation17 + $0x10] sm:$0xff]  ;;  %1490 = vmatpush.msra.mxu2 %v1482_v54  ;;  %v1485_v58 = vld [vmem:[#allocation22 + $0x3d8] sm:$0xff] }
 0x38e   : > { %1324 = vmatpush.msra.mxu1 %v1300_v30  ;;  %v1217_v46 = vld [vmem:[#allocation14] sm:$0x1]  ;;  %v1230_v50 = vld [vmem:[#allocation16] sm:$0x1]  ;;  %v1483_v55 = vld [vmem:[#allocation22 + $0x3c8] sm:$0xff]  ;;  %vm1908_vm8 = vcmask 1044484  }
 0x38f   : > { %v1215_v37 = vmul.f32 %v1212_v34, %v1212_v34  ;;  %v1484_v56 = vld [vmem:[#allocation22 + $0x3d0] sm:$0xff]  ;;  %1519 = vmatpush.msra.mxu3 %v1483_v55  ;;  %v1474_v59 = vld [vmem:[#allocation22 + $0x380] sm:$0xff]  ;;  %v1475_v60 = vld [vmem:[#allocation22 + $0x388] sm:$0xff]  ;;  %vm1912_vm9 = vcmask 1045508   ;;  %vm1914_vm10 = vcmask 1043456   ;;  %s6838_s21 = sld [smem:[#allocation47_spill]] }
 0x390   : > { %1325 = vmatpush.msra.mxu1 %v1299_v31  ;;  %1548 = vmatpush.msrb.mxu0 %v1484_v56  ;;  %v1476_v62 = vld [vmem:[#allocation22 + $0x390] sm:$0xff]  ;;  %v1477_v63 = vld [vmem:[#allocation22 + $0x398] sm:$0xff]  ;;  %v1466_v1 = vld [vmem:[#allocation22 + $0x340] sm:$0xff] }
 0x391   : > { %v1216_v38 = vsub.f32 %v1214_v36, %v1215_v37  ;;  %1491 = vmatpush.msra.mxu2 %v1474_v59  ;;  %1520 = vmatpush.msra.mxu3 %v1475_v60  ;;  %v1467_v6 = vld [vmem:[#allocation22 + $0x348] sm:$0xff]  ;;  %v1468_v7 = vld [vmem:[#allocation22 + $0x350] sm:$0xff]  ;;  %v1469_v8 = vld [vmem:[#allocation22 + $0x358] sm:$0xff] }
 0x392   : > { %1326 = vmatpush.msra.mxu1 %v1298_v32  ;;  %1549 = vmatpush.msrb.mxu0 %v1476_v62  ;;  %v1458_v11 = vld [vmem:[#allocation22 + $0x300] sm:$0xff]  ;;  %v1459_v12 = vld [vmem:[#allocation22 + $0x308] sm:$0xff]  ;;  %v1460_v13 = vld [vmem:[#allocation22 + $0x310] sm:$0xff] }
 0x393   : > { %v1218_v39 = vadd.f32 1e-05, %v1216_v38  ;;  %1492 = vmatpush.msra.mxu2 %v1466_v1  ;;  %1521 = vmatpush.msra.mxu3 %v1467_v6  ;;  %v1461_v15 = vld [vmem:[#allocation22 + $0x318] sm:$0xff]  ;;  %v1450_v16 = vld [vmem:[#allocation22 + $0x2c0] sm:$0xff]  ;;  %v1451_v17 = vld [vmem:[#allocation22 + $0x2c8] sm:$0xff] }
 0x394   : > { %4757 = vmatmul.msk.f32.gmra.mxu0 %vm1234_vm11, %v6010_v3  ;;  %1327 = vmatpush.msra.mxu1 %v1297_v41  ;;  %v1295_v3 = vld [vmem:[#allocation17 + $0x8] sm:$0xff]  ;;  %v1452_v18 = vld [vmem:[#allocation22 + $0x2d0] sm:$0xff]  ;;  %v1453_v19 = vld [vmem:[#allocation22 + $0x2d8] sm:$0xff] }
 0x395   : > { %5042 = vrsqrt.f32 %v1218_v39  ;;  %vm1225_vm12 = vweird.f32 %v1218_v39  ;;  %1550 = vmatpush.msrb.mxu0 %v1468_v7  ;;  %1493 = vmatpush.msra.mxu2 %v1458_v11  ;;  %v1442_v20 = vld [vmem:[#allocation22 + $0x280] sm:$0xff]  ;;  %v1443_v22 = vld [vmem:[#allocation22 + $0x288] sm:$0xff]  ;;  %v1444_v23 = vld [vmem:[#allocation22 + $0x290] sm:$0xff]  ;;  %p4780_p11 = scmp.ne.s32.totalorder %s6838_s21, 0 }
 0x396   : > { %1328 = vmatpush.msra.mxu1 %v1296_v43  ;;  %1522 = vmatpush.msra.mxu3 %v1459_v12  ;;  %v1445_v25 = vld [vmem:[#allocation22 + $0x298] sm:$0xff]  ;;  %v1434_v26 = vld [vmem:[#allocation22 + $0x240] sm:$0xff]  ;;  %v1435_v27 = vld [vmem:[#allocation22 + $0x248] sm:$0xff] }
 0x397   : > { %1551 = vmatpush.msrb.mxu0 %v1460_v13  ;;  %1494 = vmatpush.msra.mxu2 %v1450_v16  ;;  %v1436_v28 = vld [vmem:[#allocation22 + $0x250] sm:$0xff]  ;;  %v1437_v30 = vld [vmem:[#allocation22 + $0x258] sm:$0xff]  ;;  %v1426_v31 = vld [vmem:[#allocation22 + $0x200] sm:$0xff] }
 0x398   : > { %1329 = vmatpush.msra.mxu1 %v1295_v3  ;;  %1523 = vmatpush.msra.mxu3 %v1451_v17  ;;  %v1427_v32 = vld [vmem:[#allocation22 + $0x208] sm:$0xff]  ;;  %v1429_v35 = vld [vmem:[#allocation22 + $0x218] sm:$0xff]  ;;  %v1418_v36 = vld [vmem:[#allocation22 + $0x1c0] sm:$0xff] }
 0x399   : > { %1552 = vmatpush.msrb.mxu0 %v1452_v18  ;;  %1495 = vmatpush.msra.mxu2 %v1442_v20  ;;  %v1419_v37 = vld [vmem:[#allocation22 + $0x1c8] sm:$0xff]  ;;  %v1420_v38 = vld [vmem:[#allocation22 + $0x1d0] sm:$0xff]  ;;  %v1413_v3 = vld [vmem:[#allocation22 + $0x198] sm:$0xff] }
 0x39a   : > { %1524 = vmatpush.msra.mxu3 %v1443_v22  ;;  %v1411_v41 = vld [vmem:[#allocation22 + $0x188] sm:$0xff]  ;;  %v1412_v43 = vld [vmem:[#allocation22 + $0x190] sm:$0xff]  ;;  %v1386_v7 = vld [vmem:[#allocation22 + $0xc0] sm:$0xff] }
 0x39b   : > { %v5043_v2 = vpop.eup %5042  ;;  %1553 = vmatpush.msrb.mxu0 %v1444_v23  ;;  %1496 = vmatpush.msra.mxu2 %v1434_v26  ;;  %v1191_v60 = vld [vmem:[#allocation5] sm:$0x1]  ;;  %v1389_v11 = vld [vmem:[#allocation22 + $0xd8] sm:$0xff]  ;;  %v1378_v12 = vld [vmem:[#allocation22 + $0x80] sm:$0xff] }
 0x39c   : > { %4758 = vmatmul.msk.f32.gmra.mxu0 %vm1234_vm11, %v6012_v4  ;;  %v1220_v40 = vmul.f32 %v5043_v2, %v1218_v39  ;;  %v1294_v4 = vld [vmem:[#allocation17] sm:$0xff]  ;;  %vm1226_vm13 = vweird.f32 %v5043_v2  ;;  %1525 = vmatpush.msra.mxu3 %v1435_v27  ;;  %v1379_v13 = vld [vmem:[#allocation22 + $0x88] sm:$0xff]  ;;  %v1372_v18 = vld [vmem:[#allocation22 + $0x50] sm:$0xff] }
 0x39d   : > { %1330 = vmatpush.msra.mxu1 %v1294_v4  ;;  %vm1227_vm14 = vmor %vm1225_vm12, %vm1226_vm13  ;;  %1554 = vmatpush.msrb.mxu0 %v1436_v28  ;;  %v1421_v39 = vld [vmem:[#allocation22 + $0x1d8] sm:$0xff]  ;;  %v1403_v4 = vld [vmem:[#allocation22 + $0x148] sm:$0xff] }
 0x39e   : > { %v1221_v42 = vmul.f32 %v5043_v2, %v1220_v40  ;;  %1497 = vmatpush.msra.mxu2 %v1426_v31  ;;  %1526 = vmatpush.msra.mxu3 %v1427_v32  ;;  %v1410_v40 = vld [vmem:[#allocation22 + $0x180] sm:$0xff]  ;;  %v1371_v17 = vld [vmem:[#allocation22 + $0x48] sm:$0xff]  ;;  %v1373_v20 = vld [vmem:[#allocation22 + $0x58] sm:$0xff] }
 0x39f   : > { %1577 = vmatpush.msrb.mxu1 %v1485_v58  ;;  %v1189_v58 = vld [vmem:[#allocation4] sm:$0x1]  ;;  %v1370_v16 = vld [vmem:[#allocation22 + $0x40] sm:$0xff]  ;;  %v1364_v23 = vld [vmem:[#allocation22 + $0x10] sm:$0xff] }
 0x3a0   : > { %v1222_v44 = vmul.f32 0.5, %v1221_v42  ;;  %1498 = vmatpush.msra.mxu2 %v1418_v36  ;;  %1527 = vmatpush.msra.mxu3 %v1419_v37  ;;  %v6066_v59 = vmul.f32 0.003125, %v1189_v58  ;;  %v1363_v22 = vld [vmem:[#allocation22 + $0x8] sm:$0xff]  ;;  %v1486_v26 = vld [vmem:[#allocation22 + $0x3e0] sm:$0xff]  ;;  %v1488_v28 = vld [vmem:[#allocation22 + $0x3f0] sm:$0xff] }
 0x3a1   : > { %1578 = vmatpush.msrb.mxu1 %v1477_v63  ;;  %v1487_v27 = vld [vmem:[#allocation22 + $0x3e8] sm:$0xff]  ;;  %v1480_v32 = vld [vmem:[#allocation22 + $0x3b0] sm:$0xff]  ;;  %v1470_v36 = vld [vmem:[#allocation22 + $0x360] sm:$0xff] }
 0x3a2   : > { %1499 = vmatpush.msra.mxu2 %v1410_v40  ;;  %1528 = vmatpush.msra.mxu3 %v1411_v41  ;;  %v1193_v62 = vmul.f32 %v6066_v59, %v6066_v59  ;;  %v1479_v31 = vld [vmem:[#allocation22 + $0x3a8] sm:$0xff]  ;;  %v1464_v41 = vld [vmem:[#allocation22 + $0x330] sm:$0xff] }
 0x3a3   : > { %1579 = vmatpush.msrb.mxu1 %v1469_v8  ;;  %v1388_v8 = vld [vmem:[#allocation22 + $0xd0] sm:$0xff]  ;;  %v1471_v37 = vld [vmem:[#allocation22 + $0x368] sm:$0xff] }
 0x3a4   : > { %4759 = vmatmul.msk.f32.gmra.mxu0 %vm1234_vm11, %v6017_v5  ;;  %v1223_v5 = vsub.f32 1.5, %v1222_v44  ;;  %v1402_v44 = vld [vmem:[#allocation22 + $0x140] sm:$0xff]  ;;  %1529 = vmatpush.msra.mxu3 %v1403_v4  ;;  %v1463_v40 = vld [vmem:[#allocation22 + $0x328] sm:$0xff] }
 0x3a5   : > { %1580 = vmatpush.msrb.mxu1 %v1461_v15  ;;  %1500 = vmatpush.msra.mxu2 %v1402_v44  ;;  %v1381_v15 = vld [vmem:[#allocation22 + $0x98] sm:$0xff]  ;;  %v1454_v44 = vld [vmem:[#allocation22 + $0x2e0] sm:$0xff]  ;;  %v1455_v4 = vld [vmem:[#allocation22 + $0x2e8] sm:$0xff] }
 0x3a6   : > { %v1224_v45 = vmul.f32 %v5043_v2, %v1223_v5  ;;  %v1431_v58 = vld [vmem:[#allocation22 + $0x228] sm:$0xff] }
 0x3a7   : > { %1581 = vmatpush.msrb.mxu1 %v1453_v19 }
 0x3a8   : > { %v1228_v47 = vsel %vm1227_vm14, %v5043_v2, %v1224_v45  ;;  %v1404_v45 = vld [vmem:[#allocation22 + $0x150] sm:$0xff] }
 0x3a9   : > { %v1229_v48 = vmul.f32 %v1228_v47, %v1217_v46  ;;  %1582 = vmatpush.msrb.mxu1 %v1445_v25  ;;  %v1405_v46 = vld [vmem:[#allocation22 + $0x158] sm:$0xff]  ;;  %v1394_v47 = vld [vmem:[#allocation22 + $0x100] sm:$0xff] }
 0x3aa   : > { %1501 = vmatpush.msra.mxu2 %v1394_v47  ;;  %v1447_v47 = vld [vmem:[#allocation22 + $0x2a8] sm:$0xff] }
 0x3ab   : > { %v1231_v49 = vmul.f32 %v1229_v48, %v1212_v34  ;;  %v6050_v52 = vperm.slane %v1229_v48, 0  ;;  %v1428_v34 = vld [vmem:[#allocation22 + $0x210] sm:$0xff]  ;;  %1583 = vmatpush.msrb.mxu1 %v1437_v30  ;;  %v1478_v30 = vld [vmem:[#allocation22 + $0x3a0] sm:$0xff] }
 0x3ac   : > { %1555 = vmatpush.msrb.mxu0 %v1428_v34  ;;  %1502 = vmatpush.msra.mxu2 %v1386_v7  ;;  %v1481_v34 = vld [vmem:[#allocation22 + $0x3b8] sm:$0xff] }
 0x3ad   : > { %v1232_v51 = vsub.f32 %v1230_v50, %v1231_v49  ;;  %1584 = vmatpush.msrb.mxu1 %v1429_v35  ;;  %v1395_v49 = vld [vmem:[#allocation22 + $0x108] sm:$0xff]  ;;  %v1396_v50 = vld [vmem:[#allocation22 + $0x110] sm:$0xff]  ;;  %v1425_v7 = vld [vmem:[#allocation22 + $0x1f8] sm:$0xff] }
 0x3ae   : > { %1556 = vmatpush.msrb.mxu0 %v1420_v38  ;;  %1530 = vmatpush.msra.mxu3 %v1395_v49  ;;  %v1472_v38 = vld [vmem:[#allocation22 + $0x370] sm:$0xff] }
 0x3af   : > { %v6052_v53 = vperm.slane %v1232_v51, 0  ;;  %1585 = vmatpush.msrb.mxu1 %v1421_v39  ;;  %v1397_v51 = vld [vmem:[#allocation22 + $0x118] sm:$0xff]  ;;  %1503 = vmatpush.msra.mxu2 %v1378_v12 }
 0x3b0   : > { %1557 = vmatpush.msrb.mxu0 %v1412_v43  ;;  %v1473_v39 = vld [vmem:[#allocation22 + $0x378] sm:$0xff] }
 0x3b1   : > { %1586 = vmatpush.msrb.mxu1 %v1413_v3  ;;  %1504 = vmatpush.msra.mxu2 %v1370_v16  ;;  %v1195_v43 = vld [vmem:[#allocation19] sm:$0x1] }
 0x3b2   : > { %1558 = vmatpush.msrb.mxu0 %v1404_v45  ;;  %v1457_v45 = vld [vmem:[#allocation22 + $0x2f8] sm:$0xff] }
 0x3b3   : > { %1587 = vmatpush.msrb.mxu1 %v1405_v46  ;;  %v1446_v46 = vld [vmem:[#allocation22 + $0x2a0] sm:$0xff]  ;;  %v1417_v12 = vld [vmem:[#allocation22 + $0x1b8] sm:$0xff] }
 0x3b4   : > { %1559 = vmatpush.msrb.mxu0 %v1396_v50  ;;  %v1449_v50 = vld [vmem:[#allocation22 + $0x2b8] sm:$0xff] }
 0x3b5   : > { %1588 = vmatpush.msrb.mxu1 %v1397_v51  ;;  %v1438_v51 = vld [vmem:[#allocation22 + $0x260] sm:$0xff]  ;;  %v1409_v16 = vld [vmem:[#allocation22 + $0x178] sm:$0xff] }
 0x3b6   : > { %1560 = vmatpush.msrb.mxu0 %v1388_v8  ;;  %v1415_v8 = vld [vmem:[#allocation22 + $0x1a8] sm:$0xff] }
 0x3b7   : > { %1589 = vmatpush.msrb.mxu1 %v1389_v11 }
 0x3b9   : > { %1590 = vmatpush.msrb.mxu1 %v1381_v15 }
 0x3bb   : > { %1591 = vmatpush.msrb.mxu1 %v1373_v20  ;;  %v1401_v20 = vld [vmem:[#allocation22 + $0x138] sm:$0xff] }
 0x409   : > { %v1264_v57 = vpop.f32.mrf.mxu0 }
 0x40a   : > { %v1279_v61 = vmul.f32 %v6050_v52, %v1264_v57 }
 0x40c   : > { %v1286_v10 = vadd.f32 %v6052_v53, %v1279_v61  ;;  %v1192_v61 = vmul.f32 0.003125, %v1191_v60  ;;  %v1432_v60 = vld [vmem:[#allocation22 + $0x230] sm:$0xff] }
 0x40e   : > { %v1290_v14 = vmax.f32 %v1286_v10, 0.0  ;;  %v1194_v63 = vsub.f32 %v1192_v61, %v1193_v62  ;;  %v1433_v61 = vld [vmem:[#allocation22 + $0x238] sm:$0xff] }
 0x40f   : > { %v1208_v62 = vld [vmem:[#allocation20] sm:$0x1] }
 0x410   : > { %4760 = vmatmul.msk.f32.vlgmr.msra.gmra.mxu1 %vm1302_vm15, %v1290_v14  ;;  %v1196_v1 = vadd.f32 1e-05, %v1194_v63  ;;  %v1380_v14 = vld [vmem:[#allocation22 + $0x90] sm:$0xff] }
 0x411   : > { %v1267_v21 = vpop.f32.mrf.mxu0  ;;  %1561 = vmatpush.msrb.mxu0 %v1380_v14  ;;  %v1408_v14 = vld [vmem:[#allocation22 + $0x170] sm:$0xff] }
 0x412   : > { %v1280_v24 = vmul.f32 %v6050_v52, %v1267_v21  ;;  %5044 = vrsqrt.f32 %v1196_v1  ;;  %v1362_v21 = vld [vmem:[#allocation22] sm:$0xff]  ;;  %vm1203_vm0 = vweird.f32 %v1196_v1 }
 0x413   : > { %1562 = vmatpush.msrb.mxu0 %v1372_v18  ;;  %1505 = vmatpush.msra.mxu2 %v1362_v21  ;;  %v1399_v18 = vld [vmem:[#allocation22 + $0x128] sm:$0xff] }
 0x414   : > { %v1287_v29 = vadd.f32 %v6052_v53, %v1280_v24  ;;  %v1365_v24 = vld [vmem:[#allocation22 + $0x18] sm:$0xff] }
 0x415   : > { %1563 = vmatpush.msrb.mxu0 %v1364_v23  ;;  %1592 = vmatpush.msrb.mxu1 %v1365_v24  ;;  %v1390_v23 = vld [vmem:[#allocation22 + $0xe0] sm:$0xff]  ;;  %v1391_v24 = vld [vmem:[#allocation22 + $0xe8] sm:$0xff] }
 0x416   : > { %v1291_v33 = vmax.f32 %v1287_v29, 0.0  ;;  %1606 = vmatpush.msrb.mxu2 %v1486_v26  ;;  %v1489_v29 = vld [vmem:[#allocation22 + $0x3f8] sm:$0xff] }
 0x417   : > { %1664 = vmatpush.msra.mxu0 %v1488_v28  ;;  %1693 = vmatpush.msra.mxu1 %v1489_v29  ;;  %v1382_v28 = vld [vmem:[#allocation22 + $0xa0] sm:$0xff]  ;;  %v1383_v29 = vld [vmem:[#allocation22 + $0xa8] sm:$0xff] }
 0x418   : > { %4761 = vmatmul.msk.f32.gmra.mxu1 %vm1302_vm15, %v1291_v33  ;;  %v6070_v6 = vpop.eup %5044  ;;  %1607 = vmatpush.msrb.mxu2 %v1478_v30  ;;  %v1384_v30 = vld [vmem:[#allocation22 + $0xb0] sm:$0xff] }
 0x419   : > { %v1270_v2 = vpop.f32.mrf.mxu0  ;;  %vm1204_vm1 = vweird.f32 %v6070_v6  ;;  %1665 = vmatpush.msra.mxu0 %v1480_v32  ;;  %1694 = vmatpush.msra.mxu1 %v1481_v34  ;;  %v1374_v32 = vld [vmem:[#allocation22 + $0x60] sm:$0xff]  ;;  %v1375_v34 = vld [vmem:[#allocation22 + $0x68] sm:$0xff] }
 0x41a   : > { %v1281_v42 = vmul.f32 %v6050_v52, %v1270_v2  ;;  %vm6075_vm2 = vmor %vm1203_vm0, %vm1204_vm1  ;;  %1608 = vmatpush.msrb.mxu2 %v1470_v36  ;;  %v1462_v2 = vld [vmem:[#allocation22 + $0x320] sm:$0xff]  ;;  %v1377_v36 = vld [vmem:[#allocation22 + $0x78] sm:$0xff] }
 0x41b   : > { %1666 = vmatpush.msra.mxu0 %v1472_v38  ;;  %1695 = vmatpush.msra.mxu1 %v1473_v39  ;;  %v1366_v38 = vld [vmem:[#allocation22 + $0x20] sm:$0xff]  ;;  %v1367_v39 = vld [vmem:[#allocation22 + $0x28] sm:$0xff] }
 0x41c   : > { %v1288_v5 = vadd.f32 %v6052_v53, %v1281_v42  ;;  %v1465_v42 = vld [vmem:[#allocation22 + $0x338] sm:$0xff]  ;;  %1609 = vmatpush.msrb.mxu2 %v1462_v2  ;;  %v1368_v2 = vld [vmem:[#allocation22 + $0x30] sm:$0xff] }
 0x41d   : > { %1667 = vmatpush.msra.mxu0 %v1464_v41  ;;  %1696 = vmatpush.msra.mxu1 %v1465_v42 }
 0x41e   : > { %v1292_v48 = vmax.f32 %v1288_v5, 0.0  ;;  %v1456_v5 = vld [vmem:[#allocation22 + $0x2f0] sm:$0xff]  ;;  %1610 = vmatpush.msrb.mxu2 %v1454_v44 }
 0x41f   : > { %1668 = vmatpush.msra.mxu0 %v1456_v5  ;;  %1697 = vmatpush.msra.mxu1 %v1457_v45 }
 0x420   : > { %4762 = vmatmul.msk.f32.gmra.mxu1 %vm1302_vm15, %v1292_v48  ;;  %v1448_v48 = vld [vmem:[#allocation22 + $0x2b0] sm:$0xff]  ;;  %1611 = vmatpush.msrb.mxu2 %v1446_v46 }
 0x421   : > { %v1273_v54 = vpop.f32.mrf.mxu0  ;;  %1669 = vmatpush.msra.mxu0 %v1448_v48  ;;  %1698 = vmatpush.msra.mxu1 %v1449_v50 }
 0x422   : > { %v1282_v55 = vmul.f32 %v6050_v52, %v1273_v54  ;;  %v1198_v52 = vmul.f32 %v6070_v6, %v1196_v1  ;;  %v1439_v54 = vld [vmem:[#allocation22 + $0x268] sm:$0xff]  ;;  %1612 = vmatpush.msrb.mxu2 %v1438_v51  ;;  %v1422_v1 = vld [vmem:[#allocation22 + $0x1e0] sm:$0xff] }
 0x424   : > { %v1289_v56 = vadd.f32 %v6052_v53, %v1282_v55  ;;  %v1387_v53 = vld [vmem:[#allocation22 + $0xc8] sm:$0xff]  ;;  %v1199_v10 = vmul.f32 %v6070_v6, %v1198_v52  ;;  %v1440_v55 = vld [vmem:[#allocation22 + $0x270] sm:$0xff] }
 0x425   : > { %1531 = vmatpush.msra.mxu3 %v1387_v53  ;;  %1670 = vmatpush.msra.mxu0 %v1440_v55  ;;  %v1424_v52 = vld [vmem:[#allocation22 + $0x1f0] sm:$0xff]  ;;  %v1414_v53 = vld [vmem:[#allocation22 + $0x1a0] sm:$0xff] }
 0x426   : > { %v1293_v57 = vmax.f32 %v1289_v56, 0.0  ;;  %v1200_v19 = vmul.f32 0.5, %v1199_v10  ;;  %v1441_v56 = vld [vmem:[#allocation22 + $0x278] sm:$0xff]  ;;  %v1416_v10 = vld [vmem:[#allocation22 + $0x1b0] sm:$0xff] }
 0x427   : > { %1532 = vmatpush.msra.mxu3 %v1379_v13  ;;  %1699 = vmatpush.msra.mxu1 %v1441_v56  ;;  %v1407_v13 = vld [vmem:[#allocation22 + $0x168] sm:$0xff] }
 0x428   : > { %4763 = vmatmul.msk.f32.gmra.mxu1 %vm1302_vm15, %v1293_v57  ;;  %v1201_v25 = vsub.f32 1.5, %v1200_v19  ;;  %v1430_v57 = vld [vmem:[#allocation22 + $0x220] sm:$0xff]  ;;  %1671 = vmatpush.msra.mxu0 %v1432_v60  ;;  %v1400_v19 = vld [vmem:[#allocation22 + $0x130] sm:$0xff] }
 0x429   : > { %1533 = vmatpush.msra.mxu3 %v1371_v17  ;;  %1613 = vmatpush.msrb.mxu2 %v1430_v57  ;;  %v1398_v17 = vld [vmem:[#allocation22 + $0x120] sm:$0xff] }
 0x42a   : > { %v1202_v35 = vmul.f32 %v6070_v6, %v1201_v25  ;;  %1700 = vmatpush.msra.mxu1 %v1433_v61  ;;  %1672 = vmatpush.msra.mxu0 %v1424_v52  ;;  %v1392_v25 = vld [vmem:[#allocation22 + $0xf0] sm:$0xff] }
 0x42b   : > { %1534 = vmatpush.msra.mxu3 %v1363_v22  ;;  %1614 = vmatpush.msrb.mxu2 %v1422_v1 }
 0x42c   : > { %v1206_v3 = vsel %vm6075_vm2, %v6070_v6, %v1202_v35  ;;  %v1423_v6 = vld [vmem:[#allocation22 + $0x1e8] sm:$0xff]  ;;  %1701 = vmatpush.msra.mxu1 %v1425_v7  ;;  %1673 = vmatpush.msra.mxu0 %v1416_v10  ;;  %v1376_v35 = vld [vmem:[#allocation22 + $0x70] sm:$0xff] }
 0x42d   : > { %1635 = vmatpush.msrb.mxu3 %v1487_v27  ;;  %v1207_v49 = vmul.f32 %v1206_v3, %v1195_v43  ;;  %1615 = vmatpush.msrb.mxu2 %v1414_v53  ;;  %v1393_v27 = vld [vmem:[#allocation22 + $0xf8] sm:$0xff] }
 0x42e   : > { %1702 = vmatpush.msra.mxu1 %v1417_v12  ;;  %1674 = vmatpush.msra.mxu0 %v1408_v14 }
 0x42f   : > { %1636 = vmatpush.msrb.mxu3 %v1479_v31  ;;  %v1209_v63 = vmul.f32 %v1207_v49, %v6066_v59  ;;  %v1406_v59 = vld [vmem:[#allocation22 + $0x160] sm:$0xff]  ;;  %v6084_v15 = vperm.slane %v1207_v49, 0  ;;  %v1385_v31 = vld [vmem:[#allocation22 + $0xb8] sm:$0xff] }
 0x430   : > { %1616 = vmatpush.msrb.mxu2 %v1406_v59  ;;  %1703 = vmatpush.msra.mxu1 %v1409_v16 }
 0x431   : > { %1637 = vmatpush.msrb.mxu3 %v1471_v37  ;;  %v1210_v11 = vsub.f32 %v1208_v62, %v1209_v63  ;;  %1675 = vmatpush.msra.mxu0 %v1400_v19 }
 0x432   : > { %1617 = vmatpush.msrb.mxu2 %v1398_v17  ;;  %1704 = vmatpush.msra.mxu1 %v1401_v20 }
 0x433   : > { %1638 = vmatpush.msrb.mxu3 %v1463_v40  ;;  %v6086_v21 = vperm.slane %v1210_v11, 0  ;;  %1676 = vmatpush.msra.mxu0 %v1392_v25  ;;  %v1369_v40 = vld [vmem:[#allocation22 + $0x38] sm:$0xff] }
 0x434   : > { %1618 = vmatpush.msrb.mxu2 %v1390_v23  ;;  %1705 = vmatpush.msra.mxu1 %v1393_v27 }
 0x435   : > { %1639 = vmatpush.msrb.mxu3 %v1455_v4  ;;  %1677 = vmatpush.msra.mxu0 %v1384_v30 }
 0x436   : > { %1619 = vmatpush.msrb.mxu2 %v1382_v28  ;;  %1706 = vmatpush.msra.mxu1 %v1385_v31 }
 0x437   : > { %1640 = vmatpush.msrb.mxu3 %v1447_v47  ;;  %1678 = vmatpush.msra.mxu0 %v1376_v35 }
 0x438   : > { %1620 = vmatpush.msrb.mxu2 %v1374_v32  ;;  %1707 = vmatpush.msra.mxu1 %v1377_v36 }
 0x439   : > { %1641 = vmatpush.msrb.mxu3 %v1439_v54  ;;  %1679 = vmatpush.msra.mxu0 %v1368_v2 }
 0x43a   : > { %1621 = vmatpush.msrb.mxu2 %v1366_v38  ;;  %1708 = vmatpush.msra.mxu1 %v1369_v40 }
 0x43b   : > { %1642 = vmatpush.msrb.mxu3 %v1431_v58 }
 0x43d   : > { %1643 = vmatpush.msrb.mxu3 %v1423_v6 }
 0x43f   : > { %1644 = vmatpush.msrb.mxu3 %v1415_v8 }
 0x441   : > { %1645 = vmatpush.msrb.mxu3 %v1407_v13 }
 0x443   : > { %1646 = vmatpush.msrb.mxu3 %v1399_v18 }
 0x445   : > { %1647 = vmatpush.msrb.mxu3 %v1391_v24 }
 0x447   : > { %1648 = vmatpush.msrb.mxu3 %v1383_v29 }
 0x449   : > { %1649 = vmatpush.msrb.mxu3 %v1375_v34 }
 0x44b   : > { %1650 = vmatpush.msrb.mxu3 %v1367_v39 }
 0x48d   : > { %v1332_v22 = vpop.f32.mrf.mxu1 }
 0x48e   : > { %v1347_v26 = vmul.f32 %v6084_v15, %v1332_v22 }
 0x490   : > { %v1354_v33 = vadd.f32 %v6086_v21, %v1347_v26 }
 0x492   : > { %v1358_v37 = vmax.f32 %v1354_v33, 0.0 }
 0x494   : > { %1506 = vmatmul.f32.vlgmr.msra.gmra.mxu2 %v1358_v37  ;;  %1535 = vmatmul.f32.vlgmr.msra.gmra.mxu3 %v1358_v37 }
 0x495   : > { %1564 = vmatmul.f32.vlgmr.msrb.gmra.mxu0 %v1358_v37  ;;  %1593 = vmatmul.f32.vlgmr.msrb.gmra.mxu1 %v1358_v37  ;;  %v1335_v41 = vpop.f32.mrf.mxu1 }
 0x496   : > { %v1348_v42 = vmul.f32 %v6084_v15, %v1335_v41 }
 0x498   : > { %v1355_v43 = vadd.f32 %v6086_v21, %v1348_v42 }
 0x49a   : > { %v1359_v3 = vmax.f32 %v1355_v43, 0.0 }
 0x49c   : > { %1509 = vmatmul.f32.gmra.mxu2 %v1359_v3  ;;  %1538 = vmatmul.f32.gmra.mxu3 %v1359_v3 }
 0x49d   : > { %1567 = vmatmul.f32.gmra.mxu0 %v1359_v3  ;;  %1596 = vmatmul.f32.gmra.mxu1 %v1359_v3  ;;  %v1338_v44 = vpop.f32.mrf.mxu1 }
 0x49e   : > { %v1349_v4 = vmul.f32 %v6084_v15, %v1338_v44 }
 0x4a0   : > { %v1356_v5 = vadd.f32 %v6086_v21, %v1349_v4 }
 0x4a2   : > { %v1360_v45 = vmax.f32 %v1356_v5, 0.0 }
 0x4a4   : > { %1512 = vmatmul.f32.gmra.mxu2 %v1360_v45  ;;  %1541 = vmatmul.f32.gmra.mxu3 %v1360_v45 }
 0x4a5   : > { %1570 = vmatmul.f32.gmra.mxu0 %v1360_v45  ;;  %1599 = vmatmul.f32.gmra.mxu1 %v1360_v45  ;;  %v1341_v46 = vpop.f32.mrf.mxu1 }
 0x4a6   : > { %v1350_v47 = vmul.f32 %v6084_v15, %v1341_v46 }
 0x4a8   : > { %v1357_v48 = vadd.f32 %v6086_v21, %v1350_v47 }
 0x4aa   : > { %v1361_v49 = vmax.f32 %v1357_v48, 0.0 }
 0x4ac   : > { %1515 = vmatmul.f32.gmra.mxu2 %v1361_v49  ;;  %1544 = vmatmul.f32.gmra.mxu3 %v1361_v49 }
 0x4ad   : > { %1573 = vmatmul.f32.gmra.mxu0 %v1361_v49  ;;  %1602 = vmatmul.f32.gmra.mxu1 %v1361_v49 }
 0x4b4   : > { %1622 = vmatmul.f32.vlgmr.msrb.gmra.mxu2 %v1358_v37  ;;  %1651 = vmatmul.f32.vlgmr.msrb.gmra.mxu3 %v1358_v37 }
 0x4b5   : > { %1680 = vmatmul.f32.vlgmr.msra.gmra.mxu0 %v1358_v37  ;;  %1709 = vmatmul.f32.vlgmr.msra.gmra.mxu1 %v1358_v37 }
 0x4bc   : > { %1625 = vmatmul.f32.gmra.mxu2 %v1359_v3  ;;  %1654 = vmatmul.f32.gmra.mxu3 %v1359_v3 }
 0x4bd   : > { %1683 = vmatmul.f32.gmra.mxu0 %v1359_v3  ;;  %1712 = vmatmul.f32.gmra.mxu1 %v1359_v3 }
 0x4c4   : > { %1628 = vmatmul.f32.gmra.mxu2 %v1360_v45  ;;  %1657 = vmatmul.f32.gmra.mxu3 %v1360_v45 }
 0x4c5   : > { %1686 = vmatmul.f32.gmra.mxu0 %v1360_v45  ;;  %1715 = vmatmul.f32.gmra.mxu1 %v1360_v45 }
 0x4cc   : > { %1631 = vmatmul.f32.gmra.mxu2 %v1361_v49  ;;  %1660 = vmatmul.f32.gmra.mxu3 %v1361_v49 }
 0x4cd   : > { %1689 = vmatmul.f32.gmra.mxu0 %v1361_v49  ;;  %1718 = vmatmul.f32.gmra.mxu1 %v1361_v49 }
 0x512   : > { %v6096_v50 = vpop.f32.mrf.mxu0  ;;  %v6098_v51 = vpop.f32.mrf.mxu1 }
 0x517   : > { %v6100_v54 = vpop.f32.mrf.mxu2  ;;  %v6102_v55 = vpop.f32.mrf.mxu3 }
 0x51a   : > { %v6104_v56 = vpop.f32.mrf.mxu0  ;;  %v6106_v57 = vpop.f32.mrf.mxu1 }
 0x51b   : > { %v2155_v58 = vmax.f32 %v6096_v50, %v6104_v56  ;;  %v2227_v60 = vmin.f32 %v6096_v50, %v6104_v56  ;;  %v2164_v61 = vmax.f32 %v6098_v51, %v6106_v57  ;;  %v2236_v62 = vmin.f32 %v6098_v51, %v6106_v57 }
 0x51f   : > { %v6116_v63 = vpop.f32.mrf.mxu2  ;;  %v6118_v1 = vpop.f32.mrf.mxu3 }
 0x520   : > { %v2137_v6 = vmax.f32 %v6100_v54, %v6116_v63  ;;  %v2209_v52 = vmin.f32 %v6100_v54, %v6116_v63  ;;  %v2146_v7 = vmax.f32 %v6102_v55, %v6118_v1  ;;  %v2218_v53 = vmin.f32 %v6102_v55, %v6118_v1 }
 0x522   : > { %v6128_v8 = vpop.f32.mrf.mxu0  ;;  %v6130_v10 = vpop.f32.mrf.mxu1 }
 0x523   : > { %v2156_v11 = vmax.f32 %v2155_v58, %v6128_v8  ;;  %v2228_v12 = vmin.f32 %v2227_v60, %v6128_v8  ;;  %v2165_v59 = vmax.f32 %v2164_v61, %v6130_v10  ;;  %v2237_v13 = vmin.f32 %v2236_v62, %v6130_v10 }
 0x527   : > { %v6136_v14 = vpop.f32.mrf.mxu2  ;;  %v6138_v15 = vpop.f32.mrf.mxu3 }
 0x528   : > { %v2138_v16 = vmax.f32 %v2137_v6, %v6136_v14  ;;  %v2210_v17 = vmin.f32 %v2209_v52, %v6136_v14  ;;  %v2147_v18 = vmax.f32 %v2146_v7, %v6138_v15  ;;  %v2219_v19 = vmin.f32 %v2218_v53, %v6138_v15 }
 0x52a   : > { %v6144_v20 = vpop.f32.mrf.mxu0  ;;  %v6146_v21 = vpop.f32.mrf.mxu1 }
 0x52b   : > { %v2157_v22 = vmax.f32 %v2156_v11, %v6144_v20  ;;  %v2229_v23 = vmin.f32 %v2228_v12, %v6144_v20  ;;  %1779 = vmatpush.msrb.mxu0 %v6144_v20  ;;  %v2166_v24 = vmax.f32 %v2165_v59, %v6146_v21  ;;  %v2238_v25 = vmin.f32 %v2237_v13, %v6146_v21 }
 0x52d   : > { %v2158_v26 = vrot.slane %v2157_v22, 4  ;;  %v2230_v27 = vrot.slane %v2229_v23, 4  ;;  %1780 = vmatpush.msrb.mxu0 %v6128_v8  ;;  %v2167_v28 = vrot.slane %v2166_v24, 4  ;;  %v2239_v29 = vrot.slane %v2238_v25, 4 }
 0x52f   : > { %v2159_v30 = vmax.f32 %v2157_v22, %v2158_v26  ;;  %v2231_v31 = vmin.f32 %v2229_v23, %v2230_v27  ;;  %1781 = vmatpush.msrb.mxu0 %v6104_v56  ;;  %v6155_v32 = vpop.f32.mrf.mxu2  ;;  %v6157_v33 = vpop.f32.mrf.mxu3  ;;  %v2168_v34 = vmax.f32 %v2166_v24, %v2167_v28  ;;  %v2240_v35 = vmin.f32 %v2238_v25, %v2239_v29 }
 0x530   : > { %v2139_v36 = vmax.f32 %v2138_v16, %v6155_v32  ;;  %1739 = vmatpush.msra.mxu2 %v6155_v32  ;;  %v2211_v39 = vmin.f32 %v2210_v17, %v6155_v32  ;;  %1759 = vmatpush.msra.mxu3 %v6157_v33  ;;  %v2148_v42 = vmax.f32 %v2147_v18, %v6157_v33 }
 0x531   : > { %v2160_v37 = vrot.slane %v2159_v30, 2  ;;  %v2232_v38 = vrot.slane %v2231_v31, 2  ;;  %1782 = vmatpush.msrb.mxu0 %v6096_v50  ;;  %v2169_v2 = vrot.slane %v2168_v34, 2  ;;  %v2241_v40 = vrot.slane %v2240_v35, 2 }
 0x532   : > { %v2140_v41 = vrot.slane %v2139_v36, 4  ;;  %v6165_v43 = vpop.f32.mrf.mxu0  ;;  %v6167_v3 = vpop.f32.mrf.mxu1  ;;  %1740 = vmatpush.msra.mxu2 %v6136_v14  ;;  %4766 = vmatmul.msk.f32.vlgmr.msrb.gmra.mxu0 %vm1723_vm3, %v6020_v9  ;;  %v2212_v5 = vrot.slane %v2211_v39, 4  ;;  %v2220_v45 = vmin.f32 %v2219_v19, %v6157_v33  ;;  %v2149_v49 = vrot.slane %v2148_v42, 4 }
 0x533   : > { %v2161_v44 = vmax.f32 %v2159_v30, %v2160_v37  ;;  %v2233_v4 = vmin.f32 %v2231_v31, %v2232_v38  ;;  %1760 = vmatpush.msra.mxu3 %v6138_v15  ;;  %v2170_v46 = vmax.f32 %v2168_v34, %v2169_v2  ;;  %v2242_v47 = vmin.f32 %v2240_v35, %v2241_v40 }
 0x534   : > { %v2141_v48 = vmax.f32 %v2139_v36, %v2140_v41  ;;  %1741 = vmatpush.msra.mxu2 %v6116_v63  ;;  %v2213_v61 = vmin.f32 %v2211_v39, %v2212_v5  ;;  %v2221_v62 = vrot.slane %v2220_v45, 4  ;;  %v2150_v53 = vmax.f32 %v2148_v42, %v2149_v49 }
 0x535   : > { %v2162_v58 = vrot.slane %v2161_v44, 1  ;;  %v2234_v60 = vrot.slane %v2233_v4, 1  ;;  %1761 = vmatpush.msra.mxu3 %v6118_v1  ;;  %v2171_v6 = vrot.slane %v2170_v46, 1  ;;  %v2243_v52 = vrot.slane %v2242_v47, 1 }
 0x536   : > { %v2142_v7 = vrot.slane %v2141_v48, 2  ;;  %1742 = vmatpush.msra.mxu2 %v6100_v54  ;;  %v2214_v59 = vrot.slane %v2213_v61, 2  ;;  %v2222_v13 = vmin.f32 %v2220_v45, %v2221_v62  ;;  %v2151_v23 = vrot.slane %v2150_v53, 2 }
 0x537   : > { %v6177_v11 = vmax.f32 %v2161_v44, %v2162_v58  ;;  %v6179_v12 = vmin.f32 %v2233_v4, %v2234_v60  ;;  %1762 = vmatpush.msra.mxu3 %v6102_v55  ;;  %v6182_v16 = vpop.f32.mrf.mxu2  ;;  %v6184_v17 = vpop.f32.mrf.mxu3  ;;  %v6187_v18 = vmax.f32 %v2170_v46, %v2171_v6  ;;  %v6189_v19 = vmin.f32 %v2242_v47, %v2243_v52 }
 0x538   : > { %1799 = vmatpush.msrb.mxu2 %v6146_v21  ;;  %v2143_v22 = vmax.f32 %v2141_v48, %v2142_v7  ;;  %4765 = vmatmul.msk.f32.vlgmr.msra.gmra.mxu3 %vm1723_vm3, %v6020_v9  ;;  %v2215_v24 = vmin.f32 %v2213_v61, %v2214_v59  ;;  %v2223_v25 = vrot.slane %v2222_v13, 2  ;;  %v2152_v27 = vmax.f32 %v2150_v53, %v2151_v23 }
 0x539   : > { %6836 = vst [vmem:[#allocation53_spill] sm:$0xff] %v6189_v19  ;;  %4764 = vmatmul.msk.f32.vlgmr.msra.gmra.mxu2 %vm1723_vm3, %v6020_v9 }
 0x53a   : > { %1800 = vmatpush.msrb.mxu2 %v6130_v10  ;;  %v2144_v26 = vrot.slane %v2143_v22, 1  ;;  %v6196_v28 = vpop.f32.mrf.mxu0  ;;  %v6198_v29 = vpop.f32.mrf.mxu1  ;;  %v2216_v30 = vrot.slane %v2215_v24, 1  ;;  %v2224_v31 = vmin.f32 %v2222_v13, %v2223_v25  ;;  %v2153_v37 = vrot.slane %v2152_v27, 1 }
 0x53b   : > { %v2191_v34 = vmax.f32 %v6165_v43, %v6196_v28  ;;  %v2263_v35 = vmin.f32 %v6165_v43, %v6196_v28  ;;  %v2200_v38 = vmax.f32 %v6167_v3, %v6198_v29  ;;  %v2272_v39 = vmin.f32 %v6167_v3, %v6198_v29 }
 0x53c   : > { %1801 = vmatpush.msrb.mxu2 %v6106_v57  ;;  %v6205_v36 = vmax.f32 %v2143_v22, %v2144_v26  ;;  %v6211_v2 = vmin.f32 %v2215_v24, %v2216_v30  ;;  %v2225_v40 = vrot.slane %v2224_v31, 1  ;;  %v6214_v41 = vmax.f32 %v2152_v27, %v2153_v37 }
 0x53e   : > { %6837 = vst [vmem:[#allocation54_spill] sm:$0xff] %v6211_v2  ;;  %1802 = vmatpush.msrb.mxu2 %v6098_v51  ;;  %v6216_v42 = vmin.f32 %v2224_v31, %v2225_v40  ;;  %v1939_v40 = vmul.f32 %v6130_v10, %v6130_v10 }
 0x53f   : > { %v6218_v44 = vpop.f32.mrf.mxu2  ;;  %v6220_v4 = vpop.f32.mrf.mxu3 }
 0x540   : > { %v2173_v5 = vmax.f32 %v6182_v16, %v6218_v44  ;;  %v2245_v45 = vmin.f32 %v6182_v16, %v6218_v44  ;;  %v2182_v46 = vmax.f32 %v6184_v17, %v6220_v4  ;;  %v2254_v47 = vmin.f32 %v6184_v17, %v6220_v4 }
 0x541   : > { %4767 = vmatmul.msk.f32.vlgmr.msrb.gmra.mxu2 %vm1723_vm3, %v6020_v9 }
 0x542   : > { %v6232_v48 = vpop.f32.mrf.mxu0  ;;  %v6234_v49 = vpop.f32.mrf.mxu1 }
 0x543   : > { %v2192_v58 = vmax.f32 %v2191_v34, %v6232_v48  ;;  %v2264_v60 = vmin.f32 %v2263_v35, %v6232_v48  ;;  %v2201_v61 = vmax.f32 %v2200_v38, %v6234_v49  ;;  %v2273_v62 = vmin.f32 %v2272_v39, %v6234_v49 }
 0x544   : > { %v1930_v34 = vmul.f32 %v6104_v56, %v6104_v56  ;;  %v1931_v35 = vmul.f32 %v6106_v57, %v6106_v57  ;;  %v1938_v39 = vmul.f32 %v6128_v8, %v6128_v8  ;;  %v1944_v8 = vmul.f32 %v6155_v32, %v6155_v32 }
 0x547   : > { %v6240_v6 = vpop.f32.mrf.mxu2  ;;  %v6242_v52 = vpop.f32.mrf.mxu3 }
 0x548   : > { %v2174_v7 = vmax.f32 %v2173_v5, %v6240_v6  ;;  %v2246_v53 = vmin.f32 %v2245_v45, %v6240_v6  ;;  %v2183_v59 = vmax.f32 %v2182_v46, %v6242_v52  ;;  %v2255_v13 = vmin.f32 %v2254_v47, %v6242_v52 }
 0x549   : > { %v1946_v5 = vmul.f32 %v6144_v20, %v6144_v20  ;;  %v1947_v45 = vmul.f32 %v6146_v21, %v6146_v21  ;;  %v1945_v20 = vmul.f32 %v6157_v33, %v6157_v33 }
 0x54a   : > { %v6248_v22 = vpop.f32.mrf.mxu0  ;;  %v6250_v23 = vpop.f32.mrf.mxu1 }
 0x54b   : > { %v2193_v24 = vmax.f32 %v2192_v58, %v6248_v22  ;;  %v2265_v25 = vmin.f32 %v2264_v60, %v6248_v22  ;;  %1859 = vmatpush.msrb.mxu1 %v6248_v22  ;;  %v2202_v26 = vmax.f32 %v2201_v61, %v6250_v23  ;;  %v2274_v27 = vmin.f32 %v2273_v62, %v6250_v23 }
 0x54c   : > { %1879 = vmatpush.msra.mxu2 %v6250_v23 }
 0x54d   : > { %v2194_v30 = vrot.slane %v2193_v24, 4  ;;  %v2266_v31 = vrot.slane %v2265_v25, 4  ;;  %1860 = vmatpush.msrb.mxu1 %v6232_v48  ;;  %v2203_v37 = vrot.slane %v2202_v26, 4  ;;  %v2275_v38 = vrot.slane %v2274_v27, 4 }
 0x54e   : > { %1880 = vmatpush.msra.mxu2 %v6234_v49 }
 0x54f   : > { %v2195_v56 = vmax.f32 %v2193_v24, %v2194_v30  ;;  %v2267_v46 = vmin.f32 %v2265_v25, %v2266_v31  ;;  %1861 = vmatpush.msrb.mxu1 %v6196_v28  ;;  %v6273_v57 = vpop.f32.mrf.mxu2  ;;  %v6275_v47 = vpop.f32.mrf.mxu3  ;;  %v2204_v58 = vmax.f32 %v2202_v26, %v2203_v37  ;;  %v2276_v60 = vmin.f32 %v2274_v27, %v2275_v38 }
 0x550   : > { %1881 = vmatpush.msra.mxu2 %v6198_v29  ;;  %v2175_v10 = vmax.f32 %v2174_v7, %v6273_v57  ;;  %v2247_v62 = vmin.f32 %v2246_v53, %v6273_v57  ;;  %1819 = vmatpush.msrb.mxu3 %v6273_v57  ;;  %v2184_v26 = vmax.f32 %v2183_v59, %v6275_v47 }
 0x551   : > { %v2196_v21 = vrot.slane %v2195_v56, 2  ;;  %v2268_v61 = vrot.slane %v2267_v46, 2  ;;  %1839 = vmatpush.msra.mxu0 %v6275_v47  ;;  %v2205_v24 = vrot.slane %v2204_v58, 2  ;;  %v2277_v25 = vrot.slane %v2276_v60, 2  ;;  %1862 = vmatpush.msrb.mxu1 %v6165_v43 }
 0x552   : > { %v2176_v32 = vrot.slane %v2175_v10, 4  ;;  %1882 = vmatpush.msra.mxu2 %v6167_v3  ;;  %v2248_v33 = vrot.slane %v2247_v62, 4  ;;  %v2256_v30 = vmin.f32 %v2255_v13, %v6275_v47  ;;  %v2185_v38 = vrot.slane %v2184_v26, 4  ;;  %1820 = vmatpush.msrb.mxu3 %v6240_v6 }
 0x553   : > { %v2197_v7 = vmax.f32 %v2195_v56, %v2196_v21  ;;  %v2269_v27 = vmin.f32 %v2267_v46, %v2268_v61  ;;  %2004 = vmatpush.msra.mxu1 %v1946_v5  ;;  %v2206_v53 = vmax.f32 %v2204_v58, %v2205_v24  ;;  %v2278_v31 = vmin.f32 %v2276_v60, %v2277_v25 }
 0x554   : > { %2024 = vmatpush.msrb.mxu2 %v1947_v45  ;;  %v2177_v37 = vmax.f32 %v2175_v10, %v2176_v32  ;;  %1840 = vmatpush.msra.mxu0 %v6242_v52  ;;  %v2249_v2 = vmin.f32 %v2247_v62, %v2248_v33  ;;  %v2257_v19 = vrot.slane %v2256_v30, 4  ;;  %v2186_v13 = vmax.f32 %v2184_v26, %v2185_v38 }
 0x555   : > { %v2198_v59 = vrot.slane %v2197_v7, 1  ;;  %v2270_v0 = vrot.slane %v2269_v27, 1  ;;  %2005 = vmatpush.msra.mxu1 %v1938_v39  ;;  %v2207_v56 = vrot.slane %v2206_v53, 1  ;;  %v2279_v46 = vrot.slane %v2278_v31, 1  ;;  %1821 = vmatpush.msrb.mxu3 %v6218_v44 }
 0x556   : > { %2025 = vmatpush.msrb.mxu2 %v1939_v40  ;;  %v2178_v21 = vrot.slane %v2177_v37, 2  ;;  %1841 = vmatpush.msra.mxu0 %v6220_v4  ;;  %v2250_v58 = vrot.slane %v2249_v2, 2  ;;  %v2258_v60 = vmin.f32 %v2256_v30, %v2257_v19  ;;  %v2187_v61 = vrot.slane %v2186_v13, 2 }
 0x557   : > { %v6294_v5 = vmax.f32 %v2197_v7, %v2198_v59  ;;  %v6296_v45 = vmin.f32 %v2269_v27, %v2270_v0  ;;  %2006 = vmatpush.msra.mxu1 %v1930_v34  ;;  %v6298_v10 = vmax.f32 %v2206_v53, %v2207_v56  ;;  %v6300_v39 = vmin.f32 %v2278_v31, %v2279_v46 }
 0x558   : > { %2026 = vmatpush.msrb.mxu2 %v1931_v35  ;;  %v2179_v40 = vmax.f32 %v2177_v37, %v2178_v21  ;;  %1822 = vmatpush.msrb.mxu3 %v6182_v16  ;;  %v2251_v62 = vmin.f32 %v2249_v2, %v2250_v58  ;;  %v2259_v24 = vrot.slane %v2258_v60, 2  ;;  %v1922_v0 = vmul.f32 %v6096_v50, %v6096_v50 }
 0x559   : > { %1842 = vmatpush.msra.mxu0 %v6184_v17  ;;  %4768 = vmatmul.msk.f32.vlgmr.msrb.gmra.mxu3 %vm1723_vm3, %v6020_v9  ;;  %v1923_v19 = vmul.f32 %v6098_v51, %v6098_v51  ;;  %v1951_v34 = vmul.f32 %v6250_v23, %v6250_v23  ;;  %v2188_v25 = vmax.f32 %v2186_v13, %v2187_v61 }
 0x55a   : > { %4771 = vmatmul.msk.f32.vlgmr.msra.gmra.mxu2 %vm1723_vm3, %v6020_v9  ;;  %v2180_v35 = vrot.slane %v2179_v40, 1  ;;  %1964 = vmatpush.msra.mxu3 %v1944_v8  ;;  %v1950_v2 = vmul.f32 %v6248_v22, %v6248_v22  ;;  %v2252_v32 = vrot.slane %v2251_v62, 1  ;;  %v2260_v26 = vmin.f32 %v2258_v60, %v2259_v24  ;;  %v1722_v24 = vld [vmem:[#allocation6] sm:$0xff] }
 0x55b   : > { %1984 = vmatpush.msrb.mxu0 %v1945_v20  ;;  %2007 = vmatpush.msra.mxu1 %v1922_v0  ;;  %v1936_v50 = vmul.f32 %v6136_v14, %v6136_v14  ;;  %v2189_v51 = vrot.slane %v2188_v25, 1  ;;  %v1937_v23 = vmul.f32 %v6138_v15, %v6138_v15  ;;  %v1943_v22 = vmul.f32 %v6234_v49, %v6234_v49 }
 0x55c   : > { %2027 = vmatpush.msrb.mxu2 %v1923_v19  ;;  %v6318_v7 = vmax.f32 %v2179_v40, %v2180_v35  ;;  %4770 = vmatmul.msk.f32.vlgmr.msrb.gmra.mxu1 %vm1723_vm3, %v6020_v9  ;;  %v6326_v8 = vmin.f32 %v2251_v62, %v2252_v32  ;;  %v2261_v20 = vrot.slane %v2260_v26, 1  ;;  %v1942_v14 = vmul.f32 %v6232_v48, %v6232_v48 }
 0x55d   : > { %2084 = vmatpush.msrb.mxu1 %v1950_v2  ;;  %1965 = vmatpush.msra.mxu3 %v1936_v50  ;;  %v1928_v27 = vmul.f32 %v6116_v63, %v6116_v63  ;;  %v6332_v33 = vmax.f32 %v2188_v25, %v2189_v51  ;;  %v1929_v15 = vmul.f32 %v6118_v1, %v6118_v1 }
 0x55e   : > { %2104 = vmatpush.msra.mxu2 %v1951_v34  ;;  %1985 = vmatpush.msrb.mxu0 %v1937_v23  ;;  %v1935_v49 = vmul.f32 %v6198_v29, %v6198_v29  ;;  %v6338_v30 = vmin.f32 %v2260_v26, %v2261_v20  ;;  %v1934_v48 = vmul.f32 %v6196_v28, %v6196_v28 }
 0x55f   : > { %2085 = vmatpush.msrb.mxu1 %v1942_v14  ;;  %1966 = vmatpush.msra.mxu3 %v1928_v27  ;;  %v1920_v63 = vmul.f32 %v6100_v54, %v6100_v54  ;;  %v1921_v53 = vmul.f32 %v6102_v55, %v6102_v55  ;;  %v1948_v1 = vmul.f32 %v6273_v57, %v6273_v57 }
 0x560   : > { %2105 = vmatpush.msra.mxu2 %v1943_v22  ;;  %1986 = vmatpush.msrb.mxu0 %v1929_v15  ;;  %v1949_v29 = vmul.f32 %v6275_v47, %v6275_v47  ;;  %v1926_v28 = vmul.f32 %v6165_v43, %v6165_v43  ;;  %v1927_v54 = vmul.f32 %v6167_v3, %v6167_v3 }
 0x561   : > { %2086 = vmatpush.msrb.mxu1 %v1934_v48  ;;  %4769 = vmatmul.msk.f32.vlgmr.msra.gmra.mxu0 %vm1723_vm3, %v6020_v9  ;;  %v1940_v55 = vmul.f32 %v6240_v6, %v6240_v6  ;;  %v1941_v57 = vmul.f32 %v6242_v52, %v6242_v52  ;;  %v1932_v47 = vmul.f32 %v6218_v44, %v6218_v44 }
 0x562   : > { %2106 = vmatpush.msra.mxu2 %v1935_v49  ;;  %1967 = vmatpush.msra.mxu3 %v1920_v63  ;;  %v1933_v43 = vmul.f32 %v6220_v4, %v6220_v4  ;;  %v1924_v3 = vmul.f32 %v6182_v16, %v6182_v16  ;;  %v1925_v6 = vmul.f32 %v6184_v17, %v6184_v17 }
 0x563   : > { %1987 = vmatpush.msrb.mxu0 %v1921_v53  ;;  %2087 = vmatpush.msrb.mxu1 %v1926_v28  ;;  %v1919_v28 = vld [vmem:[#allocation7] sm:$0xff] }
 0x564   : > { %2044 = vmatpush.msrb.mxu3 %v1948_v1  ;;  %2107 = vmatpush.msra.mxu2 %v1927_v54 }
 0x565   : > { %2064 = vmatpush.msra.mxu0 %v1949_v29  ;;  %4772 = vmatmul.msk.f32.vlgmr.msra.gmra.mxu3 %vm1723_vm3, %v6020_v9 }
 0x566   : > { %2045 = vmatpush.msrb.mxu3 %v1940_v55  ;;  %4775 = vmatmul.msk.f32.vlgmr.msrb.gmra.mxu2 %vm1723_vm3, %v6020_v9 }
 0x567   : > { %2065 = vmatpush.msra.mxu0 %v1941_v57  ;;  %4774 = vmatmul.msk.f32.vlgmr.msra.gmra.mxu1 %vm1723_vm3, %v6020_v9 }
 0x568   : > { %2046 = vmatpush.msrb.mxu3 %v1932_v47 }
 0x569   : > { %2066 = vmatpush.msra.mxu0 %v1933_v43 }
 0x56a   : > { %2047 = vmatpush.msrb.mxu3 %v1924_v3  ;;  %4773 = vmatmul.msk.f32.vlgmr.msrb.gmra.mxu0 %vm1723_vm3, %v6020_v9 }
 0x56b   : > { %2067 = vmatpush.msra.mxu0 %v1925_v6 }
 0x56d   : > { %4776 = vmatmul.msk.f32.vlgmr.msrb.gmra.mxu3 %vm1723_vm3, %v6020_v9 }
 0x56e   : > { %4779 = vmatmul.msk.f32.vlgmr.msra.gmra.mxu2 %vm1723_vm3, %v6020_v9 }
 0x56f   : > { %4778 = vmatmul.msk.f32.vlgmr.msrb.gmra.mxu1 %vm1723_vm3, %v6020_v9 }
 0x572   : > { %4777 = vmatmul.msk.f32.vlgmr.msra.gmra.mxu0 %vm1723_vm3, %v6020_v9 }
 0x5af   : > { %v1784_v4 = vpop.f32.mrf.mxu0 }
 0x5b0   : > { %v1896_v37 = vrot.slane %v1784_v4, 6 }
 0x5bb   : > { %v1764_v17 = vpop.f32.mrf.mxu3 }
 0x5bc   : > { %v1744_v16 = vpop.f32.mrf.mxu2  ;;  %v1895_v52 = vrot.slane %v1764_v17, 7 }
 0x5be   : > { %v1903_v58 = vsel %vm1902_vm4, %v1744_v16, %v1895_v52 }
 0x5c4   : > { %v1804_v44 = vpop.f32.mrf.mxu2 }
 0x5c5   : > { %v1897_v38 = vrot.slane %v1804_v44, 5 }
 0x5c7   : > { %v1905_v60 = vsel %vm1904_vm5, %v1896_v37, %v1897_v38 }
 0x5c8   : > { %v1907_v0 = vsel %vm1906_vm7, %v1903_v58, %v1905_v60 }
 0x5d9   : > { %v1864_v31 = vpop.f32.mrf.mxu1 }
 0x5da   : > { %v1900_v59 = vrot.slane %v1864_v31, 2 }
 0x5dc   : > { %v1824_v56 = vpop.f32.mrf.mxu3 }
 0x5dd   : > { %v1884_v46 = vpop.f32.mrf.mxu2  ;;  %v1898_v21 = vrot.slane %v1824_v56, 4 }
 0x5de   : > { %v1901_v13 = vrot.slane %v1884_v46, 1  ;;  %v1844_v9 = vpop.f32.mrf.mxu0 }
 0x5df   : > { %v1899_v40 = vrot.slane %v1844_v9, 3 }
 0x5e0   : > { %v1911_v61 = vsel %vm1910_vm6, %v1900_v59, %v1901_v13 }
 0x5e1   : > { %v1909_v62 = vsel %vm1908_vm8, %v1898_v21, %v1899_v40 }
 0x5e2   : > { %v1913_v19 = vsel %vm1912_vm9, %v1909_v62, %v1911_v61 }
 0x5e3   : > { %v1915_v34 = vsel %vm1914_vm10, %v1907_v0, %v1913_v19 }
 0x5e4   : > { %v1917_v35 = vadd.f32 %v1915_v34, %v1722_v24  ;;  %v2009_v25 = vpop.f32.mrf.mxu1 }
 0x5e5   : > { %v2121_v23 = vrot.slane %v2009_v25, 6 }
 0x5e6   : > { %1918 = vst [vmem:[#allocation6] sm:$0xff] %v1917_v35 }
 0x5e7   : > { %v1989_v2 = vpop.f32.mrf.mxu0 }
 0x5e8   : > { %v1969_v32 = vpop.f32.mrf.mxu3  ;;  %v2120_v51 = vrot.slane %v1989_v2, 7 }
 0x5e9   : > { %v2029_v26 = vpop.f32.mrf.mxu2 }
 0x5ea   : > { %v2122_v22 = vrot.slane %v2029_v26, 5  ;;  %v2127_v48 = vsel %vm1902_vm4, %v1969_v32, %v2120_v51 }
 0x5ec   : > { %v2089_v50 = vpop.f32.mrf.mxu1  ;;  %v2128_v63 = vsel %vm1904_vm5, %v2121_v23, %v2122_v22 }
 0x5ed   : > { %v2125_v27 = vrot.slane %v2089_v50, 2  ;;  %v2129_v55 = vsel %vm1906_vm7, %v2127_v48, %v2128_v63 }
 0x5ef   : > { %v2069_v20 = vpop.f32.mrf.mxu0 }
 0x5f0   : > { %v2124_v14 = vrot.slane %v2069_v20, 3  ;;  %v2049_v15 = vpop.f32.mrf.mxu3 }
 0x5f1   : > { %v2109_v49 = vpop.f32.mrf.mxu2  ;;  %v2123_v53 = vrot.slane %v2049_v15, 4 }
 0x5f2   : > { %v2126_v1 = vrot.slane %v2109_v49, 1 }
 0x5f3   : > { %v2130_v29 = vsel %vm1908_vm8, %v2123_v53, %v2124_v14 }
 0x5f4   : > { %v2131_v54 = vsel %vm1910_vm6, %v2125_v27, %v2126_v1 }
 0x5f5   : > { %v2132_v57 = vsel %vm1912_vm9, %v2130_v29, %v2131_v54  ;;  %2283 = sbr.rel (%p4780_p11) target bundleno = 1540 (0x604), region = 180 }
 0x5f6   : > { %v2133_v47 = vsel %vm1914_vm10, %v2129_v55, %v2132_v57 }
 0x5f7   : > { %v2135_v43 = vadd.f32 %v2133_v47, %v1919_v28 }
 0x5f9   : > { %2136 = vst [vmem:[#allocation7] sm:$0xff] %v2135_v43 }
 0x5fa   : > { %v2292_v3 = vrot.slane %v6214_v41, 7  ;;  %v2293_v6 = vrot.slane %v6177_v11, 6  ;;  %v2294_v16 = vrot.slane %v6187_v18, 5  ;;  %v2295_v17 = vrot.slane %v6318_v7, 4  ;;  %v6839_v56 = vld [vmem:[#allocation53_spill] sm:$0xff]  ;;  %v6840_v0 = vld [vmem:[#allocation54_spill] sm:$0xff] }
 0x5fb   : > { %v2296_v44 = vrot.slane %v6332_v33, 3  ;;  %v2297_v4 = vrot.slane %v6294_v5, 2  ;;  %v2298_v52 = vrot.slane %v6298_v10, 1  ;;  %v2316_v31 = vrot.slane %v6216_v42, 7 }
 0x5fc   : > { %v2299_v37 = vsel %vm1902_vm4, %v6205_v36, %v2292_v3  ;;  %v2300_v38 = vsel %vm1904_vm5, %v2293_v6, %v2294_v16  ;;  %v2317_v59 = vrot.slane %v6179_v12, 6  ;;  %v2318_v46 = vrot.slane %v6839_v56, 5 }
 0x5fd   : > { %v2301_v21 = vsel %vm1906_vm7, %v2299_v37, %v2300_v38  ;;  %v2302_v13 = vsel %vm1908_vm8, %v2295_v17, %v2296_v44  ;;  %v2303_v58 = vsel %vm1910_vm6, %v2297_v4, %v2298_v52  ;;  %v2319_v9 = vrot.slane %v6326_v8, 4 }
 0x5fe   : > { %v2304_v60 = vsel %vm1912_vm9, %v2302_v13, %v2303_v58  ;;  %v2320_v40 = vrot.slane %v6338_v30, 3  ;;  %v2321_v61 = vrot.slane %v6296_v45, 2  ;;  %v2322_v62 = vrot.slane %v6300_v39, 1 }
 0x5ff   : > { %v2305_v24 = vsel %vm1914_vm10, %v2301_v21, %v2304_v60  ;;  %v2323_v19 = vsel %vm1902_vm4, %v6840_v0, %v2316_v31  ;;  %v2324_v34 = vsel %vm1904_vm5, %v2317_v59, %v2318_v46 }
 0x600   : > { %2307 = vst [vmem:[#allocation8] sm:$0xff] %v2305_v24  ;;  %v2325_v35 = vsel %vm1906_vm7, %v2323_v19, %v2324_v34  ;;  %v2326_v25 = vsel %vm1908_vm8, %v2319_v9, %v2320_v40  ;;  %v2327_v2 = vsel %vm1910_vm6, %v2321_v61, %v2322_v62 }
 0x601   : > { %v2328_v32 = vsel %vm1912_vm9, %v2326_v25, %v2327_v2 }
 0x602   : > { %v2329_v26 = vsel %vm1914_vm10, %v2325_v35, %v2328_v32 }
 0x603   : > { %2331 = vst [vmem:[#allocation9] sm:$0xff] %v2329_v26 }
 0x604 PF: > { %s6841_s3 = sld [smem:[#allocation47_spill]] }
 0x60a   : > { %p4781_p12 = scmp.le.s32.totalorder %s6841_s3, 0 }
 0x60c   : > { %2335 = sbr.rel (%p4781_p12) target bundleno = 1565 (0x61d), region = 184 }
 0x611   : > { %v2345_v50 = vrot.slane %v6214_v41, 7  ;;  %v2346_v51 = vrot.slane %v6177_v11, 6  ;;  %v2347_v23 = vrot.slane %v6187_v18, 5  ;;  %v2348_v22 = vrot.slane %v6318_v7, 4  ;;  %v6842_v11 = vld [vmem:[#allocation53_spill] sm:$0xff]  ;;  %v6843_v29 = vld [vmem:[#allocation54_spill] sm:$0xff] }
 0x612   : > { %v2349_v20 = vrot.slane %v6332_v33, 3  ;;  %v2350_v14 = vrot.slane %v6294_v5, 2  ;;  %v2351_v27 = vrot.slane %v6298_v10, 1  ;;  %v2371_v15 = vrot.slane %v6216_v42, 7  ;;  %v2336_v18 = vld [vmem:[#allocation8] sm:$0xff]  ;;  %v2362_v57 = vld [vmem:[#allocation9] sm:$0xff] }
 0x613   : > { %v2352_v49 = vsel %vm1902_vm4, %v6205_v36, %v2345_v50  ;;  %v2353_v48 = vsel %vm1904_vm5, %v2346_v51, %v2347_v23  ;;  %v2372_v41 = vrot.slane %v6179_v12, 6  ;;  %v2373_v63 = vrot.slane %v6842_v11, 5 }
 0x614   : > { %v2354_v7 = vsel %vm1906_vm7, %v2352_v49, %v2353_v48  ;;  %v2355_v33 = vsel %vm1908_vm8, %v2348_v22, %v2349_v20  ;;  %v2356_v5 = vsel %vm1910_vm6, %v2350_v14, %v2351_v27  ;;  %v2374_v10 = vrot.slane %v6326_v8, 4 }
 0x615   : > { %v2357_v42 = vsel %vm1912_vm9, %v2355_v33, %v2356_v5  ;;  %v2375_v53 = vrot.slane %v6338_v30, 3  ;;  %v2376_v36 = vrot.slane %v6296_v45, 2  ;;  %v2377_v1 = vrot.slane %v6300_v39, 1 }
 0x616   : > { %v2358_v12 = vsel %vm1914_vm10, %v2354_v7, %v2357_v42  ;;  %v2378_v28 = vsel %vm1902_vm4, %v6843_v29, %v2371_v15  ;;  %v2379_v54 = vsel %vm1904_vm5, %v2372_v41, %v2373_v63 }
 0x617   : > { %v2360_v55 = vmax.f32 %v2336_v18, %v2358_v12  ;;  %v2380_v47 = vsel %vm1906_vm7, %v2378_v28, %v2379_v54  ;;  %v2381_v8 = vsel %vm1908_vm8, %v2374_v10, %v2375_v53  ;;  %v2382_v43 = vsel %vm1910_vm6, %v2376_v36, %v2377_v1 }
 0x618   : > { %v2383_v30 = vsel %vm1912_vm9, %v2381_v8, %v2382_v43 }
 0x619   : > { %2361 = vst [vmem:[#allocation8] sm:$0xff] %v2360_v55  ;;  %v2384_v45 = vsel %vm1914_vm10, %v2380_v47, %v2383_v30 }
 0x61a   : > { %v2386_v39 = vmin.f32 %v2362_v57, %v2384_v45 }
 0x61c   : > { %2387 = vst [vmem:[#allocation9] sm:$0xff] %v2386_v39 }
 0x61d PF: > { %s6844_s6 = sld [smem:[#allocation47_spill]] }
 0x623   : > { %p4782_p13 = scmp.ne.s32.totalorder %s6844_s6, 2 }
 0x624   : > { %s6845_s20 = sld [smem:[#allocation48_spill]] (!%p4782_p13) }
 0x625   : > { %2390 = sbr.rel (%p4782_p13) target bundleno = 1606 (0x646), region = 188 }
 0x62a   : > { %v2396_v3 = vld [vmem:[#allocation10 + $0x10] sm:$0xff]  ;;  %v2397_v6 = vld [vmem:[#allocation10] sm:$0xff]  ;;  %v2398_v16 = vld [vmem:[#allocation10 + $0x18] sm:$0xff]  ;;  %v6846_v44 = vlaneseq  ;;  %v2393_v31 = vstv %s6845_s20 }
 0x62b   : > { %2423 = vst [vmem:[#allocation1] ss:$2 sm:$0xff] %v2396_v3  ;;  %v2399_v17 = vld [vmem:[#allocation10 + $0x8] sm:$0xff]  ;;  %v2395_v52 = vld [vmem:[#allocation8] sm:$0xff]  ;;  %v2479_v38 = vld [vmem:[#allocation11] sm:$0xff] }
 0x62c   : > { %2425 = vst [vmem:[#allocation1 + $0x10] ss:$2 sm:$0xff] %v2397_v6  ;;  %v2392_v4 = vshrl.u32 %v6846_v44, 7  ;;  %v2404_v37 = vperm.slane %v2395_v52, 1  ;;  %v2403_v56 = vperm.slane %v2395_v52, 0  ;;  %v2405_v46 = vperm.slane %v2395_v52, 2 }
 0x62d   : > { %2427 = vst [vmem:[#allocation1 + $0x20] ss:$2 sm:$0xff] %v2398_v16  ;;  %v2406_v21 = vperm.slane %v2395_v52, 3  ;;  %v2480_v13 = vld [vmem:[#allocation11 + $0x18] sm:$0xff]  ;;  %v2481_v58 = vld [vmem:[#allocation11 + $0x8] sm:$0xff]  ;;  %v2407_v9 = vperm.slane %v2395_v52, 4 }
 0x62e   : > { %2429 = vst [vmem:[#allocation1 + $0x30] ss:$2 sm:$0xff] %v2399_v17  ;;  %vm6463_vm11 = vcmp.eq.s32.totalorder %v2392_v4, %v2393_v31  ;;  %v2408_v60 = vperm.slane %v2395_v52, 5  ;;  %v2409_v40 = vperm.slane %v2395_v52, 6  ;;  %v2410_v61 = vperm.slane %v2395_v52, 7  ;;  %v2482_v19 = vld [vmem:[#allocation11 + $0x10] sm:$0xff] }
 0x62f   : > { %v6469_v35 = vld [vmem:[#allocation9] sm:$0xff] }
 0x630   : > { %v2485_v63 = vperm.slane %v6469_v35, 1  ;;  %v2484_v5 = vperm.slane %v6469_v35, 0  ;;  %v2487_v42 = vperm.slane %v6469_v35, 3  ;;  %v2489_v1 = vperm.slane %v6469_v35, 5 }
 0x631   : > { %v2486_v29 = vperm.slane %v6469_v35, 2  ;;  %v2488_v57 = vperm.slane %v6469_v35, 4  ;;  %v2491_v47 = vperm.slane %v6469_v35, 7  ;;  %v2490_v16 = vperm.slane %v6469_v35, 6 }
 0x632   : > { %v2430_v62 = vld.sshfl [vmem:[#allocation1] sm:$0xff pattern:$0x75316420]  ;;  %v2431_v24 = vld.sshfl [vmem:[#allocation1 + $0x8] sm:$0xff pattern:$0x75316420] }
 0x633   : > { %2504 = vst [vmem:[#allocation1] ss:$2 sm:$0xff] %v2479_v38  ;;  %v2432_v0 = vld.sshfl [vmem:[#allocation1 + $0x10] sm:$0xff pattern:$0x75316420]  ;;  %v2447_v34 = vsel %vm6463_vm11, %v2404_v37, %v2431_v24  ;;  %v2446_v23 = vsel %vm6463_vm11, %v2403_v56, %v2430_v62 }
 0x634   : > { %v2433_v25 = vld.sshfl [vmem:[#allocation1 + $0x18] sm:$0xff pattern:$0x75316420]  ;;  %v2434_v2 = vld.sshfl [vmem:[#allocation1 + $0x20] sm:$0xff pattern:$0x75316420]  ;;  %v2448_v15 = vsel %vm6463_vm11, %v2405_v46, %v2432_v0 }
 0x635   : > { %2506 = vst [vmem:[#allocation1 + $0x10] ss:$2 sm:$0xff] %v2480_v13  ;;  %v2435_v32 = vld.sshfl [vmem:[#allocation1 + $0x28] sm:$0xff pattern:$0x75316420]  ;;  %v2462_v26 = vrot.slane %v2447_v34, 4  ;;  %v2449_v50 = vsel %vm6463_vm11, %v2406_v21, %v2433_v25  ;;  %v2450_v41 = vsel %vm6463_vm11, %v2407_v9, %v2434_v2 }
 0x636   : > { %2508 = vst [vmem:[#allocation1 + $0x20] ss:$2 sm:$0xff] %v2481_v58  ;;  %v2436_v51 = vld.sshfl [vmem:[#allocation1 + $0x30] sm:$0xff pattern:$0x75316420]  ;;  %v2463_v22 = vrot.slane %v2449_v50, 4  ;;  %v2451_v20 = vsel %vm6463_vm11, %v2408_v60, %v2435_v32 }
 0x637   : > { %v2437_v14 = vld.sshfl [vmem:[#allocation1 + $0x38] sm:$0xff pattern:$0x75316420]  ;;  %v2466_v27 = vsel %vm1914_vm10, %v2446_v23, %v2462_v26  ;;  %v2464_v49 = vrot.slane %v2451_v20, 4  ;;  %v2452_v33 = vsel %vm6463_vm11, %v2409_v40, %v2436_v51 }
 0x638   : > { %2510 = vst [vmem:[#allocation1 + $0x30] ss:$2 sm:$0xff] %v2482_v19  ;;  %v2467_v48 = vsel %vm1914_vm10, %v2448_v15, %v2463_v22  ;;  %v2453_v11 = vsel %vm6463_vm11, %v2410_v61, %v2437_v14 }
 0x639   : > { %2474 = vst [vmem:[#allocation10 + $0x10] sm:$0xff] %v2466_v27  ;;  %v2468_v18 = vsel %vm1914_vm10, %v2450_v41, %v2464_v49  ;;  %v2465_v7 = vrot.slane %v2453_v11, 4 }
 0x63a   : > { %2475 = vst [vmem:[#allocation10] sm:$0xff] %v2467_v48  ;;  %v2511_v10 = vld.sshfl [vmem:[#allocation1] sm:$0xff pattern:$0x75316420] }
 0x63b   : > { %2476 = vst [vmem:[#allocation10 + $0x18] sm:$0xff] %v2468_v18  ;;  %v2469_v53 = vsel %vm1914_vm10, %v2452_v33, %v2465_v7  ;;  %v2512_v36 = vld.sshfl [vmem:[#allocation1 + $0x8] sm:$0xff pattern:$0x75316420]  ;;  %v2527_v8 = vsel %vm6463_vm11, %v2484_v5, %v2511_v10 }
 0x63c   : > { %2477 = vst [vmem:[#allocation10 + $0x8] sm:$0xff] %v2469_v53  ;;  %v2528_v12 = vsel %vm6463_vm11, %v2485_v63, %v2512_v36  ;;  %v2513_v28 = vld.sshfl [vmem:[#allocation1 + $0x10] sm:$0xff pattern:$0x75316420] }
 0x63d   : > { %v2543_v54 = vrot.slane %v2528_v12, 4  ;;  %v2514_v55 = vld.sshfl [vmem:[#allocation1 + $0x18] sm:$0xff pattern:$0x75316420]  ;;  %v2529_v44 = vsel %vm6463_vm11, %v2486_v29, %v2513_v28 }
 0x63e   : > { %v2530_v43 = vsel %vm6463_vm11, %v2487_v42, %v2514_v55  ;;  %v2515_v30 = vld.sshfl [vmem:[#allocation1 + $0x20] sm:$0xff pattern:$0x75316420]  ;;  %v2516_v45 = vld.sshfl [vmem:[#allocation1 + $0x28] sm:$0xff pattern:$0x75316420] }
 0x63f   : > { %v2547_v39 = vsel %vm1914_vm10, %v2527_v8, %v2543_v54  ;;  %v2544_v3 = vrot.slane %v2530_v43, 4  ;;  %v2532_v6 = vsel %vm6463_vm11, %v2489_v1, %v2516_v45  ;;  %v2517_v17 = vld.sshfl [vmem:[#allocation1 + $0x30] sm:$0xff pattern:$0x75316420]  ;;  %v2531_v37 = vsel %vm6463_vm11, %v2488_v57, %v2515_v30 }
 0x640   : > { %2555 = vst [vmem:[#allocation11] sm:$0xff] %v2547_v39  ;;  %v2545_v4 = vrot.slane %v2532_v6, 4  ;;  %v2518_v52 = vld.sshfl [vmem:[#allocation1 + $0x38] sm:$0xff pattern:$0x75316420]  ;;  %v2533_v21 = vsel %vm6463_vm11, %v2490_v16, %v2517_v17 }
 0x641   : > { %v2548_v31 = vsel %vm1914_vm10, %v2529_v44, %v2544_v3  ;;  %v2534_v38 = vsel %vm6463_vm11, %v2491_v47, %v2518_v52 }
 0x642   : > { %2556 = vst [vmem:[#allocation11 + $0x18] sm:$0xff] %v2548_v31  ;;  %v2549_v56 = vsel %vm1914_vm10, %v2531_v37, %v2545_v4  ;;  %v2546_v46 = vrot.slane %v2534_v38, 4 }
 0x643   : > { %2557 = vst [vmem:[#allocation11 + $0x8] sm:$0xff] %v2549_v56 }
 0x644   : > { %v2550_v13 = vsel %vm1914_vm10, %v2533_v21, %v2546_v46 }
 0x645   : > { %2558 = vst [vmem:[#allocation11 + $0x10] sm:$0xff] %v2550_v13 }
 0x646 PF: > { %p2559_p0 = pnand %p1185_p9, %p860_p4 }
 0x647   : > { %s6856_s4 = sld [smem:[#allocation64_spill]] (!%p2559_p0) }
 0x648   : > { %2562 = sbr.rel (%p2559_p0) target bundleno = 2552 (0x9f8), region = 192 }
 0x64d   : > { %v2720_v58 = vld [vmem:[#allocation26 + $0x1e0] sm:$0xff]  ;;  %vm2602_vm15 = vcmask 1043456   ;;  %vm3967_vm11 = vcmask 1040384  }
 0x64e   : > { %v2848_v9 = vld [vmem:[#allocation26 + $0x5e0] sm:$0xff]  ;;  %3199 = vmatpush.msra.mxu0 %v2720_v58 }
 0x64f   : > { %v2716_v60 = vld [vmem:[#allocation26 + $0x1c0] sm:$0xff]  ;;  %3239 = vmatpush.msra.mxu2 %v2848_v9 }
 0x650   : > { %v2784_v40 = vld [vmem:[#allocation26 + $0x3e0] sm:$0xff]  ;;  %3200 = vmatpush.msra.mxu0 %v2716_v60 }
 0x651   : > { %v2844_v59 = vld [vmem:[#allocation26 + $0x5c0] sm:$0xff]  ;;  %3219 = vmatpush.msra.mxu1 %v2784_v40 }
 0x652   : > { %v2912_v61 = vld [vmem:[#allocation26 + $0x7e0] sm:$0xff]  ;;  %3240 = vmatpush.msra.mxu2 %v2844_v59 }
 0x653   : > { %3259 = vmatpush.msra.mxu3 %v2912_v61  ;;  %v2712_v62 = vld [vmem:[#allocation26 + $0x1a0] sm:$0xff] }
 0x654   : > { %v2780_v24 = vld [vmem:[#allocation26 + $0x3c0] sm:$0xff]  ;;  %3201 = vmatpush.msra.mxu0 %v2712_v62 }
 0x655   : > { %v2840_v0 = vld [vmem:[#allocation26 + $0x5a0] sm:$0xff]  ;;  %3220 = vmatpush.msra.mxu1 %v2780_v24 }
 0x656   : > { %v2908_v19 = vld [vmem:[#allocation26 + $0x7c0] sm:$0xff]  ;;  %3241 = vmatpush.msra.mxu2 %v2840_v0 }
 0x657   : > { %v2776_v34 = vld [vmem:[#allocation26 + $0x3a0] sm:$0xff]  ;;  %3260 = vmatpush.msra.mxu3 %v2908_v19 }
 0x658   : > { %v2708_v35 = vld [vmem:[#allocation26 + $0x180] sm:$0xff]  ;;  %3221 = vmatpush.msra.mxu1 %v2776_v34 }
 0x659   : > { %v2836_v25 = vld [vmem:[#allocation26 + $0x580] sm:$0xff]  ;;  %3202 = vmatpush.msra.mxu0 %v2708_v35 }
 0x65a   : > { %v2904_v2 = vld [vmem:[#allocation26 + $0x7a0] sm:$0xff]  ;;  %3242 = vmatpush.msra.mxu2 %v2836_v25 }
 0x65b   : > { %v2772_v32 = vld [vmem:[#allocation26 + $0x380] sm:$0xff]  ;;  %3261 = vmatpush.msra.mxu3 %v2904_v2 }
 0x65c   : > { %v2900_v26 = vld [vmem:[#allocation26 + $0x780] sm:$0xff]  ;;  %3222 = vmatpush.msra.mxu1 %v2772_v32 }
 0x65d   : > { %v2704_v50 = vld [vmem:[#allocation26 + $0x160] sm:$0xff]  ;;  %3262 = vmatpush.msra.mxu3 %v2900_v26 }
 0x65e   : > { %v2832_v51 = vld [vmem:[#allocation26 + $0x560] sm:$0xff]  ;;  %3203 = vmatpush.msra.mxu0 %v2704_v50 }
 0x65f   : > { %v2768_v23 = vld [vmem:[#allocation26 + $0x360] sm:$0xff]  ;;  %3243 = vmatpush.msra.mxu2 %v2832_v51 }
 0x660   : > { %v2896_v22 = vld [vmem:[#allocation26 + $0x760] sm:$0xff]  ;;  %3223 = vmatpush.msra.mxu1 %v2768_v23  ;;  %v2565_v23 = vld [vmem:[#allocation7] sm:$0xff] }
 0x661   : > { %v2700_v20 = vld [vmem:[#allocation26 + $0x140] sm:$0xff]  ;;  %3263 = vmatpush.msra.mxu3 %v2896_v22 }
 0x662   : > { %v2828_v14 = vld [vmem:[#allocation26 + $0x540] sm:$0xff]  ;;  %3204 = vmatpush.msra.mxu0 %v2700_v20 }
 0x663   : > { %v2764_v27 = vld [vmem:[#allocation26 + $0x340] sm:$0xff]  ;;  %3244 = vmatpush.msra.mxu2 %v2828_v14  ;;  %v2566_v14 = vmul.f32 0.003125, %v2565_v23 }
 0x664   : > { %v2892_v15 = vld [vmem:[#allocation26 + $0x740] sm:$0xff]  ;;  %3224 = vmatpush.msra.mxu1 %v2764_v27 }
 0x665   : > { %v2696_v49 = vld [vmem:[#allocation26 + $0x120] sm:$0xff]  ;;  %3264 = vmatpush.msra.mxu3 %v2892_v15 }
 0x666   : > { %v2824_v48 = vld [vmem:[#allocation26 + $0x520] sm:$0xff]  ;;  %3205 = vmatpush.msra.mxu0 %v2696_v49 }
 0x667   : > { %v2760_v41 = vld [vmem:[#allocation26 + $0x320] sm:$0xff]  ;;  %3245 = vmatpush.msra.mxu2 %v2824_v48 }
 0x668   : > { %v2888_v11 = vld [vmem:[#allocation26 + $0x720] sm:$0xff]  ;;  %3225 = vmatpush.msra.mxu1 %v2760_v41 }
 0x669   : > { %v2692_v63 = vld [vmem:[#allocation26 + $0x100] sm:$0xff]  ;;  %3265 = vmatpush.msra.mxu3 %v2888_v11 }
 0x66a   : > { %v2820_v18 = vld [vmem:[#allocation26 + $0x500] sm:$0xff]  ;;  %3206 = vmatpush.msra.mxu0 %v2692_v63 }
 0x66b   : > { %v2756_v7 = vld [vmem:[#allocation26 + $0x300] sm:$0xff]  ;;  %3246 = vmatpush.msra.mxu2 %v2820_v18 }
 0x66c   : > { %v2884_v33 = vld [vmem:[#allocation26 + $0x700] sm:$0xff]  ;;  %3226 = vmatpush.msra.mxu1 %v2756_v7 }
 0x66d   : > { %v2688_v5 = vld [vmem:[#allocation26 + $0xe0] sm:$0xff]  ;;  %3266 = vmatpush.msra.mxu3 %v2884_v33 }
 0x66e   : > { %v2816_v10 = vld [vmem:[#allocation26 + $0x4e0] sm:$0xff]  ;;  %3207 = vmatpush.msra.mxu0 %v2688_v5 }
 0x66f   : > { %v2752_v42 = vld [vmem:[#allocation26 + $0x2e0] sm:$0xff]  ;;  %3247 = vmatpush.msra.mxu2 %v2816_v10 }
 0x670   : > { %v2880_v53 = vld [vmem:[#allocation26 + $0x6e0] sm:$0xff]  ;;  %3227 = vmatpush.msra.mxu1 %v2752_v42 }
 0x671   : > { %v2684_v36 = vld [vmem:[#allocation26 + $0xc0] sm:$0xff]  ;;  %3267 = vmatpush.msra.mxu3 %v2880_v53 }
 0x672   : > { %v2812_v1 = vld [vmem:[#allocation26 + $0x4c0] sm:$0xff]  ;;  %3208 = vmatpush.msra.mxu0 %v2684_v36 }
 0x673   : > { %v2748_v12 = vld [vmem:[#allocation26 + $0x2c0] sm:$0xff]  ;;  %3248 = vmatpush.msra.mxu2 %v2812_v1 }
 0x674   : > { %v2876_v29 = vld [vmem:[#allocation26 + $0x6c0] sm:$0xff]  ;;  %3228 = vmatpush.msra.mxu1 %v2748_v12 }
 0x675   : > { %v2680_v28 = vld [vmem:[#allocation26 + $0xa0] sm:$0xff]  ;;  %3268 = vmatpush.msra.mxu3 %v2876_v29 }
 0x676   : > { %v2808_v54 = vld [vmem:[#allocation26 + $0x4a0] sm:$0xff]  ;;  %3209 = vmatpush.msra.mxu0 %v2680_v28 }
 0x677   : > { %v2744_v55 = vld [vmem:[#allocation26 + $0x2a0] sm:$0xff]  ;;  %3249 = vmatpush.msra.mxu2 %v2808_v54 }
 0x678   : > { %v2872_v57 = vld [vmem:[#allocation26 + $0x6a0] sm:$0xff]  ;;  %3229 = vmatpush.msra.mxu1 %v2744_v55 }
 0x679   : > { %v2676_v47 = vld [vmem:[#allocation26 + $0x80] sm:$0xff]  ;;  %3269 = vmatpush.msra.mxu3 %v2872_v57 }
 0x67a   : > { %v2804_v8 = vld [vmem:[#allocation26 + $0x480] sm:$0xff]  ;;  %3210 = vmatpush.msra.mxu0 %v2676_v47 }
 0x67b   : > { %v2740_v43 = vld [vmem:[#allocation26 + $0x280] sm:$0xff]  ;;  %3250 = vmatpush.msra.mxu2 %v2804_v8 }
 0x67c   : > { %v2868_v30 = vld [vmem:[#allocation26 + $0x680] sm:$0xff]  ;;  %3230 = vmatpush.msra.mxu1 %v2740_v43 }
 0x67d   : > { %v2672_v45 = vld [vmem:[#allocation26 + $0x60] sm:$0xff]  ;;  %3270 = vmatpush.msra.mxu3 %v2868_v30 }
 0x67e   : > { %v2800_v39 = vld [vmem:[#allocation26 + $0x460] sm:$0xff]  ;;  %3211 = vmatpush.msra.mxu0 %v2672_v45 }
 0x67f   : > { %v2736_v3 = vld [vmem:[#allocation26 + $0x260] sm:$0xff]  ;;  %3251 = vmatpush.msra.mxu2 %v2800_v39 }
 0x680   : > { %v2864_v6 = vld [vmem:[#allocation26 + $0x660] sm:$0xff]  ;;  %3231 = vmatpush.msra.mxu1 %v2736_v3 }
 0x681   : > { %v2668_v16 = vld [vmem:[#allocation26 + $0x40] sm:$0xff]  ;;  %3271 = vmatpush.msra.mxu3 %v2864_v6 }
 0x682   : > { %v2796_v17 = vld [vmem:[#allocation26 + $0x440] sm:$0xff]  ;;  %3212 = vmatpush.msra.mxu0 %v2668_v16 }
 0x683   : > { %v2732_v44 = vld [vmem:[#allocation26 + $0x240] sm:$0xff]  ;;  %3252 = vmatpush.msra.mxu2 %v2796_v17 }
 0x684   : > { %v2860_v4 = vld [vmem:[#allocation26 + $0x640] sm:$0xff]  ;;  %3232 = vmatpush.msra.mxu1 %v2732_v44 }
 0x685   : > { %v2664_v52 = vld [vmem:[#allocation26 + $0x20] sm:$0xff]  ;;  %3272 = vmatpush.msra.mxu3 %v2860_v4 }
 0x686   : > { %v2792_v31 = vld [vmem:[#allocation26 + $0x420] sm:$0xff]  ;;  %3213 = vmatpush.msra.mxu0 %v2664_v52 }
 0x687   : > { %v2728_v37 = vld [vmem:[#allocation26 + $0x220] sm:$0xff]  ;;  %3253 = vmatpush.msra.mxu2 %v2792_v31 }
 0x688   : > { %v2856_v38 = vld [vmem:[#allocation26 + $0x620] sm:$0xff]  ;;  %3233 = vmatpush.msra.mxu1 %v2728_v37 }
 0x689   : > { %v2660_v56 = vld [vmem:[#allocation26] sm:$0xff]  ;;  %3273 = vmatpush.msra.mxu3 %v2856_v38 }
 0x68a   : > { %v2788_v46 = vld [vmem:[#allocation26 + $0x400] sm:$0xff]  ;;  %3214 = vmatpush.msra.mxu0 %v2660_v56 }
 0x68b   : > { %v2976_v21 = vld [vmem:[#allocation26 + $0x9e0] sm:$0xff]  ;;  %3254 = vmatpush.msra.mxu2 %v2788_v46 }
 0x68c   : > { %v3104_v13 = vld [vmem:[#allocation26 + $0xde0] sm:$0xff]  ;;  %3279 = vmatpush.msrb.mxu0 %v2976_v21 }
 0x68d   : > { %v2724_v58 = vld [vmem:[#allocation26 + $0x200] sm:$0xff]  ;;  %3319 = vmatpush.msrb.mxu2 %v3104_v13 }
 0x68e   : > { %v2852_v9 = vld [vmem:[#allocation26 + $0x600] sm:$0xff]  ;;  %3234 = vmatpush.msra.mxu1 %v2724_v58 }
 0x68f   : > { %v2972_v60 = vld [vmem:[#allocation26 + $0x9c0] sm:$0xff]  ;;  %3274 = vmatpush.msra.mxu3 %v2852_v9 }
 0x690   : > { %v3040_v40 = vld [vmem:[#allocation26 + $0xbe0] sm:$0xff]  ;;  %3280 = vmatpush.msrb.mxu0 %v2972_v60 }
 0x691   : > { %v3100_v59 = vld [vmem:[#allocation26 + $0xdc0] sm:$0xff]  ;;  %3299 = vmatpush.msrb.mxu1 %v3040_v40 }
 0x692   : > { %v3168_v61 = vld [vmem:[#allocation26 + $0xfe0] sm:$0xff]  ;;  %3320 = vmatpush.msrb.mxu2 %v3100_v59 }
 0x693   : > { %v2968_v62 = vld [vmem:[#allocation26 + $0x9a0] sm:$0xff]  ;;  %3339 = vmatpush.msrb.mxu3 %v3168_v61 }
 0x694   : > { %v3036_v24 = vld [vmem:[#allocation26 + $0xbc0] sm:$0xff]  ;;  %3281 = vmatpush.msrb.mxu0 %v2968_v62 }
 0x695   : > { %v3096_v0 = vld [vmem:[#allocation26 + $0xda0] sm:$0xff]  ;;  %3300 = vmatpush.msrb.mxu1 %v3036_v24  ;;  %v2569_v24 = vld [vmem:[#allocation23] sm:$0xff] }
 0x696   : > { %v3164_v19 = vld [vmem:[#allocation26 + $0xfc0] sm:$0xff]  ;;  %3321 = vmatpush.msrb.mxu2 %v3096_v0 }
 0x697   : > { %v2964_v34 = vld [vmem:[#allocation26 + $0x980] sm:$0xff]  ;;  %3340 = vmatpush.msrb.mxu3 %v3164_v19 }
 0x698   : > { %v3032_v35 = vld [vmem:[#allocation26 + $0xba0] sm:$0xff]  ;;  %3282 = vmatpush.msrb.mxu0 %v2964_v34 }
 0x699   : > { %v3092_v25 = vld [vmem:[#allocation26 + $0xd80] sm:$0xff]  ;;  %3301 = vmatpush.msrb.mxu1 %v3032_v35 }
 0x69a   : > { %v3160_v2 = vld [vmem:[#allocation26 + $0xfa0] sm:$0xff]  ;;  %3322 = vmatpush.msrb.mxu2 %v3092_v25 }
 0x69b   : > { %v2563_v32 = vld [vmem:[#allocation6] sm:$0xff]  ;;  %3341 = vmatpush.msrb.mxu3 %v3160_v2 }
 0x69c   : > { %v2960_v26 = vld [vmem:[#allocation26 + $0x960] sm:$0xff]  ;;  %v6522_v51 = vmul.f32 0.003125, %v2563_v32 }
 0x69d   : > { %v3028_v50 = vld [vmem:[#allocation26 + $0xb80] sm:$0xff]  ;;  %3283 = vmatpush.msrb.mxu0 %v2960_v26  ;;  %v2582_v26 = vld [vmem:[#allocation25] sm:$0xff] }
 0x69e   : > { %v3088_v22 = vld [vmem:[#allocation26 + $0xd60] sm:$0xff]  ;;  %v2567_v49 = vmul.f32 %v6522_v51, %v6522_v51  ;;  %3302 = vmatpush.msrb.mxu1 %v3028_v50 }
 0x69f   : > { %v3156_v20 = vld [vmem:[#allocation26 + $0xf80] sm:$0xff]  ;;  %3323 = vmatpush.msrb.mxu2 %v3088_v22 }
 0x6a0   : > { %v2956_v27 = vld [vmem:[#allocation26 + $0x940] sm:$0xff]  ;;  %3342 = vmatpush.msrb.mxu3 %v3156_v20  ;;  %v2568_v18 = vsub.f32 %v2566_v14, %v2567_v49 }
 0x6a1   : > { %v3024_v15 = vld [vmem:[#allocation26 + $0xb60] sm:$0xff]  ;;  %3284 = vmatpush.msrb.mxu0 %v2956_v27 }
 0x6a2   : > { %v3084_v48 = vld [vmem:[#allocation26 + $0xd40] sm:$0xff]  ;;  %3303 = vmatpush.msrb.mxu1 %v3024_v15  ;;  %v2570_v42 = vadd.f32 1e-05, %v2568_v18 }
 0x6a3   : > { %v3152_v41 = vld [vmem:[#allocation26 + $0xf60] sm:$0xff]  ;;  %3324 = vmatpush.msrb.mxu2 %v3084_v48 }
 0x6a4   : > { %v2952_v11 = vld [vmem:[#allocation26 + $0x920] sm:$0xff]  ;;  %3343 = vmatpush.msrb.mxu3 %v3152_v41  ;;  %5047 = vrsqrt.f32 %v2570_v42  ;;  %vm2577_vm12 = vweird.f32 %v2570_v42 }
 0x6a5   : > { %v3020_v63 = vld [vmem:[#allocation26 + $0xb40] sm:$0xff]  ;;  %3285 = vmatpush.msrb.mxu0 %v2952_v11 }
 0x6a6   : > { %v3080_v7 = vld [vmem:[#allocation26 + $0xd20] sm:$0xff]  ;;  %3304 = vmatpush.msrb.mxu1 %v3020_v63  ;;  %v2641_v63 = vld [vmem:[#allocation11 + $0x18] sm:$0xff] }
 0x6a7   : > { %v3148_v33 = vld [vmem:[#allocation26 + $0xf40] sm:$0xff]  ;;  %3325 = vmatpush.msrb.mxu2 %v3080_v7  ;;  %v2585_v7 = vld [vmem:[#allocation10 + $0x10] sm:$0xff] }
 0x6a8   : > { %v2948_v5 = vld [vmem:[#allocation26 + $0x900] sm:$0xff]  ;;  %3344 = vmatpush.msrb.mxu3 %v3148_v33 }
 0x6a9   : > { %v3016_v10 = vld [vmem:[#allocation26 + $0xb20] sm:$0xff]  ;;  %3286 = vmatpush.msrb.mxu0 %v2948_v5 }
 0x6aa   : > { %v3076_v53 = vld [vmem:[#allocation26 + $0xd00] sm:$0xff]  ;;  %3305 = vmatpush.msrb.mxu1 %v3016_v10  ;;  %v5048_v39 = vpop.eup %5047 }
 0x6ab   : > { %v3144_v36 = vld [vmem:[#allocation26 + $0xf20] sm:$0xff]  ;;  %3326 = vmatpush.msrb.mxu2 %v3076_v53  ;;  %v2572_v44 = vmul.f32 %v5048_v39, %v2570_v42  ;;  %vm2578_vm13 = vweird.f32 %v5048_v39 }
 0x6ac   : > { %v2944_v1 = vld [vmem:[#allocation26 + $0x8e0] sm:$0xff]  ;;  %3345 = vmatpush.msrb.mxu3 %v3144_v36  ;;  %vm6526_vm14 = vmor %vm2577_vm12, %vm2578_vm13  ;;  %vm3969_vm12 = vcmask 1042434  }
 0x6ad   : > { %v3012_v12 = vld [vmem:[#allocation26 + $0xb00] sm:$0xff]  ;;  %3287 = vmatpush.msrb.mxu0 %v2944_v1  ;;  %v2573_v4 = vmul.f32 %v5048_v39, %v2572_v44 }
 0x6ae   : > { %v3072_v29 = vld [vmem:[#allocation26 + $0xce0] sm:$0xff]  ;;  %3306 = vmatpush.msrb.mxu1 %v3012_v12 }
 0x6af   : > { %v3140_v28 = vld [vmem:[#allocation26 + $0xf00] sm:$0xff]  ;;  %3327 = vmatpush.msrb.mxu2 %v3072_v29  ;;  %v2574_v31 = vmul.f32 0.5, %v2573_v4  ;;  %v2588_v29 = vld [vmem:[#allocation10 + $0x8] sm:$0xff]  ;;  %v2587_v4 = vld [vmem:[#allocation10 + $0x18] sm:$0xff] }
 0x6b0   : > { %v2940_v54 = vld [vmem:[#allocation26 + $0x8c0] sm:$0xff]  ;;  %3346 = vmatpush.msrb.mxu3 %v3140_v28 }
 0x6b1   : > { %v3008_v55 = vld [vmem:[#allocation26 + $0xae0] sm:$0xff]  ;;  %3288 = vmatpush.msrb.mxu0 %v2940_v54  ;;  %v2575_v58 = vsub.f32 1.5, %v2574_v31 }
 0x6b2   : > { %v3068_v57 = vld [vmem:[#allocation26 + $0xcc0] sm:$0xff]  ;;  %3307 = vmatpush.msrb.mxu1 %v3008_v55 }
 0x6b3   : > { %v3136_v47 = vld [vmem:[#allocation26 + $0xee0] sm:$0xff]  ;;  %3328 = vmatpush.msrb.mxu2 %v3068_v57  ;;  %v2576_v0 = vmul.f32 %v5048_v39, %v2575_v58 }
 0x6b4   : > { %v2936_v8 = vld [vmem:[#allocation26 + $0x8a0] sm:$0xff]  ;;  %3347 = vmatpush.msrb.mxu3 %v3136_v47  ;;  %v2643_v47 = vld [vmem:[#allocation11 + $0x10] sm:$0xff] }
 0x6b5   : > { %v3004_v43 = vld [vmem:[#allocation26 + $0xac0] sm:$0xff]  ;;  %3289 = vmatpush.msrb.mxu0 %v2936_v8  ;;  %v2580_v2 = vsel %vm6526_vm14, %v5048_v39, %v2576_v0  ;;  %vm3971_vm14 = vcmask 1041408  }
 0x6b6   : > { %v3064_v30 = vld [vmem:[#allocation26 + $0xca0] sm:$0xff]  ;;  %3308 = vmatpush.msrb.mxu1 %v3004_v43  ;;  %v2581_v32 = vmul.f32 %v2580_v2, %v2569_v24 }
 0x6b7   : > { %v3132_v45 = vld [vmem:[#allocation26 + $0xec0] sm:$0xff]  ;;  %3329 = vmatpush.msrb.mxu2 %v3064_v30 }
 0x6b8   : > { %v2932_v3 = vld [vmem:[#allocation26 + $0x880] sm:$0xff]  ;;  %3348 = vmatpush.msrb.mxu3 %v3132_v45  ;;  %v2583_v22 = vmul.f32 %v2581_v32, %v6522_v51  ;;  %v2592_v20 = vperm.slane %v2581_v32, 2  ;;  %v2593_v14 = vperm.slane %v2581_v32, 3  ;;  %v2590_v27 = vperm.slane %v2581_v32, 0 }
 0x6b9   : > { %v3000_v6 = vld [vmem:[#allocation26 + $0xaa0] sm:$0xff]  ;;  %3290 = vmatpush.msrb.mxu0 %v2932_v3  ;;  %v2591_v15 = vperm.slane %v2581_v32, 1  ;;  %v2597_v49 = vperm.slane %v2581_v32, 7  ;;  %v2596_v18 = vperm.slane %v2581_v32, 6  ;;  %v2594_v42 = vperm.slane %v2581_v32, 4 }
 0x6ba   : > { %v3060_v16 = vld [vmem:[#allocation26 + $0xc80] sm:$0xff]  ;;  %3309 = vmatpush.msrb.mxu1 %v3000_v6  ;;  %v2584_v48 = vsub.f32 %v2582_v26, %v2583_v22  ;;  %v2599_v11 = vrot.slane %v2593_v14, 4  ;;  %v2595_v53 = vperm.slane %v2581_v32, 5  ;;  %v2721_v14 = vld [vmem:[#allocation26 + $0x1e8] sm:$0xff] }
 0x6bb   : > { %v3128_v17 = vld [vmem:[#allocation26 + $0xea0] sm:$0xff]  ;;  %3330 = vmatpush.msrb.mxu2 %v3060_v16  ;;  %v2598_v33 = vrot.slane %v2591_v15, 4  ;;  %v2601_v10 = vrot.slane %v2597_v49, 4  ;;  %v2785_v15 = vld [vmem:[#allocation26 + $0x3e8] sm:$0xff] }
 0x6bc   : > { %3349 = vmatpush.msrb.mxu3 %v3128_v17  ;;  %v2928_v37 = vld [vmem:[#allocation26 + $0x860] sm:$0xff]  ;;  %v2604_v51 = vsel %vm2602_vm15, %v2592_v20, %v2599_v11  ;;  %v2618_v36 = vperm.slane %v2584_v48, 2  ;;  %v2619_v1 = vperm.slane %v2584_v48, 3  ;;  %v2616_v12 = vperm.slane %v2584_v48, 0  ;;  %v2913_v49 = vld [vmem:[#allocation26 + $0x7e8] sm:$0xff] }
 0x6bd   : > { %v2996_v38 = vld [vmem:[#allocation26 + $0xa80] sm:$0xff]  ;;  %3291 = vmatpush.msrb.mxu0 %v2928_v37  ;;  %v2645_v54 = vmul.f32 %v2641_v63, %v2604_v51  ;;  %v2603_v55 = vsel %vm2602_vm15, %v2590_v27, %v2598_v33  ;;  %v2617_v57 = vperm.slane %v2584_v48, 1  ;;  %v2606_v45 = vsel %vm2602_vm15, %v2596_v18, %v2601_v10  ;;  %v2642_v37 = vld [vmem:[#allocation11 + $0x8] sm:$0xff] }
 0x6be   : > { %v3056_v56 = vld [vmem:[#allocation26 + $0xc60] sm:$0xff]  ;;  %3310 = vmatpush.msrb.mxu1 %v2996_v38  ;;  %v2625_v8 = vrot.slane %v2619_v1, 4  ;;  %v2611_v43 = vmul.f32 %v2603_v55, %v2585_v7  ;;  %v2614_v3 = vmul.f32 %v2606_v45, %v2588_v29  ;;  %v2622_v6 = vperm.slane %v2584_v48, 6  ;;  %v2849_v27 = vld [vmem:[#allocation26 + $0x5e8] sm:$0xff] }
 0x6bf   : > { %v3124_v46 = vld [vmem:[#allocation26 + $0xe80] sm:$0xff]  ;;  %3331 = vmatpush.msrb.mxu2 %v3056_v56  ;;  %v2624_v39 = vrot.slane %v2617_v57, 4  ;;  %v2623_v16 = vperm.slane %v2584_v48, 7  ;;  %v2647_v44 = vmul.f32 %v2643_v47, %v2606_v45  ;;  %v2600_v52 = vrot.slane %v2595_v53, 4  ;;  %v2717_v18 = vld [vmem:[#allocation26 + $0x1c8] sm:$0xff] }
 0x6c0   : > { %v2924_v21 = vld [vmem:[#allocation26 + $0x840] sm:$0xff]  ;;  %3350 = vmatpush.msrb.mxu3 %v3124_v46  ;;  %v2629_v17 = vsel %vm2602_vm15, %v2618_v36, %v2625_v8  ;;  %v2620_v31 = vperm.slane %v2584_v48, 4  ;;  %v2845_v7 = vld [vmem:[#allocation26 + $0x5c8] sm:$0xff] }
 0x6c1   : > { %v2992_v13 = vld [vmem:[#allocation26 + $0xa60] sm:$0xff]  ;;  %3292 = vmatpush.msrb.mxu0 %v2924_v21  ;;  %v2649_v56 = vadd.f32 %v2645_v54, %v2629_v17  ;;  %v2628_v46 = vsel %vm2602_vm15, %v2616_v12, %v2624_v39  ;;  %v2627_v21 = vrot.slane %v2623_v16, 4  ;;  %v2781_v33 = vld [vmem:[#allocation26 + $0x3c8] sm:$0xff] }
 0x6c2   : > { %v3052_v9 = vld [vmem:[#allocation26 + $0xc40] sm:$0xff]  ;;  %3311 = vmatpush.msrb.mxu1 %v2992_v13  ;;  %v2636_v13 = vadd.f32 %v2628_v46, %v2611_v43  ;;  %v2713_v10 = vld [vmem:[#allocation26 + $0x1a8] sm:$0xff] }
 0x6c3   : > { %v3120_v60 = vld [vmem:[#allocation26 + $0xe60] sm:$0xff]  ;;  %3332 = vmatpush.msrb.mxu2 %v3052_v9  ;;  %v2605_v9 = vsel %vm2602_vm15, %v2594_v42, %v2600_v52  ;;  %v2841_v42 = vld [vmem:[#allocation26 + $0x5a8] sm:$0xff] }
 0x6c4   : > { %v2920_v40 = vld [vmem:[#allocation26 + $0x820] sm:$0xff]  ;;  %3351 = vmatpush.msrb.mxu3 %v3120_v60  ;;  %v2621_v60 = vperm.slane %v2584_v48, 5  ;;  %v2777_v53 = vld [vmem:[#allocation26 + $0x3a8] sm:$0xff] }
 0x6c5   : > { %v2988_v59 = vld [vmem:[#allocation26 + $0xa40] sm:$0xff]  ;;  %3293 = vmatpush.msrb.mxu0 %v2920_v40  ;;  %v2837_v54 = vld [vmem:[#allocation26 + $0x588] sm:$0xff] }
 0x6c6   : > { %v3048_v61 = vld [vmem:[#allocation26 + $0xc20] sm:$0xff]  ;;  %3312 = vmatpush.msrb.mxu1 %v2988_v59  ;;  %v2631_v59 = vsel %vm2602_vm15, %v2622_v6, %v2627_v21  ;;  %v2901_v57 = vld [vmem:[#allocation26 + $0x788] sm:$0xff] }
 0x6c7   : > { %v3116_v62 = vld [vmem:[#allocation26 + $0xe40] sm:$0xff]  ;;  %3333 = vmatpush.msrb.mxu2 %v3048_v61  ;;  %v2613_v61 = vmul.f32 %v2605_v9, %v2587_v4  ;;  %v2639_v0 = vadd.f32 %v2631_v59, %v2614_v3  ;;  %v2705_v47 = vld [vmem:[#allocation26 + $0x168] sm:$0xff] }
 0x6c8   : > { %v2916_v19 = vld [vmem:[#allocation26 + $0x800] sm:$0xff]  ;;  %3352 = vmatpush.msrb.mxu3 %v3116_v62  ;;  %v2646_v62 = vmul.f32 %v2642_v37, %v2605_v9  ;;  %v2833_v8 = vld [vmem:[#allocation26 + $0x568] sm:$0xff] }
 0x6c9   : > { %v2984_v34 = vld [vmem:[#allocation26 + $0xa20] sm:$0xff]  ;;  %3294 = vmatpush.msrb.mxu0 %v2916_v19  ;;  %v2651_v19 = vadd.f32 %v2647_v44, %v2631_v59  ;;  %v2769_v43 = vld [vmem:[#allocation26 + $0x368] sm:$0xff] }
 0x6ca   : > { %v3044_v35 = vld [vmem:[#allocation26 + $0xc00] sm:$0xff]  ;;  %3313 = vmatpush.msrb.mxu1 %v2984_v34  ;;  %v2626_v34 = vrot.slane %v2621_v60, 4  ;;  %v2701_v45 = vld [vmem:[#allocation26 + $0x148] sm:$0xff] }
 0x6cb   : > { %v3112_v25 = vld [vmem:[#allocation26 + $0xe20] sm:$0xff]  ;;  %3334 = vmatpush.msrb.mxu2 %v3044_v35  ;;  %v2655_v2 = vmax.f32 %v2639_v0, %v2651_v19  ;;  %v2829_v39 = vld [vmem:[#allocation26 + $0x548] sm:$0xff] }
 0x6cc   : > { %3353 = vmatpush.msrb.mxu3 %v3112_v25  ;;  %v2980_v50 = vld [vmem:[#allocation26 + $0xa00] sm:$0xff]  ;;  %v2630_v32 = vsel %vm2602_vm15, %v2620_v31, %v2626_v34  ;;  %v2765_v3 = vld [vmem:[#allocation26 + $0x348] sm:$0xff] }
 0x6cd   : > { %v3108_v23 = vld [vmem:[#allocation26 + $0xe00] sm:$0xff]  ;;  %3314 = vmatpush.msrb.mxu1 %v2980_v50  ;;  %v2638_v26 = vadd.f32 %v2630_v32, %v2613_v61  ;;  %v2650_v50 = vadd.f32 %v2646_v62, %v2630_v32  ;;  %v2893_v6 = vld [vmem:[#allocation26 + $0x748] sm:$0xff] }
 0x6ce   : > { %3354 = vmatpush.msrb.mxu3 %v3108_v23  ;;  %v2586_v41 = vld [vmem:[#allocation10] sm:$0xff]  ;;  %v2659_v23 = vmax.f32 %v2655_v2, 0.0  ;;  %v2697_v16 = vld [vmem:[#allocation26 + $0x128] sm:$0xff] }
 0x6cf   : > { %v2640_v5 = vld [vmem:[#allocation11] sm:$0xff]  ;;  %v2612_v28 = vmul.f32 %v2604_v51, %v2586_v41  ;;  %v2654_v22 = vmax.f32 %v2638_v26, %v2650_v50  ;;  %v2905_v51 = vld [vmem:[#allocation26 + $0x7a8] sm:$0xff] }
 0x6d0   : > { %v2644_v30 = vmul.f32 %v2640_v5, %v2603_v55  ;;  %3182 = vst [vmem:[#allocation1 + $0x30] ss:$2 sm:$0xff] %v2659_v23  ;;  %v2909_v5 = vld [vmem:[#allocation26 + $0x7c8] sm:$0xff] }
 0x6d1   : > { %v2637_v38 = vadd.f32 %v2629_v17, %v2612_v28  ;;  %v2658_v20 = vmax.f32 %v2654_v22, 0.0  ;;  %v2709_v28 = vld [vmem:[#allocation26 + $0x188] sm:$0xff] }
 0x6d2   : > { %v2648_v58 = vadd.f32 %v2644_v30, %v2628_v46  ;;  %v2773_v55 = vld [vmem:[#allocation26 + $0x388] sm:$0xff] }
 0x6d3   : > { %v2653_v40 = vmax.f32 %v2637_v38, %v2649_v56  ;;  %3180 = vst [vmem:[#allocation1 + $0x20] ss:$2 sm:$0xff] %v2658_v20  ;;  %v2897_v30 = vld [vmem:[#allocation26 + $0x768] sm:$0xff] }
 0x6d4   : > { %v2652_v24 = vmax.f32 %v2636_v13, %v2648_v58  ;;  %v2825_v17 = vld [vmem:[#allocation26 + $0x528] sm:$0xff] }
 0x6d5   : > { %v2657_v35 = vmax.f32 %v2653_v40, 0.0  ;;  %v2761_v44 = vld [vmem:[#allocation26 + $0x328] sm:$0xff] }
 0x6d6   : > { %v2656_v25 = vmax.f32 %v2652_v24, 0.0  ;;  %v2889_v4 = vld [vmem:[#allocation26 + $0x728] sm:$0xff] }
 0x6d7   : > { %3178 = vst [vmem:[#allocation1 + $0x10] ss:$2 sm:$0xff] %v2657_v35  ;;  %v6553_v36 = vld.sshfl [vmem:[#allocation1 + $0x30] sm:$0xff pattern:$0x75316420] }
 0x6d8   : > { %3176 = vst [vmem:[#allocation1] ss:$2 sm:$0xff] %v2656_v25  ;;  %v6555_v1 = vld.sshfl [vmem:[#allocation1 + $0x38] sm:$0xff pattern:$0x75316420] }
 0x6d9   : > { %v2693_v52 = vld [vmem:[#allocation26 + $0x108] sm:$0xff] }
 0x6da   : > { %v6557_v12 = vld.sshfl [vmem:[#allocation1 + $0x20] sm:$0xff pattern:$0x75316420]  ;;  %v6559_v29 = vld.sshfl [vmem:[#allocation1 + $0x28] sm:$0xff pattern:$0x75316420] }
 0x6db   : > { %v2821_v31 = vld [vmem:[#allocation26 + $0x508] sm:$0xff] }
 0x6dc   : > { %v2757_v37 = vld [vmem:[#allocation26 + $0x308] sm:$0xff] }
 0x6dd   : > { %v2885_v38 = vld [vmem:[#allocation26 + $0x708] sm:$0xff] }
 0x6de   : > { %v6541_v48 = vld.sshfl [vmem:[#allocation1 + $0x10] sm:$0xff pattern:$0x75316420]  ;;  %v6543_v41 = vld.sshfl [vmem:[#allocation1 + $0x18] sm:$0xff pattern:$0x75316420] }
 0x6df   : > { %3255 = vmatmul.f32.vlgmr.msra.gmra.mxu2 %v6541_v48  ;;  %v6546_v11 = vld.sshfl [vmem:[#allocation1] sm:$0xff pattern:$0x75316420]  ;;  %3275 = vmatmul.f32.vlgmr.msra.gmra.mxu3 %v6543_v41  ;;  %v6549_v63 = vld.sshfl [vmem:[#allocation1 + $0x8] sm:$0xff pattern:$0x75316420] }
 0x6e0   : > { %3215 = vmatmul.f32.vlgmr.msra.gmra.mxu0 %v6546_v11  ;;  %3235 = vmatmul.f32.vlgmr.msra.gmra.mxu1 %v6549_v63  ;;  %v2689_v56 = vld [vmem:[#allocation26 + $0xe8] sm:$0xff] }
 0x6e1   : > { %3359 = vmatpush.msra.mxu0 %v2721_v14  ;;  %3399 = vmatpush.msra.mxu2 %v2849_v27  ;;  %v2817_v46 = vld [vmem:[#allocation26 + $0x4e8] sm:$0xff] }
 0x6e2   : > { %3379 = vmatpush.msra.mxu1 %v2785_v15  ;;  %3419 = vmatpush.msra.mxu3 %v2913_v49  ;;  %v2753_v21 = vld [vmem:[#allocation26 + $0x2e8] sm:$0xff] }
 0x6e3   : > { %3360 = vmatpush.msra.mxu0 %v2717_v18  ;;  %3400 = vmatpush.msra.mxu2 %v2845_v7  ;;  %v2881_v13 = vld [vmem:[#allocation26 + $0x6e8] sm:$0xff] }
 0x6e4   : > { %3380 = vmatpush.msra.mxu1 %v2781_v33  ;;  %3420 = vmatpush.msra.mxu3 %v2909_v5  ;;  %v2685_v58 = vld [vmem:[#allocation26 + $0xc8] sm:$0xff] }
 0x6e5   : > { %3361 = vmatpush.msra.mxu0 %v2713_v10  ;;  %3401 = vmatpush.msra.mxu2 %v2841_v42  ;;  %v2813_v9 = vld [vmem:[#allocation26 + $0x4c8] sm:$0xff] }
 0x6e6   : > { %3381 = vmatpush.msra.mxu1 %v2777_v53  ;;  %3421 = vmatpush.msra.mxu3 %v2905_v51  ;;  %v2749_v60 = vld [vmem:[#allocation26 + $0x2c8] sm:$0xff] }
 0x6e7   : > { %3335 = vmatmul.f32.vlgmr.msrb.gmra.mxu2 %v6553_v36  ;;  %3355 = vmatmul.f32.vlgmr.msrb.gmra.mxu3 %v6555_v1  ;;  %v2877_v40 = vld [vmem:[#allocation26 + $0x6c8] sm:$0xff] }
 0x6e8   : > { %3295 = vmatmul.f32.vlgmr.msrb.gmra.mxu0 %v6557_v12  ;;  %3315 = vmatmul.f32.vlgmr.msrb.gmra.mxu1 %v6559_v29  ;;  %v2681_v59 = vld [vmem:[#allocation26 + $0xa8] sm:$0xff] }
 0x6e9   : > { %3362 = vmatpush.msra.mxu0 %v2709_v28  ;;  %3402 = vmatpush.msra.mxu2 %v2837_v54  ;;  %v2809_v61 = vld [vmem:[#allocation26 + $0x4a8] sm:$0xff] }
 0x6ea   : > { %3382 = vmatpush.msra.mxu1 %v2773_v55  ;;  %3422 = vmatpush.msra.mxu3 %v2901_v57  ;;  %v2745_v62 = vld [vmem:[#allocation26 + $0x2a8] sm:$0xff] }
 0x6eb   : > { %3363 = vmatpush.msra.mxu0 %v2705_v47  ;;  %3403 = vmatpush.msra.mxu2 %v2833_v8  ;;  %v2873_v24 = vld [vmem:[#allocation26 + $0x6a8] sm:$0xff] }
 0x6ec   : > { %3383 = vmatpush.msra.mxu1 %v2769_v43  ;;  %3423 = vmatpush.msra.mxu3 %v2897_v30  ;;  %v2677_v0 = vld [vmem:[#allocation26 + $0x88] sm:$0xff] }
 0x6ed   : > { %3364 = vmatpush.msra.mxu0 %v2701_v45  ;;  %3404 = vmatpush.msra.mxu2 %v2829_v39  ;;  %v2805_v19 = vld [vmem:[#allocation26 + $0x488] sm:$0xff] }
 0x6ee   : > { %3384 = vmatpush.msra.mxu1 %v2765_v3  ;;  %3424 = vmatpush.msra.mxu3 %v2893_v6  ;;  %v2741_v34 = vld [vmem:[#allocation26 + $0x288] sm:$0xff] }
 0x6ef   : > { %3365 = vmatpush.msra.mxu0 %v2697_v16  ;;  %3405 = vmatpush.msra.mxu2 %v2825_v17  ;;  %v2869_v35 = vld [vmem:[#allocation26 + $0x688] sm:$0xff] }
 0x6f0   : > { %3385 = vmatpush.msra.mxu1 %v2761_v44  ;;  %3425 = vmatpush.msra.mxu3 %v2889_v4  ;;  %v2673_v25 = vld [vmem:[#allocation26 + $0x68] sm:$0xff] }
 0x6f1   : > { %3366 = vmatpush.msra.mxu0 %v2693_v52  ;;  %3406 = vmatpush.msra.mxu2 %v2821_v31  ;;  %v2801_v2 = vld [vmem:[#allocation26 + $0x468] sm:$0xff] }
 0x6f2   : > { %3386 = vmatpush.msra.mxu1 %v2757_v37  ;;  %3426 = vmatpush.msra.mxu3 %v2885_v38  ;;  %v2737_v32 = vld [vmem:[#allocation26 + $0x268] sm:$0xff] }
 0x6f3   : > { %3367 = vmatpush.msra.mxu0 %v2689_v56  ;;  %3407 = vmatpush.msra.mxu2 %v2817_v46  ;;  %v2865_v26 = vld [vmem:[#allocation26 + $0x668] sm:$0xff] }
 0x6f4   : > { %3387 = vmatpush.msra.mxu1 %v2753_v21  ;;  %3427 = vmatpush.msra.mxu3 %v2881_v13  ;;  %v2669_v50 = vld [vmem:[#allocation26 + $0x48] sm:$0xff] }
 0x6f5   : > { %3368 = vmatpush.msra.mxu0 %v2685_v58  ;;  %3408 = vmatpush.msra.mxu2 %v2813_v9  ;;  %v2797_v23 = vld [vmem:[#allocation26 + $0x448] sm:$0xff] }
 0x6f6   : > { %3388 = vmatpush.msra.mxu1 %v2749_v60  ;;  %3428 = vmatpush.msra.mxu3 %v2877_v40  ;;  %v2733_v22 = vld [vmem:[#allocation26 + $0x248] sm:$0xff] }
 0x6f7   : > { %3369 = vmatpush.msra.mxu0 %v2681_v59  ;;  %3409 = vmatpush.msra.mxu2 %v2809_v61  ;;  %v2861_v20 = vld [vmem:[#allocation26 + $0x648] sm:$0xff] }
 0x6f8   : > { %3389 = vmatpush.msra.mxu1 %v2745_v62  ;;  %3429 = vmatpush.msra.mxu3 %v2873_v24  ;;  %v2665_v14 = vld [vmem:[#allocation26 + $0x28] sm:$0xff] }
 0x6f9   : > { %3370 = vmatpush.msra.mxu0 %v2677_v0  ;;  %3410 = vmatpush.msra.mxu2 %v2805_v19  ;;  %v2793_v27 = vld [vmem:[#allocation26 + $0x428] sm:$0xff] }
 0x6fa   : > { %3390 = vmatpush.msra.mxu1 %v2741_v34  ;;  %3430 = vmatpush.msra.mxu3 %v2869_v35  ;;  %v2729_v15 = vld [vmem:[#allocation26 + $0x228] sm:$0xff] }
 0x6fb   : > { %3371 = vmatpush.msra.mxu0 %v2673_v25  ;;  %3411 = vmatpush.msra.mxu2 %v2801_v2  ;;  %v2857_v49 = vld [vmem:[#allocation26 + $0x628] sm:$0xff] }
 0x6fc   : > { %3391 = vmatpush.msra.mxu1 %v2737_v32  ;;  %3431 = vmatpush.msra.mxu3 %v2865_v26  ;;  %v2661_v18 = vld [vmem:[#allocation26 + $0x8] sm:$0xff] }
 0x6fd   : > { %3372 = vmatpush.msra.mxu0 %v2669_v50  ;;  %3412 = vmatpush.msra.mxu2 %v2797_v23  ;;  %v2789_v7 = vld [vmem:[#allocation26 + $0x408] sm:$0xff] }
 0x6fe   : > { %3392 = vmatpush.msra.mxu1 %v2733_v22  ;;  %3432 = vmatpush.msra.mxu3 %v2861_v20  ;;  %v2977_v33 = vld [vmem:[#allocation26 + $0x9e8] sm:$0xff] }
 0x6ff   : > { %3373 = vmatpush.msra.mxu0 %v2665_v14  ;;  %3413 = vmatpush.msra.mxu2 %v2793_v27  ;;  %v3105_v5 = vld [vmem:[#allocation26 + $0xde8] sm:$0xff] }
 0x700   : > { %3393 = vmatpush.msra.mxu1 %v2729_v15  ;;  %3433 = vmatpush.msra.mxu3 %v2857_v49  ;;  %v2725_v10 = vld [vmem:[#allocation26 + $0x208] sm:$0xff] }
 0x701   : > { %v2853_v42 = vld [vmem:[#allocation26 + $0x608] sm:$0xff]  ;;  %3374 = vmatpush.msra.mxu0 %v2661_v18  ;;  %3414 = vmatpush.msra.mxu2 %v2789_v7 }
 0x702   : > { %v2973_v53 = vld [vmem:[#allocation26 + $0x9c8] sm:$0xff]  ;;  %3394 = vmatpush.msra.mxu1 %v2725_v10  ;;  %3434 = vmatpush.msra.mxu3 %v2853_v42 }
 0x703   : > { %v3041_v51 = vld [vmem:[#allocation26 + $0xbe8] sm:$0xff]  ;;  %3439 = vmatpush.msrb.mxu0 %v2977_v33  ;;  %3479 = vmatpush.msrb.mxu2 %v3105_v5 }
 0x704   : > { %v3101_v28 = vld [vmem:[#allocation26 + $0xdc8] sm:$0xff]  ;;  %3459 = vmatpush.msrb.mxu1 %v3041_v51  ;;  %3415 = vmatmul.f32.vlgmr.msra.gmra.mxu2 %v6541_v48 }
 0x705   : > { %v3169_v54 = vld [vmem:[#allocation26 + $0xfe8] sm:$0xff]  ;;  %3440 = vmatpush.msrb.mxu0 %v2973_v53  ;;  %3480 = vmatpush.msrb.mxu2 %v3101_v28 }
 0x706   : > { %v2969_v55 = vld [vmem:[#allocation26 + $0x9a8] sm:$0xff]  ;;  %3499 = vmatpush.msrb.mxu3 %v3169_v54  ;;  %3375 = vmatmul.f32.vlgmr.msra.gmra.mxu0 %v6546_v11 }
 0x707   : > { %v3037_v57 = vld [vmem:[#allocation26 + $0xbc8] sm:$0xff]  ;;  %3441 = vmatpush.msrb.mxu0 %v2969_v55  ;;  %3435 = vmatmul.f32.vlgmr.msra.gmra.mxu3 %v6543_v41  ;;  %v2722_v55 = vld [vmem:[#allocation26 + $0x1f0] sm:$0xff] }
 0x708   : > { %v3097_v47 = vld [vmem:[#allocation26 + $0xda8] sm:$0xff]  ;;  %3460 = vmatpush.msrb.mxu1 %v3037_v57  ;;  %v2850_v57 = vld [vmem:[#allocation26 + $0x5f0] sm:$0xff] }
 0x709   : > { %v3165_v8 = vld [vmem:[#allocation26 + $0xfc8] sm:$0xff]  ;;  %3481 = vmatpush.msrb.mxu2 %v3097_v47  ;;  %3395 = vmatmul.f32.vlgmr.msra.gmra.mxu1 %v6549_v63  ;;  %v2718_v63 = vld [vmem:[#allocation26 + $0x1d0] sm:$0xff] }
 0x70a   : > { %v2965_v43 = vld [vmem:[#allocation26 + $0x988] sm:$0xff]  ;;  %3500 = vmatpush.msrb.mxu3 %v3165_v8 }
 0x70b   : > { %v3033_v30 = vld [vmem:[#allocation26 + $0xba8] sm:$0xff]  ;;  %3442 = vmatpush.msrb.mxu0 %v2965_v43  ;;  %v2786_v43 = vld [vmem:[#allocation26 + $0x3f0] sm:$0xff] }
 0x70c   : > { %v3093_v45 = vld [vmem:[#allocation26 + $0xd88] sm:$0xff]  ;;  %3461 = vmatpush.msrb.mxu1 %v3033_v30  ;;  %v2846_v30 = vld [vmem:[#allocation26 + $0x5d0] sm:$0xff] }
 0x70d   : > { %v3161_v39 = vld [vmem:[#allocation26 + $0xfa8] sm:$0xff]  ;;  %3482 = vmatpush.msrb.mxu2 %v3093_v45  ;;  %v2914_v45 = vld [vmem:[#allocation26 + $0x7f0] sm:$0xff] }
 0x70e   : > { %v2961_v3 = vld [vmem:[#allocation26 + $0x968] sm:$0xff]  ;;  %3501 = vmatpush.msrb.mxu3 %v3161_v39  ;;  %v2714_v39 = vld [vmem:[#allocation26 + $0x1b0] sm:$0xff] }
 0x70f   : > { %v3029_v6 = vld [vmem:[#allocation26 + $0xb88] sm:$0xff]  ;;  %3443 = vmatpush.msrb.mxu0 %v2961_v3  ;;  %v2782_v3 = vld [vmem:[#allocation26 + $0x3d0] sm:$0xff] }
 0x710   : > { %v3089_v16 = vld [vmem:[#allocation26 + $0xd68] sm:$0xff]  ;;  %3462 = vmatpush.msrb.mxu1 %v3029_v6  ;;  %v2842_v6 = vld [vmem:[#allocation26 + $0x5b0] sm:$0xff] }
 0x711   : > { %v3157_v17 = vld [vmem:[#allocation26 + $0xf88] sm:$0xff]  ;;  %3483 = vmatpush.msrb.mxu2 %v3089_v16  ;;  %v2910_v16 = vld [vmem:[#allocation26 + $0x7d0] sm:$0xff] }
 0x712   : > { %v2957_v44 = vld [vmem:[#allocation26 + $0x948] sm:$0xff]  ;;  %3502 = vmatpush.msrb.mxu3 %v3157_v17  ;;  %v2778_v17 = vld [vmem:[#allocation26 + $0x3b0] sm:$0xff] }
 0x713   : > { %v3025_v4 = vld [vmem:[#allocation26 + $0xb68] sm:$0xff]  ;;  %3444 = vmatpush.msrb.mxu0 %v2957_v44  ;;  %v2838_v44 = vld [vmem:[#allocation26 + $0x590] sm:$0xff] }
 0x714   : > { %v3085_v52 = vld [vmem:[#allocation26 + $0xd48] sm:$0xff]  ;;  %3463 = vmatpush.msrb.mxu1 %v3025_v4  ;;  %v2906_v4 = vld [vmem:[#allocation26 + $0x7b0] sm:$0xff] }
 0x715   : > { %v3153_v31 = vld [vmem:[#allocation26 + $0xf68] sm:$0xff]  ;;  %3484 = vmatpush.msrb.mxu2 %v3085_v52  ;;  %v2834_v52 = vld [vmem:[#allocation26 + $0x570] sm:$0xff] }
 0x716   : > { %v2953_v37 = vld [vmem:[#allocation26 + $0x928] sm:$0xff]  ;;  %3503 = vmatpush.msrb.mxu3 %v3153_v31  ;;  %v2902_v31 = vld [vmem:[#allocation26 + $0x790] sm:$0xff] }
 0x717   : > { %v3021_v38 = vld [vmem:[#allocation26 + $0xb48] sm:$0xff]  ;;  %3445 = vmatpush.msrb.mxu0 %v2953_v37  ;;  %v2702_v37 = vld [vmem:[#allocation26 + $0x150] sm:$0xff] }
 0x718   : > { %v3081_v56 = vld [vmem:[#allocation26 + $0xd28] sm:$0xff]  ;;  %3464 = vmatpush.msrb.mxu1 %v3021_v38  ;;  %v2770_v38 = vld [vmem:[#allocation26 + $0x370] sm:$0xff] }
 0x719   : > { %v3149_v46 = vld [vmem:[#allocation26 + $0xf48] sm:$0xff]  ;;  %3485 = vmatpush.msrb.mxu2 %v3081_v56  ;;  %v2898_v56 = vld [vmem:[#allocation26 + $0x770] sm:$0xff] }
 0x71a   : > { %v2949_v21 = vld [vmem:[#allocation26 + $0x908] sm:$0xff]  ;;  %3504 = vmatpush.msrb.mxu3 %v3149_v46  ;;  %v2698_v46 = vld [vmem:[#allocation26 + $0x130] sm:$0xff] }
 0x71b   : > { %v3017_v13 = vld [vmem:[#allocation26 + $0xb28] sm:$0xff]  ;;  %3446 = vmatpush.msrb.mxu0 %v2949_v21  ;;  %v2766_v21 = vld [vmem:[#allocation26 + $0x350] sm:$0xff] }
 0x71c   : > { %v3077_v58 = vld [vmem:[#allocation26 + $0xd08] sm:$0xff]  ;;  %3465 = vmatpush.msrb.mxu1 %v3017_v13  ;;  %v2826_v13 = vld [vmem:[#allocation26 + $0x530] sm:$0xff] }
 0x71d   : > { %v3145_v9 = vld [vmem:[#allocation26 + $0xf28] sm:$0xff]  ;;  %3486 = vmatpush.msrb.mxu2 %v3077_v58  ;;  %v2894_v58 = vld [vmem:[#allocation26 + $0x750] sm:$0xff] }
 0x71e   : > { %v2945_v60 = vld [vmem:[#allocation26 + $0x8e8] sm:$0xff]  ;;  %3505 = vmatpush.msrb.mxu3 %v3145_v9  ;;  %v2694_v9 = vld [vmem:[#allocation26 + $0x110] sm:$0xff] }
 0x71f   : > { %v3013_v40 = vld [vmem:[#allocation26 + $0xb08] sm:$0xff]  ;;  %3447 = vmatpush.msrb.mxu0 %v2945_v60  ;;  %v2762_v60 = vld [vmem:[#allocation26 + $0x330] sm:$0xff] }
 0x720   : > { %v3073_v59 = vld [vmem:[#allocation26 + $0xce8] sm:$0xff]  ;;  %3466 = vmatpush.msrb.mxu1 %v3013_v40  ;;  %v2822_v40 = vld [vmem:[#allocation26 + $0x510] sm:$0xff] }
 0x721   : > { %v3141_v61 = vld [vmem:[#allocation26 + $0xf08] sm:$0xff]  ;;  %3487 = vmatpush.msrb.mxu2 %v3073_v59  ;;  %v2890_v59 = vld [vmem:[#allocation26 + $0x730] sm:$0xff] }
 0x722   : > { %v2941_v62 = vld [vmem:[#allocation26 + $0x8c8] sm:$0xff]  ;;  %3506 = vmatpush.msrb.mxu3 %v3141_v61  ;;  %v2690_v61 = vld [vmem:[#allocation26 + $0xf0] sm:$0xff] }
 0x723   : > { %v3009_v24 = vld [vmem:[#allocation26 + $0xae8] sm:$0xff]  ;;  %3448 = vmatpush.msrb.mxu0 %v2941_v62  ;;  %v2758_v62 = vld [vmem:[#allocation26 + $0x310] sm:$0xff] }
 0x724   : > { %v3069_v0 = vld [vmem:[#allocation26 + $0xcc8] sm:$0xff]  ;;  %3467 = vmatpush.msrb.mxu1 %v3009_v24  ;;  %v2818_v24 = vld [vmem:[#allocation26 + $0x4f0] sm:$0xff] }
 0x725   : > { %v3137_v19 = vld [vmem:[#allocation26 + $0xee8] sm:$0xff]  ;;  %3488 = vmatpush.msrb.mxu2 %v3069_v0  ;;  %v2886_v0 = vld [vmem:[#allocation26 + $0x710] sm:$0xff] }
 0x726   : > { %v2937_v34 = vld [vmem:[#allocation26 + $0x8a8] sm:$0xff]  ;;  %3507 = vmatpush.msrb.mxu3 %v3137_v19  ;;  %v2686_v19 = vld [vmem:[#allocation26 + $0xd0] sm:$0xff] }
 0x727   : > { %v3005_v35 = vld [vmem:[#allocation26 + $0xac8] sm:$0xff]  ;;  %3449 = vmatpush.msrb.mxu0 %v2937_v34  ;;  %v2754_v34 = vld [vmem:[#allocation26 + $0x2f0] sm:$0xff] }
 0x728   : > { %v3065_v25 = vld [vmem:[#allocation26 + $0xca8] sm:$0xff]  ;;  %3468 = vmatpush.msrb.mxu1 %v3005_v35  ;;  %v2814_v35 = vld [vmem:[#allocation26 + $0x4d0] sm:$0xff] }
 0x729   : > { %v3133_v2 = vld [vmem:[#allocation26 + $0xec8] sm:$0xff]  ;;  %3489 = vmatpush.msrb.mxu2 %v3065_v25  ;;  %v2882_v25 = vld [vmem:[#allocation26 + $0x6f0] sm:$0xff] }
 0x72a   : > { %v2933_v32 = vld [vmem:[#allocation26 + $0x888] sm:$0xff]  ;;  %3508 = vmatpush.msrb.mxu3 %v3133_v2  ;;  %v2682_v2 = vld [vmem:[#allocation26 + $0xb0] sm:$0xff] }
 0x72b   : > { %v3001_v26 = vld [vmem:[#allocation26 + $0xaa8] sm:$0xff]  ;;  %3450 = vmatpush.msrb.mxu0 %v2933_v32  ;;  %v2750_v32 = vld [vmem:[#allocation26 + $0x2d0] sm:$0xff] }
 0x72c   : > { %v3061_v50 = vld [vmem:[#allocation26 + $0xc88] sm:$0xff]  ;;  %3469 = vmatpush.msrb.mxu1 %v3001_v26  ;;  %v2810_v26 = vld [vmem:[#allocation26 + $0x4b0] sm:$0xff] }
 0x72d   : > { %v3129_v23 = vld [vmem:[#allocation26 + $0xea8] sm:$0xff]  ;;  %3490 = vmatpush.msrb.mxu2 %v3061_v50  ;;  %v2878_v50 = vld [vmem:[#allocation26 + $0x6d0] sm:$0xff] }
 0x72e   : > { %v2929_v22 = vld [vmem:[#allocation26 + $0x868] sm:$0xff]  ;;  %3509 = vmatpush.msrb.mxu3 %v3129_v23  ;;  %v2678_v23 = vld [vmem:[#allocation26 + $0x90] sm:$0xff] }
 0x72f   : > { %v2997_v20 = vld [vmem:[#allocation26 + $0xa88] sm:$0xff]  ;;  %3451 = vmatpush.msrb.mxu0 %v2929_v22  ;;  %v2746_v22 = vld [vmem:[#allocation26 + $0x2b0] sm:$0xff] }
 0x730   : > { %v3057_v14 = vld [vmem:[#allocation26 + $0xc68] sm:$0xff]  ;;  %3470 = vmatpush.msrb.mxu1 %v2997_v20  ;;  %v2806_v20 = vld [vmem:[#allocation26 + $0x490] sm:$0xff] }
 0x731   : > { %v3125_v27 = vld [vmem:[#allocation26 + $0xe88] sm:$0xff]  ;;  %3491 = vmatpush.msrb.mxu2 %v3057_v14  ;;  %v2874_v14 = vld [vmem:[#allocation26 + $0x6b0] sm:$0xff] }
 0x732   : > { %v2925_v15 = vld [vmem:[#allocation26 + $0x848] sm:$0xff]  ;;  %3510 = vmatpush.msrb.mxu3 %v3125_v27  ;;  %v2674_v27 = vld [vmem:[#allocation26 + $0x70] sm:$0xff] }
 0x733   : > { %v2993_v49 = vld [vmem:[#allocation26 + $0xa68] sm:$0xff]  ;;  %3452 = vmatpush.msrb.mxu0 %v2925_v15  ;;  %v2742_v15 = vld [vmem:[#allocation26 + $0x290] sm:$0xff] }
 0x734   : > { %v3053_v18 = vld [vmem:[#allocation26 + $0xc48] sm:$0xff]  ;;  %3471 = vmatpush.msrb.mxu1 %v2993_v49  ;;  %v2802_v49 = vld [vmem:[#allocation26 + $0x470] sm:$0xff] }
 0x735   : > { %v3121_v7 = vld [vmem:[#allocation26 + $0xe68] sm:$0xff]  ;;  %3492 = vmatpush.msrb.mxu2 %v3053_v18  ;;  %v2870_v18 = vld [vmem:[#allocation26 + $0x690] sm:$0xff] }
 0x736   : > { %v2921_v33 = vld [vmem:[#allocation26 + $0x828] sm:$0xff]  ;;  %3511 = vmatpush.msrb.mxu3 %v3121_v7  ;;  %v2670_v7 = vld [vmem:[#allocation26 + $0x50] sm:$0xff] }
 0x737   : > { %v2989_v5 = vld [vmem:[#allocation26 + $0xa48] sm:$0xff]  ;;  %3453 = vmatpush.msrb.mxu0 %v2921_v33  ;;  %v2738_v33 = vld [vmem:[#allocation26 + $0x270] sm:$0xff] }
 0x738   : > { %v3049_v10 = vld [vmem:[#allocation26 + $0xc28] sm:$0xff]  ;;  %3472 = vmatpush.msrb.mxu1 %v2989_v5  ;;  %v2798_v5 = vld [vmem:[#allocation26 + $0x450] sm:$0xff] }
 0x739   : > { %v3117_v42 = vld [vmem:[#allocation26 + $0xe48] sm:$0xff]  ;;  %3493 = vmatpush.msrb.mxu2 %v3049_v10  ;;  %v2866_v10 = vld [vmem:[#allocation26 + $0x670] sm:$0xff] }
 0x73a   : > { %v2917_v53 = vld [vmem:[#allocation26 + $0x808] sm:$0xff]  ;;  %3512 = vmatpush.msrb.mxu3 %v3117_v42  ;;  %v2666_v42 = vld [vmem:[#allocation26 + $0x30] sm:$0xff] }
 0x73b   : > { %v2985_v51 = vld [vmem:[#allocation26 + $0xa28] sm:$0xff]  ;;  %3454 = vmatpush.msrb.mxu0 %v2917_v53  ;;  %v2734_v53 = vld [vmem:[#allocation26 + $0x250] sm:$0xff] }
 0x73c   : > { %v3045_v28 = vld [vmem:[#allocation26 + $0xc08] sm:$0xff]  ;;  %3473 = vmatpush.msrb.mxu1 %v2985_v51  ;;  %3455 = vmatmul.f32.vlgmr.msrb.gmra.mxu0 %v6557_v12  ;;  %v2706_v12 = vld [vmem:[#allocation26 + $0x170] sm:$0xff] }
 0x73d   : > { %v3113_v54 = vld [vmem:[#allocation26 + $0xe28] sm:$0xff]  ;;  %3494 = vmatpush.msrb.mxu2 %v3045_v28  ;;  %3519 = vmatpush.msra.mxu0 %v2722_v55  ;;  %v2794_v51 = vld [vmem:[#allocation26 + $0x430] sm:$0xff] }
 0x73e   : > { %v2981_v47 = vld [vmem:[#allocation26 + $0xa08] sm:$0xff]  ;;  %3513 = vmatpush.msrb.mxu3 %v3113_v54  ;;  %3495 = vmatmul.f32.vlgmr.msrb.gmra.mxu2 %v6553_v36  ;;  %v2710_v36 = vld [vmem:[#allocation26 + $0x190] sm:$0xff] }
 0x73f   : > { %v3109_v8 = vld [vmem:[#allocation26 + $0xe08] sm:$0xff]  ;;  %3559 = vmatpush.msra.mxu2 %v2850_v57  ;;  %3474 = vmatpush.msrb.mxu1 %v2981_v47  ;;  %v2862_v28 = vld [vmem:[#allocation26 + $0x650] sm:$0xff] }
 0x740   : > { %3514 = vmatpush.msrb.mxu3 %v3109_v8  ;;  %3520 = vmatpush.msra.mxu0 %v2718_v63  ;;  %v2662_v54 = vld [vmem:[#allocation26 + $0x10] sm:$0xff] }
 0x741   : > { %3515 = vmatmul.f32.vlgmr.msrb.gmra.mxu3 %v6555_v1  ;;  %3539 = vmatpush.msra.mxu1 %v2786_v43  ;;  %v2774_v1 = vld [vmem:[#allocation26 + $0x390] sm:$0xff] }
 0x742   : > { %3560 = vmatpush.msra.mxu2 %v2846_v30  ;;  %3579 = vmatpush.msra.mxu3 %v2914_v45  ;;  %v2730_v55 = vld [vmem:[#allocation26 + $0x230] sm:$0xff] }
 0x743   : > { %3475 = vmatmul.f32.vlgmr.msrb.gmra.mxu1 %v6559_v29  ;;  %3521 = vmatpush.msra.mxu0 %v2714_v39  ;;  %v2830_v29 = vld [vmem:[#allocation26 + $0x550] sm:$0xff] }
 0x744   : > { %3540 = vmatpush.msra.mxu1 %v2782_v3  ;;  %3561 = vmatpush.msra.mxu2 %v2842_v6  ;;  %v2790_v57 = vld [vmem:[#allocation26 + $0x410] sm:$0xff] }
 0x745   : > { %3580 = vmatpush.msra.mxu3 %v2910_v16  ;;  %3522 = vmatpush.msra.mxu0 %v2710_v36  ;;  %v2858_v47 = vld [vmem:[#allocation26 + $0x630] sm:$0xff] }
 0x746   : > { %3541 = vmatpush.msra.mxu1 %v2778_v17  ;;  %3562 = vmatpush.msra.mxu2 %v2838_v44  ;;  %v2978_v8 = vld [vmem:[#allocation26 + $0x9f0] sm:$0xff] }
 0x747   : > { %3581 = vmatpush.msra.mxu3 %v2906_v4  ;;  %3523 = vmatpush.msra.mxu0 %v2706_v12  ;;  %v3106_v63 = vld [vmem:[#allocation26 + $0xdf0] sm:$0xff] }
 0x748   : > { %3542 = vmatpush.msra.mxu1 %v2774_v1  ;;  %3563 = vmatpush.msra.mxu2 %v2834_v52  ;;  %v2726_v43 = vld [vmem:[#allocation26 + $0x210] sm:$0xff] }
 0x749   : > { %3582 = vmatpush.msra.mxu3 %v2902_v31  ;;  %3524 = vmatpush.msra.mxu0 %v2702_v37  ;;  %v2854_v30 = vld [vmem:[#allocation26 + $0x610] sm:$0xff] }
 0x74a   : > { %3543 = vmatpush.msra.mxu1 %v2770_v38  ;;  %3564 = vmatpush.msra.mxu2 %v2830_v29  ;;  %v2974_v45 = vld [vmem:[#allocation26 + $0x9d0] sm:$0xff] }
 0x74b   : > { %3583 = vmatpush.msra.mxu3 %v2898_v56  ;;  %3525 = vmatpush.msra.mxu0 %v2698_v46  ;;  %v3042_v39 = vld [vmem:[#allocation26 + $0xbf0] sm:$0xff] }
 0x74c   : > { %3544 = vmatpush.msra.mxu1 %v2766_v21  ;;  %3565 = vmatpush.msra.mxu2 %v2826_v13  ;;  %v3102_v3 = vld [vmem:[#allocation26 + $0xdd0] sm:$0xff] }
 0x74d   : > { %3584 = vmatpush.msra.mxu3 %v2894_v58  ;;  %3526 = vmatpush.msra.mxu0 %v2694_v9  ;;  %v3170_v6 = vld [vmem:[#allocation26 + $0xff0] sm:$0xff] }
 0x74e   : > { %3545 = vmatpush.msra.mxu1 %v2762_v60  ;;  %3566 = vmatpush.msra.mxu2 %v2822_v40  ;;  %v2970_v16 = vld [vmem:[#allocation26 + $0x9b0] sm:$0xff] }
 0x74f   : > { %3585 = vmatpush.msra.mxu3 %v2890_v59  ;;  %3527 = vmatpush.msra.mxu0 %v2690_v61  ;;  %v3038_v36 = vld [vmem:[#allocation26 + $0xbd0] sm:$0xff] }
 0x750   : > { %3546 = vmatpush.msra.mxu1 %v2758_v62  ;;  %3567 = vmatpush.msra.mxu2 %v2818_v24  ;;  %v3098_v17 = vld [vmem:[#allocation26 + $0xdb0] sm:$0xff] }
 0x751   : > { %3586 = vmatpush.msra.mxu3 %v2886_v0  ;;  %3528 = vmatpush.msra.mxu0 %v2686_v19  ;;  %v3166_v44 = vld [vmem:[#allocation26 + $0xfd0] sm:$0xff] }
 0x752   : > { %3547 = vmatpush.msra.mxu1 %v2754_v34  ;;  %3568 = vmatpush.msra.mxu2 %v2814_v35  ;;  %v2966_v4 = vld [vmem:[#allocation26 + $0x990] sm:$0xff] }
 0x753   : > { %3587 = vmatpush.msra.mxu3 %v2882_v25  ;;  %3529 = vmatpush.msra.mxu0 %v2682_v2  ;;  %v3034_v12 = vld [vmem:[#allocation26 + $0xbb0] sm:$0xff] }
 0x754   : > { %3548 = vmatpush.msra.mxu1 %v2750_v32  ;;  %3569 = vmatpush.msra.mxu2 %v2810_v26  ;;  %v3094_v1 = vld [vmem:[#allocation26 + $0xd90] sm:$0xff] }
 0x755   : > { %3588 = vmatpush.msra.mxu3 %v2878_v50  ;;  %3530 = vmatpush.msra.mxu0 %v2678_v23  ;;  %v3162_v52 = vld [vmem:[#allocation26 + $0xfb0] sm:$0xff] }
 0x756   : > { %3549 = vmatpush.msra.mxu1 %v2746_v22  ;;  %3570 = vmatpush.msra.mxu2 %v2806_v20  ;;  %v2962_v31 = vld [vmem:[#allocation26 + $0x970] sm:$0xff] }
 0x757   : > { %3589 = vmatpush.msra.mxu3 %v2874_v14  ;;  %3531 = vmatpush.msra.mxu0 %v2674_v27  ;;  %v3030_v37 = vld [vmem:[#allocation26 + $0xb90] sm:$0xff] }
 0x758   : > { %3550 = vmatpush.msra.mxu1 %v2742_v15  ;;  %3571 = vmatpush.msra.mxu2 %v2802_v49  ;;  %v3090_v38 = vld [vmem:[#allocation26 + $0xd70] sm:$0xff] }
 0x759   : > { %3590 = vmatpush.msra.mxu3 %v2870_v18  ;;  %3532 = vmatpush.msra.mxu0 %v2670_v7  ;;  %v3158_v29 = vld [vmem:[#allocation26 + $0xf90] sm:$0xff] }
 0x75a   : > { %3551 = vmatpush.msra.mxu1 %v2738_v33  ;;  %3572 = vmatpush.msra.mxu2 %v2798_v5  ;;  %v2958_v56 = vld [vmem:[#allocation26 + $0x950] sm:$0xff] }
 0x75b   : > { %3591 = vmatpush.msra.mxu3 %v2866_v10  ;;  %3533 = vmatpush.msra.mxu0 %v2666_v42  ;;  %v3026_v46 = vld [vmem:[#allocation26 + $0xb70] sm:$0xff] }
 0x75c   : > { %3552 = vmatpush.msra.mxu1 %v2734_v53  ;;  %3573 = vmatpush.msra.mxu2 %v2794_v51  ;;  %v3086_v21 = vld [vmem:[#allocation26 + $0xd50] sm:$0xff] }
 0x75d   : > { %3592 = vmatpush.msra.mxu3 %v2862_v28  ;;  %3534 = vmatpush.msra.mxu0 %v2662_v54  ;;  %v3154_v13 = vld [vmem:[#allocation26 + $0xf70] sm:$0xff] }
 0x75e   : > { %3553 = vmatpush.msra.mxu1 %v2730_v55  ;;  %3574 = vmatpush.msra.mxu2 %v2790_v57  ;;  %v2954_v58 = vld [vmem:[#allocation26 + $0x930] sm:$0xff] }
 0x75f   : > { %3593 = vmatpush.msra.mxu3 %v2858_v47  ;;  %3599 = vmatpush.msrb.mxu0 %v2978_v8  ;;  %v3022_v9 = vld [vmem:[#allocation26 + $0xb50] sm:$0xff] }
 0x760   : > { %3639 = vmatpush.msrb.mxu2 %v3106_v63  ;;  %3554 = vmatpush.msra.mxu1 %v2726_v43  ;;  %v3082_v60 = vld [vmem:[#allocation26 + $0xd30] sm:$0xff]  ;;  %v2851_v43 = vld [vmem:[#allocation26 + $0x5f8] sm:$0xff] }
 0x761   : > { %3594 = vmatpush.msra.mxu3 %v2854_v30  ;;  %3600 = vmatpush.msrb.mxu0 %v2974_v45  ;;  %v3150_v40 = vld [vmem:[#allocation26 + $0xf50] sm:$0xff] }
 0x762   : > { %3619 = vmatpush.msrb.mxu1 %v3042_v39  ;;  %3640 = vmatpush.msrb.mxu2 %v3102_v3  ;;  %v2950_v59 = vld [vmem:[#allocation26 + $0x910] sm:$0xff]  ;;  %v6579_v39 = vld.sshfl [vmem:[#allocation1 + $0x30] sm:$0xff pattern:$0x75316420]  ;;  %v2719_v3 = vld [vmem:[#allocation26 + $0x1d8] sm:$0xff] }
 0x763   : > { %3659 = vmatpush.msrb.mxu3 %v3170_v6  ;;  %3601 = vmatpush.msrb.mxu0 %v2970_v16  ;;  %v3018_v61 = vld [vmem:[#allocation26 + $0xb30] sm:$0xff]  ;;  %v2787_v6 = vld [vmem:[#allocation26 + $0x3f8] sm:$0xff] }
 0x764   : > { %3620 = vmatpush.msrb.mxu1 %v3038_v36  ;;  %3641 = vmatpush.msrb.mxu2 %v3098_v17  ;;  %v3078_v62 = vld [vmem:[#allocation26 + $0xd10] sm:$0xff]  ;;  %v2847_v16 = vld [vmem:[#allocation26 + $0x5d8] sm:$0xff] }
 0x765   : > { %3660 = vmatpush.msrb.mxu3 %v3166_v44  ;;  %3602 = vmatpush.msrb.mxu0 %v2966_v4  ;;  %v3146_v24 = vld [vmem:[#allocation26 + $0xf30] sm:$0xff]  ;;  %v2915_v17 = vld [vmem:[#allocation26 + $0x7f8] sm:$0xff] }
 0x766   : > { %3621 = vmatpush.msrb.mxu1 %v3034_v12  ;;  %3642 = vmatpush.msrb.mxu2 %v3094_v1  ;;  %v2946_v0 = vld [vmem:[#allocation26 + $0x8f0] sm:$0xff]  ;;  %v2715_v4 = vld [vmem:[#allocation26 + $0x1b8] sm:$0xff] }
 0x767   : > { %3661 = vmatpush.msrb.mxu3 %v3162_v52  ;;  %3603 = vmatpush.msrb.mxu0 %v2962_v31  ;;  %v3014_v19 = vld [vmem:[#allocation26 + $0xb10] sm:$0xff]  ;;  %v2783_v12 = vld [vmem:[#allocation26 + $0x3d8] sm:$0xff] }
 0x768   : > { %3622 = vmatpush.msrb.mxu1 %v3030_v37  ;;  %3643 = vmatpush.msrb.mxu2 %v3090_v38  ;;  %v3074_v34 = vld [vmem:[#allocation26 + $0xcf0] sm:$0xff]  ;;  %v2843_v1 = vld [vmem:[#allocation26 + $0x5b8] sm:$0xff] }
 0x769   : > { %3662 = vmatpush.msrb.mxu3 %v3158_v29  ;;  %3604 = vmatpush.msrb.mxu0 %v2958_v56  ;;  %v3142_v35 = vld [vmem:[#allocation26 + $0xf10] sm:$0xff]  ;;  %v2911_v52 = vld [vmem:[#allocation26 + $0x7d8] sm:$0xff] }
 0x76a   : > { %3623 = vmatpush.msrb.mxu1 %v3026_v46  ;;  %3644 = vmatpush.msrb.mxu2 %v3086_v21  ;;  %v2942_v25 = vld [vmem:[#allocation26 + $0x8d0] sm:$0xff]  ;;  %v6588_v31 = vld.sshfl [vmem:[#allocation1 + $0x28] sm:$0xff pattern:$0x75316420] }
 0x76b   : > { %3663 = vmatpush.msrb.mxu3 %v3154_v13  ;;  %3605 = vmatpush.msrb.mxu0 %v2954_v58  ;;  %v3010_v2 = vld [vmem:[#allocation26 + $0xaf0] sm:$0xff]  ;;  %v2711_v37 = vld [vmem:[#allocation26 + $0x198] sm:$0xff] }
 0x76c   : > { %3624 = vmatpush.msrb.mxu1 %v3022_v9  ;;  %3645 = vmatpush.msrb.mxu2 %v3082_v60  ;;  %v3070_v32 = vld [vmem:[#allocation26 + $0xcd0] sm:$0xff]  ;;  %v2779_v38 = vld [vmem:[#allocation26 + $0x3b8] sm:$0xff] }
 0x76d   : > { %3664 = vmatpush.msrb.mxu3 %v3150_v40  ;;  %3606 = vmatpush.msrb.mxu0 %v2950_v59  ;;  %v3138_v26 = vld [vmem:[#allocation26 + $0xef0] sm:$0xff]  ;;  %v2839_v29 = vld [vmem:[#allocation26 + $0x598] sm:$0xff] }
 0x76e   : > { %3625 = vmatpush.msrb.mxu1 %v3018_v61  ;;  %3646 = vmatpush.msrb.mxu2 %v3078_v62  ;;  %v2938_v50 = vld [vmem:[#allocation26 + $0x8b0] sm:$0xff]  ;;  %v2907_v56 = vld [vmem:[#allocation26 + $0x7b8] sm:$0xff] }
 0x76f   : > { %3665 = vmatpush.msrb.mxu3 %v3146_v24  ;;  %3607 = vmatpush.msrb.mxu0 %v2946_v0  ;;  %v3006_v23 = vld [vmem:[#allocation26 + $0xad0] sm:$0xff]  ;;  %v2707_v46 = vld [vmem:[#allocation26 + $0x178] sm:$0xff] }
 0x770   : > { %3626 = vmatpush.msrb.mxu1 %v3014_v19  ;;  %3647 = vmatpush.msrb.mxu2 %v3074_v34  ;;  %v3066_v22 = vld [vmem:[#allocation26 + $0xcb0] sm:$0xff]  ;;  %v2775_v21 = vld [vmem:[#allocation26 + $0x398] sm:$0xff] }
 0x771   : > { %3666 = vmatpush.msrb.mxu3 %v3142_v35  ;;  %3608 = vmatpush.msrb.mxu0 %v2942_v25  ;;  %v3134_v20 = vld [vmem:[#allocation26 + $0xed0] sm:$0xff]  ;;  %v2835_v13 = vld [vmem:[#allocation26 + $0x578] sm:$0xff] }
 0x772   : > { %3627 = vmatpush.msrb.mxu1 %v3010_v2  ;;  %3648 = vmatpush.msrb.mxu2 %v3070_v32  ;;  %v2934_v14 = vld [vmem:[#allocation26 + $0x890] sm:$0xff]  ;;  %v2903_v58 = vld [vmem:[#allocation26 + $0x798] sm:$0xff] }
 0x773   : > { %3667 = vmatpush.msrb.mxu3 %v3138_v26  ;;  %v3002_v27 = vld [vmem:[#allocation26 + $0xab0] sm:$0xff]  ;;  %3609 = vmatpush.msrb.mxu0 %v2938_v50  ;;  %v2703_v9 = vld [vmem:[#allocation26 + $0x158] sm:$0xff] }
 0x774   : > { %3628 = vmatpush.msrb.mxu1 %v3006_v23  ;;  %v3062_v15 = vld [vmem:[#allocation26 + $0xc90] sm:$0xff]  ;;  %3649 = vmatpush.msrb.mxu2 %v3066_v22  ;;  %v2771_v60 = vld [vmem:[#allocation26 + $0x378] sm:$0xff] }
 0x775   : > { %v3130_v49 = vld [vmem:[#allocation26 + $0xeb0] sm:$0xff]  ;;  %3668 = vmatpush.msrb.mxu3 %v3134_v20  ;;  %3610 = vmatpush.msrb.mxu0 %v2934_v14  ;;  %v2831_v40 = vld [vmem:[#allocation26 + $0x558] sm:$0xff] }
 0x776   : > { %v2930_v18 = vld [vmem:[#allocation26 + $0x870] sm:$0xff]  ;;  %3629 = vmatpush.msrb.mxu1 %v3002_v27  ;;  %3650 = vmatpush.msrb.mxu2 %v3062_v15  ;;  %v2899_v59 = vld [vmem:[#allocation26 + $0x778] sm:$0xff] }
 0x777   : > { %v2998_v7 = vld [vmem:[#allocation26 + $0xa90] sm:$0xff]  ;;  %3669 = vmatpush.msrb.mxu3 %v3130_v49  ;;  %3575 = vmatmul.f32.vlgmr.msra.gmra.mxu2 %v6541_v48  ;;  %v6576_v48 = vld.sshfl [vmem:[#allocation1 + $0x8] sm:$0xff pattern:$0x75316420] }
 0x778   : > { %v3058_v33 = vld [vmem:[#allocation26 + $0xc70] sm:$0xff]  ;;  %3611 = vmatpush.msrb.mxu0 %v2930_v18  ;;  %3630 = vmatpush.msrb.mxu1 %v2998_v7  ;;  %v2699_v61 = vld [vmem:[#allocation26 + $0x138] sm:$0xff] }
 0x779   : > { %v3126_v5 = vld [vmem:[#allocation26 + $0xe90] sm:$0xff]  ;;  %3651 = vmatpush.msrb.mxu2 %v3058_v33  ;;  %3535 = vmatmul.f32.vlgmr.msra.gmra.mxu0 %v6546_v11  ;;  %v2767_v62 = vld [vmem:[#allocation26 + $0x358] sm:$0xff] }
 0x77a   : > { %v2926_v10 = vld [vmem:[#allocation26 + $0x850] sm:$0xff]  ;;  %3670 = vmatpush.msrb.mxu3 %v3126_v5  ;;  %3555 = vmatmul.f32.vlgmr.msra.gmra.mxu1 %v6576_v48  ;;  %v2827_v24 = vld [vmem:[#allocation26 + $0x538] sm:$0xff] }
 0x77b   : > { %v2994_v42 = vld [vmem:[#allocation26 + $0xa70] sm:$0xff]  ;;  %3595 = vmatmul.f32.vlgmr.msra.gmra.mxu3 %v6543_v41  ;;  %3612 = vmatpush.msrb.mxu0 %v2926_v10  ;;  %v2723_v41 = vld [vmem:[#allocation26 + $0x1f8] sm:$0xff] }
 0x77c   : > { %v3054_v53 = vld [vmem:[#allocation26 + $0xc50] sm:$0xff]  ;;  %3631 = vmatpush.msrb.mxu1 %v2994_v42  ;;  %v2895_v0 = vld [vmem:[#allocation26 + $0x758] sm:$0xff] }
 0x77d   : > { %v3122_v51 = vld [vmem:[#allocation26 + $0xe70] sm:$0xff]  ;;  %3652 = vmatpush.msrb.mxu2 %v3054_v53  ;;  %v2695_v19 = vld [vmem:[#allocation26 + $0x118] sm:$0xff] }
 0x77e   : > { %v2922_v28 = vld [vmem:[#allocation26 + $0x830] sm:$0xff]  ;;  %3671 = vmatpush.msrb.mxu3 %v3122_v51  ;;  %v2763_v34 = vld [vmem:[#allocation26 + $0x338] sm:$0xff] }
 0x77f   : > { %v2990_v54 = vld [vmem:[#allocation26 + $0xa50] sm:$0xff]  ;;  %3613 = vmatpush.msrb.mxu0 %v2922_v28  ;;  %v2823_v35 = vld [vmem:[#allocation26 + $0x518] sm:$0xff] }
 0x780   : > { %v3050_v55 = vld [vmem:[#allocation26 + $0xc30] sm:$0xff]  ;;  %3632 = vmatpush.msrb.mxu1 %v2990_v54  ;;  %v2891_v25 = vld [vmem:[#allocation26 + $0x738] sm:$0xff] }
 0x781   : > { %v3118_v57 = vld [vmem:[#allocation26 + $0xe50] sm:$0xff]  ;;  %3653 = vmatpush.msrb.mxu2 %v3050_v55  ;;  %v2691_v2 = vld [vmem:[#allocation26 + $0xf8] sm:$0xff] }
 0x782   : > { %v2918_v47 = vld [vmem:[#allocation26 + $0x810] sm:$0xff]  ;;  %3672 = vmatpush.msrb.mxu3 %v3118_v57  ;;  %v2759_v32 = vld [vmem:[#allocation26 + $0x318] sm:$0xff] }
 0x783   : > { %v2986_v8 = vld [vmem:[#allocation26 + $0xa30] sm:$0xff]  ;;  %3614 = vmatpush.msrb.mxu0 %v2918_v47  ;;  %v2819_v26 = vld [vmem:[#allocation26 + $0x4f8] sm:$0xff] }
 0x784   : > { %v3046_v11 = vld [vmem:[#allocation26 + $0xc10] sm:$0xff]  ;;  %3633 = vmatpush.msrb.mxu1 %v2986_v8  ;;  %v2887_v50 = vld [vmem:[#allocation26 + $0x718] sm:$0xff] }
 0x785   : > { %v3114_v63 = vld [vmem:[#allocation26 + $0xe30] sm:$0xff]  ;;  %3654 = vmatpush.msrb.mxu2 %v3046_v11  ;;  %3679 = vmatpush.msra.mxu0 %v2723_v41  ;;  %v2687_v23 = vld [vmem:[#allocation26 + $0xd8] sm:$0xff] }
 0x786   : > { %v2982_v30 = vld [vmem:[#allocation26 + $0xa10] sm:$0xff]  ;;  %3673 = vmatpush.msrb.mxu3 %v3114_v63  ;;  %3655 = vmatmul.f32.vlgmr.msrb.gmra.mxu2 %v6579_v39  ;;  %v2755_v22 = vld [vmem:[#allocation26 + $0x2f8] sm:$0xff] }
 0x787   : > { %v3110_v45 = vld [vmem:[#allocation26 + $0xe10] sm:$0xff]  ;;  %3719 = vmatpush.msra.mxu2 %v2851_v43  ;;  %3634 = vmatpush.msrb.mxu1 %v2982_v30  ;;  %v2815_v20 = vld [vmem:[#allocation26 + $0x4d8] sm:$0xff] }
 0x788   : > { %3674 = vmatpush.msrb.mxu3 %v3110_v45  ;;  %v6582_v36 = vld.sshfl [vmem:[#allocation1 + $0x20] sm:$0xff pattern:$0x75316420]  ;;  %v6585_v44 = vld.sshfl [vmem:[#allocation1 + $0x38] sm:$0xff pattern:$0x75316420]  ;;  %3680 = vmatpush.msra.mxu0 %v2719_v3 }
 0x789   : > { %3615 = vmatmul.f32.vlgmr.msrb.gmra.mxu0 %v6582_v36  ;;  %3675 = vmatmul.f32.vlgmr.msrb.gmra.mxu3 %v6585_v44  ;;  %v2883_v14 = vld [vmem:[#allocation26 + $0x6f8] sm:$0xff] }
 0x78a   : > { %3699 = vmatpush.msra.mxu1 %v2787_v6  ;;  %3720 = vmatpush.msra.mxu2 %v2847_v16  ;;  %v2683_v27 = vld [vmem:[#allocation26 + $0xb8] sm:$0xff] }
 0x78b   : > { %3739 = vmatpush.msra.mxu3 %v2915_v17  ;;  %3635 = vmatmul.f32.vlgmr.msrb.gmra.mxu1 %v6588_v31  ;;  %v2751_v15 = vld [vmem:[#allocation26 + $0x2d8] sm:$0xff] }
 0x78c   : > { %3681 = vmatpush.msra.mxu0 %v2715_v4  ;;  %3700 = vmatpush.msra.mxu1 %v2783_v12  ;;  %v2811_v49 = vld [vmem:[#allocation26 + $0x4b8] sm:$0xff] }
 0x78d   : > { %3721 = vmatpush.msra.mxu2 %v2843_v1  ;;  %3740 = vmatpush.msra.mxu3 %v2911_v52  ;;  %v2879_v18 = vld [vmem:[#allocation26 + $0x6d8] sm:$0xff] }
 0x78e   : > { %3682 = vmatpush.msra.mxu0 %v2711_v37  ;;  %3701 = vmatpush.msra.mxu1 %v2779_v38  ;;  %v2679_v7 = vld [vmem:[#allocation26 + $0x98] sm:$0xff] }
 0x78f   : > { %3722 = vmatpush.msra.mxu2 %v2839_v29  ;;  %3741 = vmatpush.msra.mxu3 %v2907_v56  ;;  %v2747_v33 = vld [vmem:[#allocation26 + $0x2b8] sm:$0xff] }
 0x790   : > { %3683 = vmatpush.msra.mxu0 %v2707_v46  ;;  %3702 = vmatpush.msra.mxu1 %v2775_v21  ;;  %v2807_v5 = vld [vmem:[#allocation26 + $0x498] sm:$0xff] }
 0x791   : > { %3723 = vmatpush.msra.mxu2 %v2835_v13  ;;  %3742 = vmatpush.msra.mxu3 %v2903_v58  ;;  %v2875_v10 = vld [vmem:[#allocation26 + $0x6b8] sm:$0xff] }
 0x792   : > { %3684 = vmatpush.msra.mxu0 %v2703_v9  ;;  %3703 = vmatpush.msra.mxu1 %v2771_v60  ;;  %v2675_v42 = vld [vmem:[#allocation26 + $0x78] sm:$0xff] }
 0x793   : > { %3724 = vmatpush.msra.mxu2 %v2831_v40  ;;  %3743 = vmatpush.msra.mxu3 %v2899_v59  ;;  %v2743_v53 = vld [vmem:[#allocation26 + $0x298] sm:$0xff] }
 0x794   : > { %3685 = vmatpush.msra.mxu0 %v2699_v61  ;;  %3704 = vmatpush.msra.mxu1 %v2767_v62  ;;  %v2803_v51 = vld [vmem:[#allocation26 + $0x478] sm:$0xff] }
 0x795   : > { %3725 = vmatpush.msra.mxu2 %v2827_v24  ;;  %3744 = vmatpush.msra.mxu3 %v2895_v0  ;;  %v2871_v28 = vld [vmem:[#allocation26 + $0x698] sm:$0xff] }
 0x796   : > { %3686 = vmatpush.msra.mxu0 %v2695_v19  ;;  %3705 = vmatpush.msra.mxu1 %v2763_v34  ;;  %v2671_v54 = vld [vmem:[#allocation26 + $0x58] sm:$0xff] }
 0x797   : > { %3726 = vmatpush.msra.mxu2 %v2823_v35  ;;  %3745 = vmatpush.msra.mxu3 %v2891_v25  ;;  %v2739_v55 = vld [vmem:[#allocation26 + $0x278] sm:$0xff] }
 0x798   : > { %3687 = vmatpush.msra.mxu0 %v2691_v2  ;;  %3706 = vmatpush.msra.mxu1 %v2759_v32  ;;  %v2799_v57 = vld [vmem:[#allocation26 + $0x458] sm:$0xff] }
 0x799   : > { %3727 = vmatpush.msra.mxu2 %v2819_v26  ;;  %3746 = vmatpush.msra.mxu3 %v2887_v50  ;;  %v2867_v47 = vld [vmem:[#allocation26 + $0x678] sm:$0xff] }
 0x79a   : > { %3688 = vmatpush.msra.mxu0 %v2687_v23  ;;  %3707 = vmatpush.msra.mxu1 %v2755_v22  ;;  %v2667_v8 = vld [vmem:[#allocation26 + $0x38] sm:$0xff] }
 0x79b   : > { %3728 = vmatpush.msra.mxu2 %v2815_v20  ;;  %3747 = vmatpush.msra.mxu3 %v2883_v14  ;;  %v2735_v11 = vld [vmem:[#allocation26 + $0x258] sm:$0xff] }
 0x79c   : > { %3689 = vmatpush.msra.mxu0 %v2683_v27  ;;  %3708 = vmatpush.msra.mxu1 %v2751_v15  ;;  %v2795_v63 = vld [vmem:[#allocation26 + $0x438] sm:$0xff] }
 0x79d   : > { %3729 = vmatpush.msra.mxu2 %v2811_v49  ;;  %3748 = vmatpush.msra.mxu3 %v2879_v18  ;;  %v2863_v41 = vld [vmem:[#allocation26 + $0x658] sm:$0xff] }
 0x79e   : > { %3690 = vmatpush.msra.mxu0 %v2679_v7  ;;  %3709 = vmatpush.msra.mxu1 %v2747_v33  ;;  %v2663_v43 = vld [vmem:[#allocation26 + $0x18] sm:$0xff] }
 0x79f   : > { %3730 = vmatpush.msra.mxu2 %v2807_v5  ;;  %3749 = vmatpush.msra.mxu3 %v2875_v10  ;;  %v2731_v30 = vld [vmem:[#allocation26 + $0x238] sm:$0xff] }
 0x7a0   : > { %3691 = vmatpush.msra.mxu0 %v2675_v42  ;;  %3710 = vmatpush.msra.mxu1 %v2743_v53  ;;  %v2791_v45 = vld [vmem:[#allocation26 + $0x418] sm:$0xff] }
 0x7a1   : > { %3731 = vmatpush.msra.mxu2 %v2803_v51  ;;  %3750 = vmatpush.msra.mxu3 %v2871_v28  ;;  %v2859_v3 = vld [vmem:[#allocation26 + $0x638] sm:$0xff] }
 0x7a2   : > { %3692 = vmatpush.msra.mxu0 %v2671_v54  ;;  %3711 = vmatpush.msra.mxu1 %v2739_v55  ;;  %v2979_v6 = vld [vmem:[#allocation26 + $0x9f8] sm:$0xff]  ;;  %v5066_v55 = vld.sshfl [vmem:[#allocation1 + $0x10] sm:$0xff pattern:$0x75316420] }
 0x7a3   : > { %3732 = vmatpush.msra.mxu2 %v2799_v57  ;;  %3751 = vmatpush.msra.mxu3 %v2867_v47  ;;  %v3107_v16 = vld [vmem:[#allocation26 + $0xdf8] sm:$0xff] }
 0x7a4   : > { %3693 = vmatpush.msra.mxu0 %v2667_v8  ;;  %3712 = vmatpush.msra.mxu1 %v2735_v11  ;;  %v2727_v17 = vld [vmem:[#allocation26 + $0x218] sm:$0xff] }
 0x7a5   : > { %3733 = vmatpush.msra.mxu2 %v2795_v63  ;;  %3752 = vmatpush.msra.mxu3 %v2863_v41  ;;  %v2855_v4 = vld [vmem:[#allocation26 + $0x618] sm:$0xff]  ;;  %v5068_v41 = vld.sshfl [vmem:[#allocation1 + $0x18] sm:$0xff pattern:$0x75316420] }
 0x7a6   : > { %3694 = vmatpush.msra.mxu0 %v2663_v43  ;;  %3713 = vmatpush.msra.mxu1 %v2731_v30  ;;  %v2975_v12 = vld [vmem:[#allocation26 + $0x9d8] sm:$0xff] }
 0x7a7   : > { %3734 = vmatpush.msra.mxu2 %v2791_v45  ;;  %3753 = vmatpush.msra.mxu3 %v2859_v3  ;;  %v3043_v1 = vld [vmem:[#allocation26 + $0xbf8] sm:$0xff] }
 0x7a8   : > { %3759 = vmatpush.msrb.mxu0 %v2979_v6  ;;  %v3103_v52 = vld [vmem:[#allocation26 + $0xdd8] sm:$0xff]  ;;  %3714 = vmatpush.msra.mxu1 %v2727_v17 }
 0x7a9   : > { %3799 = vmatpush.msrb.mxu2 %v3107_v16  ;;  %v3171_v37 = vld [vmem:[#allocation26 + $0xff8] sm:$0xff]  ;;  %3754 = vmatpush.msra.mxu3 %v2855_v4 }
 0x7aa   : > { %v2971_v38 = vld [vmem:[#allocation26 + $0x9b8] sm:$0xff]  ;;  %3760 = vmatpush.msrb.mxu0 %v2975_v12  ;;  %3779 = vmatpush.msrb.mxu1 %v3043_v1 }
 0x7ab   : > { %v3039_v29 = vld [vmem:[#allocation26 + $0xbd8] sm:$0xff]  ;;  %3800 = vmatpush.msrb.mxu2 %v3103_v52  ;;  %3819 = vmatpush.msrb.mxu3 %v3171_v37 }
 0x7ac   : > { %v3099_v56 = vld [vmem:[#allocation26 + $0xdb8] sm:$0xff]  ;;  %3761 = vmatpush.msrb.mxu0 %v2971_v38  ;;  %3780 = vmatpush.msrb.mxu1 %v3039_v29  ;;  %v3236_v29 = vpop.f32.mrf.mxu1 }
 0x7ad   : > { %v3167_v46 = vld [vmem:[#allocation26 + $0xfd8] sm:$0xff]  ;;  %3801 = vmatpush.msrb.mxu2 %v3099_v56  ;;  %3755 = vmatmul.f32.vlgmr.msra.gmra.mxu3 %v5068_v41  ;;  %v3216_v56 = vpop.f32.mrf.mxu0 }
 0x7ae   : > { %v2967_v21 = vld [vmem:[#allocation26 + $0x998] sm:$0xff]  ;;  %3820 = vmatpush.msrb.mxu3 %v3167_v46  ;;  %3735 = vmatmul.f32.vlgmr.msra.gmra.mxu2 %v5066_v55  ;;  %v3256_v46 = vpop.f32.mrf.mxu2 }
 0x7af   : > { %v3035_v13 = vld [vmem:[#allocation26 + $0xbb8] sm:$0xff]  ;;  %3762 = vmatpush.msrb.mxu0 %v2967_v21  ;;  %3715 = vmatmul.f32.vlgmr.msra.gmra.mxu1 %v6576_v48  ;;  %v3276_v21 = vpop.f32.mrf.mxu3 }
 0x7b0   : > { %v3095_v58 = vld [vmem:[#allocation26 + $0xd98] sm:$0xff]  ;;  %3781 = vmatpush.msrb.mxu1 %v3035_v13 }
 0x7b1   : > { %v3163_v9 = vld [vmem:[#allocation26 + $0xfb8] sm:$0xff]  ;;  %3802 = vmatpush.msrb.mxu2 %v3095_v58 }
 0x7b2   : > { %v2963_v60 = vld [vmem:[#allocation26 + $0x978] sm:$0xff]  ;;  %3821 = vmatpush.msrb.mxu3 %v3163_v9 }
 0x7b3   : > { %v3031_v40 = vld [vmem:[#allocation26 + $0xb98] sm:$0xff]  ;;  %3763 = vmatpush.msrb.mxu0 %v2963_v60 }
 0x7b4   : > { %v3091_v59 = vld [vmem:[#allocation26 + $0xd78] sm:$0xff]  ;;  %3782 = vmatpush.msrb.mxu1 %v3031_v40  ;;  %v3316_v13 = vpop.f32.mrf.mxu1 }
 0x7b5   : > { %v3159_v61 = vld [vmem:[#allocation26 + $0xf98] sm:$0xff]  ;;  %3803 = vmatpush.msrb.mxu2 %v3091_v59  ;;  %v3296_v58 = vpop.f32.mrf.mxu0 }
 0x7b6   : > { %v2959_v62 = vld [vmem:[#allocation26 + $0x958] sm:$0xff]  ;;  %3822 = vmatpush.msrb.mxu3 %v3159_v61  ;;  %v3336_v9 = vpop.f32.mrf.mxu2 }
 0x7b7   : > { %v3027_v24 = vld [vmem:[#allocation26 + $0xb78] sm:$0xff]  ;;  %3764 = vmatpush.msrb.mxu0 %v2959_v62  ;;  %v3356_v60 = vpop.f32.mrf.mxu3 }
 0x7b8   : > { %v3087_v0 = vld [vmem:[#allocation26 + $0xd58] sm:$0xff]  ;;  %3783 = vmatpush.msrb.mxu1 %v3027_v24 }
 0x7b9   : > { %v3155_v19 = vld [vmem:[#allocation26 + $0xf78] sm:$0xff]  ;;  %3804 = vmatpush.msrb.mxu2 %v3087_v0 }
 0x7ba   : > { %v2955_v34 = vld [vmem:[#allocation26 + $0x938] sm:$0xff]  ;;  %3823 = vmatpush.msrb.mxu3 %v3155_v19 }
 0x7bb   : > { %v3023_v35 = vld [vmem:[#allocation26 + $0xb58] sm:$0xff]  ;;  %3765 = vmatpush.msrb.mxu0 %v2955_v34 }
 0x7bc   : > { %v3083_v25 = vld [vmem:[#allocation26 + $0xd38] sm:$0xff]  ;;  %3784 = vmatpush.msrb.mxu1 %v3023_v35  ;;  %v3396_v40 = vpop.f32.mrf.mxu1 }
 0x7bd   : > { %v3151_v2 = vld [vmem:[#allocation26 + $0xf58] sm:$0xff]  ;;  %3805 = vmatpush.msrb.mxu2 %v3083_v25  ;;  %v3376_v59 = vpop.f32.mrf.mxu0 }
 0x7be   : > { %v2951_v32 = vld [vmem:[#allocation26 + $0x918] sm:$0xff]  ;;  %3824 = vmatpush.msrb.mxu3 %v3151_v2  ;;  %v3416_v61 = vpop.f32.mrf.mxu2  ;;  %v3237_v2 = vadd.f32 %v3236_v29, %v3216_v56 }
 0x7bf   : > { %v3019_v26 = vld [vmem:[#allocation26 + $0xb38] sm:$0xff]  ;;  %3766 = vmatpush.msrb.mxu0 %v2951_v32 }
 0x7c0   : > { %v3079_v50 = vld [vmem:[#allocation26 + $0xd18] sm:$0xff]  ;;  %3785 = vmatpush.msrb.mxu1 %v3019_v26 }
 0x7c1   : > { %v3147_v23 = vld [vmem:[#allocation26 + $0xf38] sm:$0xff]  ;;  %3806 = vmatpush.msrb.mxu2 %v3079_v50 }
 0x7c2   : > { %v2947_v22 = vld [vmem:[#allocation26 + $0x8f8] sm:$0xff]  ;;  %3825 = vmatpush.msrb.mxu3 %v3147_v23  ;;  %v3257_v23 = vadd.f32 %v3256_v46, %v3237_v2 }
 0x7c3   : > { %v3015_v20 = vld [vmem:[#allocation26 + $0xb18] sm:$0xff]  ;;  %3767 = vmatpush.msrb.mxu0 %v2947_v22 }
 0x7c4   : > { %v3075_v14 = vld [vmem:[#allocation26 + $0xcf8] sm:$0xff]  ;;  %3786 = vmatpush.msrb.mxu1 %v3015_v20  ;;  %v3476_v62 = vpop.f32.mrf.mxu1 }
 0x7c5   : > { %v3143_v27 = vld [vmem:[#allocation26 + $0xf18] sm:$0xff]  ;;  %3807 = vmatpush.msrb.mxu2 %v3075_v14 }
 0x7c6   : > { %v2943_v15 = vld [vmem:[#allocation26 + $0x8d8] sm:$0xff]  ;;  %3826 = vmatpush.msrb.mxu3 %v3143_v27  ;;  %v3496_v24 = vpop.f32.mrf.mxu2  ;;  %v3277_v27 = vadd.f32 %v3276_v21, %v3257_v23  ;;  %v4110_v23 = vld [vmem:[#allocation31 + $0x2c0] sm:$0xff] }
 0x7c7   : > { %v3011_v49 = vld [vmem:[#allocation26 + $0xaf8] sm:$0xff]  ;;  %3768 = vmatpush.msrb.mxu0 %v2943_v15 }
 0x7c8   : > { %v3071_v18 = vld [vmem:[#allocation26 + $0xcd8] sm:$0xff]  ;;  %3787 = vmatpush.msrb.mxu1 %v3011_v49 }
 0x7c9   : > { %v3139_v7 = vld [vmem:[#allocation26 + $0xef8] sm:$0xff]  ;;  %3808 = vmatpush.msrb.mxu2 %v3071_v18 }
 0x7ca   : > { %v2939_v33 = vld [vmem:[#allocation26 + $0x8b8] sm:$0xff]  ;;  %3827 = vmatpush.msrb.mxu3 %v3139_v7  ;;  %v3297_v7 = vadd.f32 %v3296_v58, %v3277_v27  ;;  %v4142_v27 = vld [vmem:[#allocation31 + $0x3c0] sm:$0xff] }
 0x7cb   : > { %v3007_v5 = vld [vmem:[#allocation26 + $0xad8] sm:$0xff]  ;;  %3769 = vmatpush.msrb.mxu0 %v2939_v33 }
 0x7cc   : > { %v3067_v10 = vld [vmem:[#allocation26 + $0xcb8] sm:$0xff]  ;;  %3788 = vmatpush.msrb.mxu1 %v3007_v5 }
 0x7cd   : > { %v3135_v42 = vld [vmem:[#allocation26 + $0xed8] sm:$0xff]  ;;  %3809 = vmatpush.msrb.mxu2 %v3067_v10 }
 0x7ce   : > { %v2935_v53 = vld [vmem:[#allocation26 + $0x898] sm:$0xff]  ;;  %3828 = vmatpush.msrb.mxu3 %v3135_v42  ;;  %v3317_v42 = vadd.f32 %v3316_v13, %v3297_v7 }
 0x7cf   : > { %v3003_v51 = vld [vmem:[#allocation26 + $0xab8] sm:$0xff]  ;;  %3770 = vmatpush.msrb.mxu0 %v2935_v53 }
 0x7d0   : > { %v3063_v28 = vld [vmem:[#allocation26 + $0xc98] sm:$0xff]  ;;  %3789 = vmatpush.msrb.mxu1 %v3003_v51 }
 0x7d1   : > { %v3131_v54 = vld [vmem:[#allocation26 + $0xeb8] sm:$0xff]  ;;  %3810 = vmatpush.msrb.mxu2 %v3063_v28 }
 0x7d2   : > { %v2931_v57 = vld [vmem:[#allocation26 + $0x878] sm:$0xff]  ;;  %3829 = vmatpush.msrb.mxu3 %v3131_v54  ;;  %v3337_v54 = vadd.f32 %v3336_v9, %v3317_v42 }
 0x7d3   : > { %v2999_v47 = vld [vmem:[#allocation26 + $0xa98] sm:$0xff]  ;;  %3771 = vmatpush.msrb.mxu0 %v2931_v57 }
 0x7d4   : > { %v3059_v8 = vld [vmem:[#allocation26 + $0xc78] sm:$0xff]  ;;  %3790 = vmatpush.msrb.mxu1 %v2999_v47 }
 0x7d5   : > { %v5067_v11 = vld.sshfl [vmem:[#allocation1] sm:$0xff pattern:$0x75316420]  ;;  %3811 = vmatpush.msrb.mxu2 %v3059_v8  ;;  %v6604_v8 = vadd.f32 %v3356_v60, %v3337_v54 }
 0x7d6   : > { %3695 = vmatmul.f32.vlgmr.msra.gmra.mxu0 %v5067_v11  ;;  %v3127_v63 = vld [vmem:[#allocation26 + $0xe98] sm:$0xff] }
 0x7d7   : > { %v2927_v43 = vld [vmem:[#allocation26 + $0x858] sm:$0xff]  ;;  %3830 = vmatpush.msrb.mxu3 %v3127_v63 }
 0x7d8   : > { %v2995_v30 = vld [vmem:[#allocation26 + $0xa78] sm:$0xff]  ;;  %3772 = vmatpush.msrb.mxu0 %v2927_v43 }
 0x7d9   : > { %v3055_v45 = vld [vmem:[#allocation26 + $0xc58] sm:$0xff]  ;;  %3791 = vmatpush.msrb.mxu1 %v2995_v30  ;;  %v3839_v30 = vsel %vm2602_vm15, %v6604_v8, 0.0 }
 0x7da   : > { %v3123_v3 = vld [vmem:[#allocation26 + $0xe78] sm:$0xff]  ;;  %3812 = vmatpush.msrb.mxu2 %v3055_v45  ;;  %v3871_v45 = vmul.f32 %v6604_v8, %v6604_v8 }
 0x7db   : > { %v2923_v6 = vld [vmem:[#allocation26 + $0x838] sm:$0xff]  ;;  %3831 = vmatpush.msrb.mxu3 %v3123_v3 }
 0x7dc   : > { %v2991_v16 = vld [vmem:[#allocation26 + $0xa58] sm:$0xff]  ;;  %3773 = vmatpush.msrb.mxu0 %v2923_v6 }
 0x7dd   : > { %v3051_v17 = vld [vmem:[#allocation26 + $0xc38] sm:$0xff]  ;;  %3792 = vmatpush.msrb.mxu1 %v2991_v16 }
 0x7de   : > { %v3119_v4 = vld [vmem:[#allocation26 + $0xe58] sm:$0xff]  ;;  %3813 = vmatpush.msrb.mxu2 %v3051_v17 }
 0x7df   : > { %v2919_v12 = vld [vmem:[#allocation26 + $0x818] sm:$0xff]  ;;  %3832 = vmatpush.msrb.mxu3 %v3119_v4  ;;  %v3840_v4 = vrot.slane %v3839_v30, 4 }
 0x7e0   : > { %v2987_v1 = vld [vmem:[#allocation26 + $0xa38] sm:$0xff]  ;;  %3774 = vmatpush.msrb.mxu0 %v2919_v12  ;;  %v3875_v12 = vsel %vm2602_vm15, %v3871_v45, 0.0 }
 0x7e1   : > { %v3047_v52 = vld [vmem:[#allocation26 + $0xc18] sm:$0xff]  ;;  %3793 = vmatpush.msrb.mxu1 %v2987_v1  ;;  %3775 = vmatmul.f32.vlgmr.msrb.gmra.mxu0 %v6582_v36  ;;  %v3436_v36 = vpop.f32.mrf.mxu3  ;;  %v3876_v29 = vrot.slane %v3875_v12, 4 }
 0x7e2   : > { %v3115_v37 = vld [vmem:[#allocation26 + $0xe38] sm:$0xff]  ;;  %3814 = vmatpush.msrb.mxu2 %v3047_v52 }
 0x7e3   : > { %v2983_v38 = vld [vmem:[#allocation26 + $0xa18] sm:$0xff]  ;;  %3833 = vmatpush.msrb.mxu3 %v3115_v37  ;;  %3815 = vmatmul.f32.vlgmr.msrb.gmra.mxu2 %v6579_v39  ;;  %v3456_v39 = vpop.f32.mrf.mxu0 }
 0x7e4   : > { %v3111_v48 = vld [vmem:[#allocation26 + $0xe18] sm:$0xff]  ;;  %3794 = vmatpush.msrb.mxu1 %v2983_v38 }
 0x7e5   : > { %3834 = vmatpush.msrb.mxu3 %v3111_v48  ;;  %3795 = vmatmul.f32.vlgmr.msrb.gmra.mxu1 %v6588_v31  ;;  %v3397_v31 = vadd.f32 %v3396_v40, %v3376_v59  ;;  %v3841_v48 = vadd.f32 %v3840_v4, %v3839_v30  ;;  %v4052_v21 = vld [vmem:[#allocation31 + $0xf0] sm:$0xff]  ;;  %v4050_v59 = vld [vmem:[#allocation31 + $0xe0] sm:$0xff] }
 0x7e6   : > { %3835 = vmatmul.f32.vlgmr.msrb.gmra.mxu3 %v6585_v44  ;;  %v4084_v13 = vld [vmem:[#allocation31 + $0x1f0] sm:$0xff]  ;;  %4150 = vmatpush.msra.mxu0 %v4052_v21  ;;  %v4138_v30 = vld [vmem:[#allocation31 + $0x3a0] sm:$0xff] }
 0x7e7   : > { %v3417_v25 = vadd.f32 %v3416_v61, %v3397_v31  ;;  %v4116_v58 = vld [vmem:[#allocation31 + $0x2f0] sm:$0xff]  ;;  %4170 = vmatpush.msra.mxu1 %v4084_v13  ;;  %v4082_v61 = vld [vmem:[#allocation31 + $0x1e0] sm:$0xff] }
 0x7e8   : > { %v4148_v9 = vld [vmem:[#allocation31 + $0x3f0] sm:$0xff]  ;;  %4190 = vmatpush.msra.mxu2 %v4116_v58  ;;  %4151 = vmatpush.msra.mxu0 %v4050_v59  ;;  %v4134_v13 = vld [vmem:[#allocation31 + $0x380] sm:$0xff] }
 0x7e9   : > { %v3516_v0 = vpop.f32.mrf.mxu3  ;;  %v3437_v50 = vadd.f32 %v3436_v36, %v3417_v25  ;;  %4210 = vmatpush.msra.mxu3 %v4148_v9  ;;  %v4114_v36 = vld [vmem:[#allocation31 + $0x2e0] sm:$0xff]  ;;  %4171 = vmatpush.msra.mxu1 %v4082_v61  ;;  %v4144_v25 = vld [vmem:[#allocation31 + $0x3d0] sm:$0xff] }
 0x7ea   : > { %4191 = vmatpush.msra.mxu2 %v4114_v36  ;;  %v4140_v42 = vld [vmem:[#allocation31 + $0x3b0] sm:$0xff] }
 0x7eb   : > { %v3457_v14 = vadd.f32 %v3456_v39, %v3437_v50  ;;  %v3877_v39 = vadd.f32 %v3876_v29, %v3875_v12  ;;  %v4078_v50 = vld [vmem:[#allocation31 + $0x1c0] sm:$0xff]  ;;  %v4104_v4 = vld [vmem:[#allocation31 + $0x290] sm:$0xff] }
 0x7ec   : > { %v4136_v12 = vld [vmem:[#allocation31 + $0x390] sm:$0xff]  ;;  %v4102_v29 = vld [vmem:[#allocation31 + $0x280] sm:$0xff] }
 0x7ed   : > { %v3477_v18 = vadd.f32 %v3476_v62, %v3457_v14  ;;  %v3842_v62 = vrot.slane %v3841_v48, 2  ;;  %v4068_v59 = vld [vmem:[#allocation31 + $0x170] sm:$0xff] }
 0x7ee   : > { %v4100_v61 = vld [vmem:[#allocation31 + $0x270] sm:$0xff] }
 0x7ef   : > { %v3497_v10 = vadd.f32 %v3496_v24, %v3477_v18  ;;  %v4146_v24 = vld [vmem:[#allocation31 + $0x3e0] sm:$0xff]  ;;  %v4132_v36 = vld [vmem:[#allocation31 + $0x370] sm:$0xff] }
 0x7f0   : > { %4211 = vmatpush.msra.mxu3 %v4146_v24  ;;  %v4034_v24 = vld [vmem:[#allocation31 + $0x60] sm:$0xff] }
 0x7f1   : > { %v6596_v28 = vadd.f32 %v3516_v0, %v3497_v10  ;;  %v4108_v10 = vld [vmem:[#allocation31 + $0x2b0] sm:$0xff] }
 0x7f2   : > { %4212 = vmatpush.msra.mxu3 %v4144_v25 }
 0x7f3   : > { %v3846_v57 = vsel %vm2602_vm15, %v6596_v28, 0.0  ;;  %v3872_v47 = vmul.f32 %v6596_v28, %v6596_v28 }
 0x7f4   : > { %v3847_v41 = vrot.slane %v3846_v57, 4  ;;  %4213 = vmatpush.msra.mxu3 %v4142_v27 }
 0x7f5   : > { %v3882_v43 = vsel %vm2602_vm15, %v3872_v47, 0.0  ;;  %v4074_v47 = vld [vmem:[#allocation31 + $0x1a0] sm:$0xff] }
 0x7f6   : > { %v3536_v34 = vpop.f32.mrf.mxu0  ;;  %v3848_v16 = vadd.f32 %v3847_v41, %v3846_v57  ;;  %v3883_v17 = vrot.slane %v3882_v43, 4  ;;  %4214 = vmatpush.msra.mxu3 %v4140_v42  ;;  %v4042_v57 = vld [vmem:[#allocation31 + $0xa0] sm:$0xff] }
 0x7f7   : > { %v3556_v19 = vpop.f32.mrf.mxu1 }
 0x7f8   : > { %v3557_v44 = vadd.f32 %v3556_v19, %v3536_v34  ;;  %v3849_v37 = vrot.slane %v3848_v16, 2  ;;  %v3884_v38 = vadd.f32 %v3883_v17, %v3882_v43  ;;  %v4048_v34 = vld [vmem:[#allocation31 + $0xd0] sm:$0xff]  ;;  %v4106_v43 = vld [vmem:[#allocation31 + $0x2a0] sm:$0xff]  ;;  %4215 = vmatpush.msra.mxu3 %v4138_v30 }
 0x7f9   : > { %4152 = vmatpush.msra.mxu0 %v4048_v34  ;;  %v4072_v17 = vld [vmem:[#allocation31 + $0x190] sm:$0xff]  ;;  %v4058_v30 = vld [vmem:[#allocation31 + $0x120] sm:$0xff] }
 0x7fa   : > { %v3576_v35 = vpop.f32.mrf.mxu2  ;;  %v3850_v60 = vadd.f32 %v3849_v37, %v3848_v16  ;;  %v3885_v40 = vrot.slane %v3884_v38, 2  ;;  %v4040_v16 = vld [vmem:[#allocation31 + $0x90] sm:$0xff]  ;;  %4216 = vmatpush.msra.mxu3 %v4136_v12 }
 0x7fb   : > { %v3577_v32 = vadd.f32 %v3576_v35, %v3557_v44  ;;  %v4080_v44 = vld [vmem:[#allocation31 + $0x1d0] sm:$0xff] }
 0x7fc   : > { %v4112_v35 = vld [vmem:[#allocation31 + $0x2d0] sm:$0xff]  ;;  %4172 = vmatpush.msra.mxu1 %v4080_v44  ;;  %v3851_v2 = vrot.slane %v3850_v60, 1  ;;  %4217 = vmatpush.msra.mxu3 %v4134_v13  ;;  %v4086_v13 = vld [vmem:[#allocation31 + $0x200] sm:$0xff] }
 0x7fd   : > { %4192 = vmatpush.msra.mxu2 %v4112_v35  ;;  %v4130_v35 = vld [vmem:[#allocation31 + $0x360] sm:$0xff] }
 0x7fe   : > { %v3596_v26 = vpop.f32.mrf.mxu3  ;;  %4173 = vmatpush.msra.mxu1 %v4078_v50  ;;  %4218 = vmatpush.msra.mxu3 %v4132_v36  ;;  %v4064_v50 = vld [vmem:[#allocation31 + $0x150] sm:$0xff] }
 0x7ff   : > { %v3597_v22 = vadd.f32 %v3596_v26, %v3577_v32  ;;  %v3886_v32 = vadd.f32 %v3885_v40, %v3884_v38  ;;  %v4046_v26 = vld [vmem:[#allocation31 + $0xc0] sm:$0xff]  ;;  %4193 = vmatpush.msra.mxu2 %v4110_v23  ;;  %v4036_v40 = vld [vmem:[#allocation31 + $0x70] sm:$0xff] }
 0x800   : > { %4153 = vmatpush.msra.mxu0 %v4046_v26  ;;  %v4038_v38 = vld [vmem:[#allocation31 + $0x80] sm:$0xff]  ;;  %4219 = vmatpush.msra.mxu3 %v4130_v35  ;;  %v4032_v26 = vld [vmem:[#allocation31 + $0x50] sm:$0xff]  ;;  %v4147_v35 = vld [vmem:[#allocation31 + $0x3e8] sm:$0xff] }
 0x801   : > { %4194 = vmatpush.msra.mxu2 %v4108_v10  ;;  %v4096_v23 = vld [vmem:[#allocation31 + $0x250] sm:$0xff]  ;;  %v4126_v10 = vld [vmem:[#allocation31 + $0x340] sm:$0xff] }
 0x803   : > { %4195 = vmatpush.msra.mxu2 %v4106_v43  ;;  %v4026_v43 = vld [vmem:[#allocation31 + $0x20] sm:$0xff] }
 0x805   : > { %4196 = vmatpush.msra.mxu2 %v4104_v4 }
 0x806   : > { %v3616_v20 = vpop.f32.mrf.mxu0 }
 0x807   : > { %v3617_v15 = vadd.f32 %v3616_v20, %v3597_v22  ;;  %v3843_v22 = vadd.f32 %v3842_v62, %v3841_v48  ;;  %v3878_v20 = vrot.slane %v3877_v39, 2  ;;  %v4070_v48 = vld [vmem:[#allocation31 + $0x180] sm:$0xff]  ;;  %4197 = vmatpush.msra.mxu2 %v4102_v29 }
 0x808   : > { %v3636_v49 = vpop.f32.mrf.mxu1 }
 0x809   : > { %v3637_v33 = vadd.f32 %v3636_v49, %v3617_v15  ;;  %v3656_v5 = vpop.f32.mrf.mxu2  ;;  %4198 = vmatpush.msra.mxu2 %v4100_v61 }
 0x80b   : > { %v3657_v53 = vadd.f32 %v3656_v5, %v3637_v33  ;;  %v4044_v33 = vld [vmem:[#allocation31 + $0xb0] sm:$0xff] }
 0x80c   : > { %v3676_v51 = vpop.f32.mrf.mxu3  ;;  %v4076_v5 = vld [vmem:[#allocation31 + $0x1b0] sm:$0xff]  ;;  %4154 = vmatpush.msra.mxu0 %v4044_v33 }
 0x80d   : > { %v6598_v55 = vadd.f32 %v3676_v51, %v3657_v53  ;;  %4174 = vmatpush.msra.mxu1 %v4076_v5  ;;  %v3852_v53 = vadd.f32 %v3851_v2, %v3850_v60  ;;  %v3887_v51 = vrot.slane %v3886_v32, 1 }
 0x80e   : > { %4155 = vmatpush.msra.mxu0 %v4042_v57 }
 0x80f   : > { %v3853_v11 = vsel %vm2602_vm15, %v6598_v55, 0.0  ;;  %v3873_v63 = vmul.f32 %v6598_v55, %v6598_v55  ;;  %4175 = vmatpush.msra.mxu1 %v4074_v47 }
 0x810   : > { %v3854_v3 = vrot.slane %v3853_v11, 4  ;;  %4156 = vmatpush.msra.mxu0 %v4040_v16  ;;  %v4122_v16 = vld [vmem:[#allocation31 + $0x320] sm:$0xff] }
 0x811   : > { %v3889_v6 = vsel %vm2602_vm15, %v3873_v63, 0.0  ;;  %v3879_v63 = vadd.f32 %v3878_v20, %v3877_v39  ;;  %4176 = vmatpush.msra.mxu1 %v4072_v17  ;;  %v4128_v20 = vld [vmem:[#allocation31 + $0x350] sm:$0xff] }
 0x812   : > { %v3855_v1 = vadd.f32 %v3854_v3, %v3853_v11  ;;  %v3890_v52 = vrot.slane %v3889_v6, 4  ;;  %v3844_v11 = vrot.slane %v3843_v22, 1  ;;  %4157 = vmatpush.msra.mxu0 %v4038_v38  ;;  %4220 = vmatpush.msra.mxu3 %v4128_v20  ;;  %v4088_v38 = vld [vmem:[#allocation31 + $0x210] sm:$0xff]  ;;  %v4047_v20 = vld [vmem:[#allocation31 + $0xc8] sm:$0xff] }
 0x813   : > { %4177 = vmatpush.msra.mxu1 %v4070_v48  ;;  %v4120_v48 = vld [vmem:[#allocation31 + $0x310] sm:$0xff] }
 0x814   : > { %v3856_v56 = vrot.slane %v3855_v1, 2  ;;  %v3891_v46 = vadd.f32 %v3890_v52, %v3889_v6  ;;  %v3888_v52 = vadd.f32 %v3887_v51, %v3886_v32  ;;  %4158 = vmatpush.msra.mxu0 %v4036_v40  ;;  %4221 = vmatpush.msra.mxu3 %v4126_v10  ;;  %v4060_v51 = vld [vmem:[#allocation31 + $0x130] sm:$0xff]  ;;  %v4053_v40 = vld [vmem:[#allocation31 + $0xf8] sm:$0xff] }
 0x815   : > { %4178 = vmatpush.msra.mxu1 %v4068_v59  ;;  %v4085_v59 = vld [vmem:[#allocation31 + $0x1f8] sm:$0xff] }
 0x816   : > { %v3857_v0 = vadd.f32 %v3856_v56, %v3855_v1  ;;  %v3892_v19 = vrot.slane %v3891_v46, 2  ;;  %v6617_v1 = vmul.f32 0.25, %v3852_v53  ;;  %v3845_v56 = vadd.f32 %v3844_v11, %v3843_v22  ;;  %4159 = vmatpush.msra.mxu0 %v4034_v24  ;;  %v4028_v53 = vld [vmem:[#allocation31 + $0x30] sm:$0xff]  ;;  %v4051_v24 = vld [vmem:[#allocation31 + $0xe8] sm:$0xff]  ;;  %v4045_v10 = vld [vmem:[#allocation31 + $0xb8] sm:$0xff] }
 0x817   : > { %v3904_v62 = vmul.f32 0.25, %v3888_v52  ;;  %v4124_v11 = vld [vmem:[#allocation31 + $0x330] sm:$0xff] }
 0x818   : > { %v3858_v15 = vrot.slane %v3857_v0, 1  ;;  %v3893_v49 = vadd.f32 %v3892_v19, %v3891_v46  ;;  %v3880_v46 = vrot.slane %v3879_v63, 1  ;;  %v3908_v39 = vmul.f32 %v6617_v1, %v6617_v1  ;;  %v4098_v19 = vld [vmem:[#allocation31 + $0x260] sm:$0xff]  ;;  %4160 = vmatpush.msra.mxu0 %v4032_v26  ;;  %4222 = vmatpush.msra.mxu3 %v4124_v11  ;;  %v4024_v52 = vld [vmem:[#allocation31 + $0x10] sm:$0xff] }
 0x819   : > { %4199 = vmatpush.msra.mxu2 %v4098_v19  ;;  %v4115_v19 = vld [vmem:[#allocation31 + $0x2e8] sm:$0xff] }
 0x81a   : > { %v3859_v45 = vadd.f32 %v3858_v15, %v3857_v0  ;;  %v3894_v3 = vrot.slane %v3893_v49, 1  ;;  %v4066_v0 = vld [vmem:[#allocation31 + $0x160] sm:$0xff]  ;;  %v3881_v34 = vadd.f32 %v3880_v46, %v3879_v63  ;;  %4223 = vmatpush.msra.mxu3 %v4122_v16  ;;  %v4041_v16 = vld [vmem:[#allocation31 + $0x98] sm:$0xff] }
 0x81b   : > { %4179 = vmatpush.msra.mxu1 %v4066_v0  ;;  %4200 = vmatpush.msra.mxu2 %v4096_v23  ;;  %v4030_v15 = vld [vmem:[#allocation31 + $0x40] sm:$0xff]  ;;  %v4083_v0 = vld [vmem:[#allocation31 + $0x1e8] sm:$0xff] }
 0x81c   : > { %v6619_v58 = vmul.f32 0.25, %v3859_v45  ;;  %v3895_v9 = vadd.f32 %v3894_v3, %v3893_v49  ;;  %v4062_v49 = vld [vmem:[#allocation31 + $0x140] sm:$0xff]  ;;  %4161 = vmatpush.msra.mxu0 %v4030_v15  ;;  %4224 = vmatpush.msra.mxu3 %v4120_v48 }
 0x81d   : > { %4180 = vmatpush.msra.mxu1 %v4064_v50  ;;  %v4090_v45 = vld [vmem:[#allocation31 + $0x220] sm:$0xff] }
 0x81e   : > { %v3905_v25 = vmul.f32 0.25, %v3895_v9  ;;  %v3909_v2 = vmul.f32 %v6619_v58, %v6619_v58  ;;  %4162 = vmatpush.msra.mxu0 %v4028_v53  ;;  %v4022_v46 = vld [vmem:[#allocation31] sm:$0xff]  ;;  %v4109_v53 = vld [vmem:[#allocation31 + $0x2b8] sm:$0xff] }
 0x81f   : > { %4181 = vmatpush.msra.mxu1 %v4062_v49 }
 0x820   : > { %v3913_v42 = vsub.f32 %v3905_v25, %v3909_v2  ;;  %4163 = vmatpush.msra.mxu0 %v4026_v43  ;;  %v4049_v25 = vld [vmem:[#allocation31 + $0xd8] sm:$0xff]  ;;  %v4075_v43 = vld [vmem:[#allocation31 + $0x1a8] sm:$0xff] }
 0x821   : > { %4182 = vmatpush.msra.mxu1 %v4060_v51  ;;  %v4081_v2 = vld [vmem:[#allocation31 + $0x1d8] sm:$0xff] }
 0x822   : > { %v6638_v17 = vadd.f32 1e-05, %v3913_v42  ;;  %4164 = vmatpush.msra.mxu0 %v4024_v52  ;;  %v4077_v42 = vld [vmem:[#allocation31 + $0x1b8] sm:$0xff] }
 0x823   : > { %4183 = vmatpush.msra.mxu1 %v4058_v30  ;;  %v4107_v30 = vld [vmem:[#allocation31 + $0x2a8] sm:$0xff] }
 0x824   : > { %4165 = vmatpush.msra.mxu0 %v4022_v46  ;;  %v4103_v46 = vld [vmem:[#allocation31 + $0x288] sm:$0xff]  ;;  %vm3946_vm4 = vweird.f32 %v6638_v17 }
 0x826   : > { %4230 = vmatpush.msrb.mxu0 %v4053_v40  ;;  %v4069_v40 = vld [vmem:[#allocation31 + $0x178] sm:$0xff] }
 0x828   : > { %4231 = vmatpush.msrb.mxu0 %v4051_v24  ;;  %v4067_v24 = vld [vmem:[#allocation31 + $0x168] sm:$0xff] }
 0x82a   : > { %4232 = vmatpush.msrb.mxu0 %v4049_v25  ;;  %v4097_v25 = vld [vmem:[#allocation31 + $0x258] sm:$0xff] }
 0x82c   : > { %v3716_v14 = vpop.f32.mrf.mxu1  ;;  %4233 = vmatpush.msrb.mxu0 %v4047_v20 }
 0x82e   : > { %4234 = vmatpush.msrb.mxu0 %v4045_v10  ;;  %v4029_v10 = vld [vmem:[#allocation31 + $0x38] sm:$0xff] }
 0x830   : > { %v3756_v41 = vpop.f32.mrf.mxu3 }
 0x831   : > { %v3736_v7 = vpop.f32.mrf.mxu2 }
 0x853   : > { %v3696_v31 = vpop.f32.mrf.mxu0 }
 0x854   : > { %v3717_v18 = vadd.f32 %v3716_v14, %v3696_v31  ;;  %v6623_v31 = vmul.f32 0.25, %v3845_v56  ;;  %v3912_v14 = vsub.f32 %v3904_v62, %v3908_v39  ;;  %v4117_v62 = vld [vmem:[#allocation31 + $0x2f8] sm:$0xff] }
 0x855   : > { %v4149_v39 = vld [vmem:[#allocation31 + $0x3f8] sm:$0xff] }
 0x856   : > { %v3737_v54 = vadd.f32 %v3736_v7, %v3717_v18  ;;  %v4094_v18 = vld [vmem:[#allocation31 + $0x240] sm:$0xff]  ;;  %v3903_v7 = vmul.f32 0.25, %v3881_v34  ;;  %v3907_v33 = vmul.f32 %v6623_v31, %v6623_v31  ;;  %v6635_v63 = vadd.f32 1e-05, %v3912_v14  ;;  %v4079_v14 = vld [vmem:[#allocation31 + $0x1c8] sm:$0xff] }
 0x857   : > { %4201 = vmatpush.msra.mxu2 %v4094_v18 }
 0x858   : > { %v3757_v6 = vadd.f32 %v3756_v41, %v3737_v54  ;;  %v4092_v54 = vld [vmem:[#allocation31 + $0x230] sm:$0xff]  ;;  %v3911_v3 = vsub.f32 %v3903_v7, %v3907_v33  ;;  %5049 = vrsqrt.f32 %v6635_v63  ;;  %v4143_v7 = vld [vmem:[#allocation31 + $0x3c8] sm:$0xff]  ;;  %vm3936_vm1 = vweird.f32 %v6635_v63 }
 0x859   : > { %4202 = vmatpush.msra.mxu2 %v4092_v54  ;;  %5051 = vrsqrt.f32 %v6638_v17 }
 0x85a   : > { %v6641_v9 = vadd.f32 1e-05, %v3911_v3  ;;  %v4139_v3 = vld [vmem:[#allocation31 + $0x3a8] sm:$0xff] }
 0x85b   : > { %4203 = vmatpush.msra.mxu2 %v4090_v45 }
 0x85c   : > { %5053 = vrsqrt.f32 %v6641_v9  ;;  %vm3926_vm10 = vweird.f32 %v6641_v9 }
 0x85d   : > { %4204 = vmatpush.msra.mxu2 %v4088_v38  ;;  %v4137_v38 = vld [vmem:[#allocation31 + $0x398] sm:$0xff] }
 0x85e   : > { %v3776_v37 = vpop.f32.mrf.mxu0  ;;  %v6645_v26 = vpop.eup %5049 }
 0x85f   : > { %v3777_v21 = vadd.f32 %v3776_v37, %v3757_v6  ;;  %v4056_v37 = vld [vmem:[#allocation31 + $0x110] sm:$0xff]  ;;  %4205 = vmatpush.msra.mxu2 %v4086_v13  ;;  %v6647_v15 = vpop.eup %5051  ;;  %v3931_v33 = vmul.f32 %v6645_v26, %v6635_v63  ;;  %vm3937_vm0 = vweird.f32 %v6645_v26 }
 0x860   : > { %4184 = vmatpush.msra.mxu1 %v4056_v37  ;;  %v3941_v11 = vmul.f32 %v6647_v15, %v6638_v17  ;;  %vm3947_vm2 = vweird.f32 %v6647_v15  ;;  %vm6679_vm3 = vmor %vm3936_vm1, %vm3937_vm0 }
 0x861   : > { %4270 = vmatpush.msrb.mxu2 %v4117_v62  ;;  %vm6691_vm7 = vmor %vm3946_vm4, %vm3947_vm2 }
 0x862   : > { %v3796_v60 = vpop.f32.mrf.mxu1  ;;  %v3942_v48 = vmul.f32 %v6647_v15, %v3941_v11  ;;  %v4059_v11 = vld [vmem:[#allocation31 + $0x128] sm:$0xff] }
 0x863   : > { %v3797_v44 = vadd.f32 %v3796_v60, %v3777_v21  ;;  %v4054_v21 = vld [vmem:[#allocation31 + $0x100] sm:$0xff]  ;;  %4271 = vmatpush.msrb.mxu2 %v4115_v19  ;;  %v4131_v19 = vld [vmem:[#allocation31 + $0x368] sm:$0xff] }
 0x864   : > { %4185 = vmatpush.msra.mxu1 %v4054_v21  ;;  %v4118_v60 = vld [vmem:[#allocation31 + $0x300] sm:$0xff]  ;;  %v4135_v21 = vld [vmem:[#allocation31 + $0x388] sm:$0xff]  ;;  %v3943_v62 = vmul.f32 0.5, %v3942_v48 }
 0x865   : > { %4225 = vmatpush.msra.mxu3 %v4118_v60  ;;  %v4037_v60 = vld [vmem:[#allocation31 + $0x78] sm:$0xff]  ;;  %v4055_v48 = vld [vmem:[#allocation31 + $0x108] sm:$0xff] }
 0x866   : > { %v3816_v32 = vpop.f32.mrf.mxu2  ;;  %4250 = vmatpush.msrb.mxu1 %v4085_v59  ;;  %v4101_v59 = vld [vmem:[#allocation31 + $0x278] sm:$0xff]  ;;  %v3944_v20 = vsub.f32 1.5, %v3943_v62 }
 0x867   : > { %v3817_v22 = vadd.f32 %v3816_v32, %v3797_v44  ;;  %4290 = vmatpush.msrb.mxu3 %v4149_v39  ;;  %v4113_v32 = vld [vmem:[#allocation31 + $0x2d8] sm:$0xff]  ;;  %v4035_v39 = vld [vmem:[#allocation31 + $0x68] sm:$0xff] }
 0x868   : > { %4251 = vmatpush.msrb.mxu1 %v4083_v0  ;;  %4272 = vmatpush.msrb.mxu2 %v4113_v32  ;;  %v4099_v0 = vld [vmem:[#allocation31 + $0x268] sm:$0xff] }
 0x869   : > { %v3836_v27 = vpop.f32.mrf.mxu3  ;;  %4291 = vmatpush.msrb.mxu3 %v4147_v35 }
 0x86a   : > { %v6629_v5 = vadd.f32 %v3836_v27, %v3817_v22  ;;  %v4145_v22 = vld [vmem:[#allocation31 + $0x3d8] sm:$0xff]  ;;  %4252 = vmatpush.msrb.mxu1 %v4081_v2  ;;  %v4111_v27 = vld [vmem:[#allocation31 + $0x2c8] sm:$0xff] }
 0x86b   : > { %4292 = vmatpush.msrb.mxu3 %v4145_v22  ;;  %4273 = vmatpush.msrb.mxu2 %v4111_v27  ;;  %v4129_v2 = vld [vmem:[#allocation31 + $0x358] sm:$0xff]  ;;  %v4063_v22 = vld [vmem:[#allocation31 + $0x148] sm:$0xff] }
 0x86c   : > { %v3860_v57 = vsel %vm2602_vm15, %v6629_v5, 0.0  ;;  %v3874_v47 = vmul.f32 %v6629_v5, %v6629_v5  ;;  %4253 = vmatpush.msrb.mxu1 %v4079_v14  ;;  %v4095_v27 = vld [vmem:[#allocation31 + $0x248] sm:$0xff] }
 0x86d   : > { %v3861_v41 = vrot.slane %v3860_v57, 4  ;;  %4293 = vmatpush.msrb.mxu3 %v4143_v7  ;;  %4274 = vmatpush.msrb.mxu2 %v4109_v53  ;;  %v4093_v53 = vld [vmem:[#allocation31 + $0x238] sm:$0xff] }
 0x86e   : > { %v3896_v6 = vsel %vm2602_vm15, %v3874_v47, 0.0  ;;  %v6655_v47 = vpop.eup %5053  ;;  %4254 = vmatpush.msrb.mxu1 %v4077_v42  ;;  %v4061_v42 = vld [vmem:[#allocation31 + $0x138] sm:$0xff] }
 0x86f   : > { %v3862_v4 = vadd.f32 %v3861_v41, %v3860_v57  ;;  %v3897_v12 = vrot.slane %v3896_v6, 4  ;;  %v4141_v57 = vld [vmem:[#allocation31 + $0x3b8] sm:$0xff]  ;;  %v4043_v41 = vld [vmem:[#allocation31 + $0xa8] sm:$0xff]  ;;  %v3921_v52 = vmul.f32 %v6655_v47, %v6641_v9  ;;  %4275 = vmatpush.msrb.mxu2 %v4107_v30  ;;  %vm3927_vm6 = vweird.f32 %v6655_v47 }
 0x870   : > { %4294 = vmatpush.msrb.mxu3 %v4141_v57  ;;  %4235 = vmatpush.msrb.mxu0 %v4043_v41  ;;  %v4027_v57 = vld [vmem:[#allocation31 + $0x28] sm:$0xff]  ;;  %v3945_v41 = vmul.f32 %v6647_v15, %v3944_v20  ;;  %vm3928_vm13 = vmor %vm3926_vm10, %vm3927_vm6 }
 0x871   : > { %v3863_v29 = vrot.slane %v3862_v4, 2  ;;  %v3898_v56 = vadd.f32 %v3897_v12, %v3896_v6  ;;  %v3932_v6 = vmul.f32 %v6645_v26, %v3931_v33  ;;  %4255 = vmatpush.msrb.mxu1 %v4075_v43  ;;  %v4105_v12 = vld [vmem:[#allocation31 + $0x298] sm:$0xff]  ;;  %v4091_v30 = vld [vmem:[#allocation31 + $0x228] sm:$0xff] }
 0x872   : > { %4295 = vmatpush.msrb.mxu3 %v4139_v3  ;;  %4236 = vmatpush.msrb.mxu0 %v4041_v16  ;;  %v4057_v16 = vld [vmem:[#allocation31 + $0x118] sm:$0xff] }
 0x873   : > { %v3864_v61 = vadd.f32 %v3863_v29, %v3862_v4  ;;  %v3899_v36 = vrot.slane %v3898_v56, 2  ;;  %v4073_v4 = vld [vmem:[#allocation31 + $0x198] sm:$0xff]  ;;  %v4039_v29 = vld [vmem:[#allocation31 + $0x88] sm:$0xff]  ;;  %4276 = vmatpush.msrb.mxu2 %v4105_v12  ;;  %v3933_v13 = vmul.f32 0.5, %v3932_v6 }
 0x874   : > { %4256 = vmatpush.msrb.mxu1 %v4073_v4  ;;  %4296 = vmatpush.msrb.mxu3 %v4137_v38  ;;  %v4025_v6 = vld [vmem:[#allocation31 + $0x18] sm:$0xff] }
 0x875   : > { %v3865_v34 = vrot.slane %v3864_v61, 1  ;;  %v3900_v44 = vadd.f32 %v3899_v36, %v3898_v56  ;;  %v4071_v56 = vld [vmem:[#allocation31 + $0x188] sm:$0xff]  ;;  %4237 = vmatpush.msrb.mxu0 %v4039_v29  ;;  %4277 = vmatpush.msrb.mxu2 %v4103_v46  ;;  %v4133_v36 = vld [vmem:[#allocation31 + $0x378] sm:$0xff]  ;;  %v3934_v35 = vsub.f32 1.5, %v3933_v13  ;;  %v3949_v29 = vsel %vm6691_vm7, %v6647_v15, %v3945_v41 }
 0x876   : > { %4257 = vmatpush.msrb.mxu1 %v4071_v56  ;;  %4297 = vmatpush.msrb.mxu3 %v4135_v21  ;;  %v4089_v12 = vld [vmem:[#allocation31 + $0x218] sm:$0xff]  ;;  %v4087_v46 = vld [vmem:[#allocation31 + $0x208] sm:$0xff]  ;;  %v3965_v15 = vrot.slane %v3949_v29, 6 }
 0x877   : > { %v3866_v50 = vadd.f32 %v3865_v34, %v3864_v61  ;;  %v3901_v23 = vrot.slane %v3900_v44, 1  ;;  %v3922_v61 = vmul.f32 %v6655_v47, %v3921_v52  ;;  %4238 = vmatpush.msrb.mxu0 %v4037_v60  ;;  %4278 = vmatpush.msrb.mxu2 %v4101_v59  ;;  %v4033_v34 = vld [vmem:[#allocation31 + $0x58] sm:$0xff]  ;;  %v3935_v7 = vmul.f32 %v6645_v26, %v3934_v35  ;;  %v4119_v21 = vld [vmem:[#allocation31 + $0x308] sm:$0xff] }
 0x878   : > { %4258 = vmatpush.msrb.mxu1 %v4069_v40  ;;  %4298 = vmatpush.msrb.mxu3 %v4133_v36  ;;  %v4121_v52 = vld [vmem:[#allocation31 + $0x318] sm:$0xff] }
 0x879   : > { %v6649_v49 = vmul.f32 0.25, %v3866_v50  ;;  %v3902_v18 = vadd.f32 %v3901_v23, %v3900_v44  ;;  %v4065_v44 = vld [vmem:[#allocation31 + $0x158] sm:$0xff]  ;;  %4239 = vmatpush.msrb.mxu0 %v4035_v39  ;;  %v3923_v50 = vmul.f32 0.5, %v3922_v61  ;;  %4279 = vmatpush.msrb.mxu2 %v4099_v0  ;;  %v4031_v23 = vld [vmem:[#allocation31 + $0x48] sm:$0xff]  ;;  %v3939_v63 = vsel %vm6679_vm3, %v6645_v26, %v3935_v7 }
 0x87a   : > { %4259 = vmatpush.msrb.mxu1 %v4067_v24  ;;  %4299 = vmatpush.msrb.mxu3 %v4131_v19  ;;  %v4023_v26 = vld [vmem:[#allocation31 + $0x8] sm:$0xff]  ;;  %v3964_v13 = vrot.slane %v3939_v63, 7  ;;  %v3915_v40 = vld [vmem:[#allocation28] sm:$0xf]  ;;  %v4433_v29 = vld [vmem:[#allocation35 + $0xf8] sm:$0xff] }
 0x87b   : > { %v3906_v51 = vmul.f32 0.25, %v3902_v18  ;;  %v3910_v54 = vmul.f32 %v6649_v49, %v6649_v49  ;;  %4240 = vmatpush.msrb.mxu0 %v4033_v34  ;;  %v4127_v18 = vld [vmem:[#allocation31 + $0x348] sm:$0xff]  ;;  %4280 = vmatpush.msrb.mxu2 %v4097_v25 }
 0x87c   : > { %4260 = vmatpush.msrb.mxu1 %v4065_v44  ;;  %4300 = vmatpush.msrb.mxu3 %v4129_v2 }
 0x87d   : > { %v3914_v45 = vsub.f32 %v3906_v51, %v3910_v54  ;;  %4241 = vmatpush.msrb.mxu0 %v4031_v23  ;;  %v3924_v51 = vsub.f32 1.5, %v3923_v50  ;;  %4281 = vmatpush.msrb.mxu2 %v4095_v27  ;;  %v4125_v54 = vld [vmem:[#allocation31 + $0x338] sm:$0xff] }
 0x87e   : > { %4261 = vmatpush.msrb.mxu1 %v4063_v22  ;;  %4301 = vmatpush.msrb.mxu3 %v4127_v18  ;;  %v3975_v50 = vld [vmem:[#allocation29] sm:$0xf] }
 0x87f   : > { %v6662_v37 = vadd.f32 1e-05, %v3914_v45  ;;  %4242 = vmatpush.msrb.mxu0 %v4029_v10  ;;  %v4123_v45 = vld [vmem:[#allocation31 + $0x328] sm:$0xff]  ;;  %4282 = vmatpush.msrb.mxu2 %v4093_v53  ;;  %v3925_v17 = vmul.f32 %v6655_v47, %v3924_v51 }
 0x880   : > { %4262 = vmatpush.msrb.mxu1 %v4061_v42  ;;  %4302 = vmatpush.msrb.mxu3 %v4125_v54 }
 0x881   : > { %5055 = vrsqrt.f32 %v6662_v37  ;;  %4243 = vmatpush.msrb.mxu0 %v4027_v57  ;;  %4283 = vmatpush.msrb.mxu2 %v4091_v30  ;;  %vm3956_vm8 = vweird.f32 %v6662_v37  ;;  %v3929_v59 = vsel %vm3928_vm13, %v6655_v47, %v3925_v17  ;;  %v4417_v17 = vld [vmem:[#allocation35 + $0x78] sm:$0xff] }
 0x882   : > { %4263 = vmatpush.msrb.mxu1 %v4059_v11  ;;  %4303 = vmatpush.msrb.mxu3 %v4123_v45  ;;  %v3968_v61 = vsel %vm3967_vm11, %v3929_v59, %v3964_v13 }
 0x883   : > { %4244 = vmatpush.msrb.mxu0 %v4025_v6  ;;  %4284 = vmatpush.msrb.mxu2 %v4089_v12 }
 0x884   : > { %4264 = vmatpush.msrb.mxu1 %v4057_v16  ;;  %4304 = vmatpush.msrb.mxu3 %v4121_v52 }
 0x885   : > { %4245 = vmatpush.msrb.mxu0 %v4023_v26  ;;  %4285 = vmatpush.msrb.mxu2 %v4087_v46 }
 0x886   : > { %4265 = vmatpush.msrb.mxu1 %v4055_v48  ;;  %4305 = vmatpush.msrb.mxu3 %v4119_v21 }
 0x887   : > { %v6667_v32 = vpop.eup %5055 }
 0x888   : > { %v3951_v14 = vmul.f32 %v6667_v32, %v6662_v37  ;;  %vm3957_vm5 = vweird.f32 %v6667_v32 }
 0x889   : > { %vm3958_vm9 = vmor %vm3956_vm8, %vm3957_vm5 }
 0x88a   : > { %v3952_v33 = vmul.f32 %v6667_v32, %v3951_v14 }
 0x88c   : > { %v3953_v43 = vmul.f32 0.5, %v3952_v33 }
 0x88e   : > { %v3954_v4 = vsub.f32 1.5, %v3953_v43 }
 0x890   : > { %v3955_v56 = vmul.f32 %v6667_v32, %v3954_v4 }
 0x892   : > { %v3959_v60 = vsel %vm3958_vm9, %v6667_v32, %v3955_v56 }
 0x893   : > { %v3966_v37 = vrot.slane %v3959_v60, 5  ;;  %v4416_v60 = vld [vmem:[#allocation35 + $0x70] sm:$0xff] }
 0x895   : > { %v3970_v9 = vsel %vm3969_vm12, %v3965_v15, %v3966_v37  ;;  %v4432_v15 = vld [vmem:[#allocation35 + $0xf0] sm:$0xff] }
 0x896   : > { %v3972_v36 = vsel %vm3971_vm14, %v3968_v61, %v3970_v9  ;;  %v4415_v61 = vld [vmem:[#allocation35 + $0x68] sm:$0xff] }
 0x897   : > { %v3974_v62 = vmul.f32 %v3972_v36, %v3915_v40  ;;  %v4431_v9 = vld [vmem:[#allocation35 + $0xe8] sm:$0xff] }
 0x899   : > { %v3977_v39 = vperm.slane %v3974_v62, 0  ;;  %v3978_v24 = vperm.slane %v3974_v62, 1  ;;  %v3979_v0 = vperm.slane %v3974_v62, 2  ;;  %v3980_v19 = vperm.slane %v3974_v62, 3 }
 0x89b   : > { %v3986_v34 = vmul.f32 %v3978_v24, %v6617_v1  ;;  %v3987_v44 = vmul.f32 %v3979_v0, %v6619_v58  ;;  %v3988_v35 = vmul.f32 %v3980_v19, %v6649_v49  ;;  %v3985_v25 = vmul.f32 %v3977_v39, %v6623_v31 }
 0x89c   : > { %v4004_v27 = vmul.f32 %v3980_v19, %v6629_v5  ;;  %v4001_v1 = vmul.f32 %v3977_v39, %v6604_v8  ;;  %v4002_v58 = vmul.f32 %v3978_v24, %v6596_v28  ;;  %v4003_v49 = vmul.f32 %v3979_v0, %v6598_v55  ;;  %v4414_v19 = vld [vmem:[#allocation35 + $0x60] sm:$0xff] }
 0x89d   : > { %v3993_v47 = vrot.slane %v3986_v34, 7  ;;  %v3994_v2 = vrot.slane %v3987_v44, 6  ;;  %v3995_v32 = vrot.slane %v3988_v35, 5  ;;  %v4430_v34 = vld [vmem:[#allocation35 + $0xe0] sm:$0xff] }
 0x89f   : > { %v3996_v23 = vsel %vm3967_vm11, %v3985_v25, %v3993_v47  ;;  %v3997_v22 = vsel %vm3969_vm12, %v3994_v2, %v3995_v32  ;;  %v4413_v32 = vld [vmem:[#allocation35 + $0x58] sm:$0xff] }
 0x8a0   : > { %v3998_v20 = vsel %vm3971_vm14, %v3996_v23, %v3997_v22 }
 0x8a1   : > { %v4000_v14 = vsub.f32 %v3975_v50, %v3998_v20  ;;  %v4429_v50 = vld [vmem:[#allocation35 + $0xd8] sm:$0xff] }
 0x8a3   : > { %v4009_v31 = vperm.slane %v4000_v14, 3  ;;  %v4006_v18 = vperm.slane %v4000_v14, 0  ;;  %v4007_v7 = vperm.slane %v4000_v14, 1  ;;  %v4008_v33 = vperm.slane %v4000_v14, 2 }
 0x8a5   : > { %v4017_v10 = vadd.f32 %v4009_v31, %v4004_v27  ;;  %v4014_v42 = vadd.f32 %v4006_v18, %v4001_v1  ;;  %v4015_v53 = vadd.f32 %v4007_v7, %v4002_v58  ;;  %v4016_v51 = vadd.f32 %v4008_v33, %v4003_v49  ;;  %v4412_v27 = vld [vmem:[#allocation35 + $0x50] sm:$0xff]  ;;  %v4411_v7 = vld [vmem:[#allocation35 + $0x48] sm:$0xff] }
 0x8a6   : > { %v4428_v1 = vld [vmem:[#allocation35 + $0xd0] sm:$0xff]  ;;  %v4427_v33 = vld [vmem:[#allocation35 + $0xc8] sm:$0xff] }
 0x8a7   : > { %v4018_v54 = vmax.f32 %v4014_v42, 0.0  ;;  %v4019_v57 = vmax.f32 %v4015_v53, 0.0  ;;  %v4020_v11 = vmax.f32 %v4016_v51, 0.0  ;;  %v4021_v41 = vmax.f32 %v4017_v10, 0.0  ;;  %v4410_v51 = vld [vmem:[#allocation35 + $0x40] sm:$0xff] }
 0x8a9   : > { %4166 = vmatmul.f32.vlgmr.msra.gmra.mxu0 %v4018_v54  ;;  %4186 = vmatmul.f32.vlgmr.msra.gmra.mxu1 %v4019_v57 }
 0x8aa   : > { %4206 = vmatmul.f32.vlgmr.msra.gmra.mxu2 %v4020_v11  ;;  %4226 = vmatmul.f32.vlgmr.msra.gmra.mxu3 %v4021_v41 }
 0x8ab   : > { %4438 = vmatpush.msra.mxu0 %v4417_v17  ;;  %4458 = vmatpush.msra.mxu1 %v4433_v29  ;;  %v4421_v17 = vld [vmem:[#allocation35 + $0x98] sm:$0xff] }
 0x8ad   : > { %4439 = vmatpush.msra.mxu0 %v4416_v60  ;;  %4459 = vmatpush.msra.mxu1 %v4432_v15  ;;  %v4402_v60 = vld [vmem:[#allocation35] sm:$0xff] }
 0x8af   : > { %4440 = vmatpush.msra.mxu0 %v4415_v61  ;;  %4460 = vmatpush.msra.mxu1 %v4431_v9 }
 0x8b1   : > { %4246 = vmatmul.f32.vlgmr.msrb.gmra.mxu0 %v4018_v54  ;;  %4266 = vmatmul.f32.vlgmr.msrb.gmra.mxu1 %v4019_v57  ;;  %v4426_v54 = vld [vmem:[#allocation35 + $0xc0] sm:$0xff] }
 0x8b2   : > { %4286 = vmatmul.f32.vlgmr.msrb.gmra.mxu2 %v4020_v11  ;;  %4306 = vmatmul.f32.vlgmr.msrb.gmra.mxu3 %v4021_v41 }
 0x8b3   : > { %4441 = vmatpush.msra.mxu0 %v4414_v19  ;;  %4461 = vmatpush.msra.mxu1 %v4430_v34 }
 0x8b5   : > { %4442 = vmatpush.msra.mxu0 %v4413_v32  ;;  %4462 = vmatpush.msra.mxu1 %v4429_v50 }
 0x8b7   : > { %4443 = vmatpush.msra.mxu0 %v4412_v27  ;;  %4463 = vmatpush.msra.mxu1 %v4428_v1 }
 0x8b9   : > { %4444 = vmatpush.msra.mxu0 %v4411_v7  ;;  %4464 = vmatpush.msra.mxu1 %v4427_v33 }
 0x8bb   : > { %4445 = vmatpush.msra.mxu0 %v4410_v51  ;;  %4465 = vmatpush.msra.mxu1 %v4426_v54  ;;  %v5046_v51 = vld [vmem:[#allocation37] ss:$0 sm:$0xff] }
 0x926   : > { %v4167_v28 = vpop.f32.mrf.mxu0  ;;  %v4187_v55 = vpop.f32.mrf.mxu1 }
 0x927   : > { %v4188_v8 = vadd.f32 %v4187_v55, %v4167_v28  ;;  %v4409_v28 = vld [vmem:[#allocation35 + $0x38] sm:$0xff] }
 0x928   : > { %v4425_v55 = vld [vmem:[#allocation35 + $0xb8] sm:$0xff]  ;;  %4446 = vmatpush.msra.mxu0 %v4409_v28 }
 0x929   : > { %4466 = vmatpush.msra.mxu1 %v4425_v55 }
 0x92d   : > { %v4207_v5 = vpop.f32.mrf.mxu2  ;;  %v4227_v43 = vpop.f32.mrf.mxu3 }
 0x92e   : > { %v4208_v30 = vadd.f32 %v4207_v5, %v4188_v8  ;;  %v4247_v3 = vpop.f32.mrf.mxu0  ;;  %v4267_v6 = vpop.f32.mrf.mxu1 }
 0x92f   : > { %v4268_v52 = vadd.f32 %v4267_v6, %v4247_v3 }
 0x930   : > { %v6722_v45 = vadd.f32 %v4227_v43, %v4208_v30  ;;  %v4408_v43 = vld [vmem:[#allocation35 + $0x30] sm:$0xff] }
 0x931   : > { %v4424_v30 = vld [vmem:[#allocation35 + $0xb0] sm:$0xff]  ;;  %4447 = vmatpush.msra.mxu0 %v4408_v43 }
 0x932   : > { %v4310_v16 = vsel %vm2602_vm15, %v6722_v45, 0.0  ;;  %v4326_v63 = vmul.f32 %v6722_v45, %v6722_v45  ;;  %4467 = vmatpush.msra.mxu1 %v4424_v30 }
 0x933   : > { %v4311_v4 = vrot.slane %v4310_v16, 4 }
 0x934   : > { %v4328_v12 = vsel %vm2602_vm15, %v4326_v63, 0.0  ;;  %v4423_v63 = vld [vmem:[#allocation35 + $0xa8] sm:$0xff] }
 0x935   : > { %v4312_v38 = vadd.f32 %v4311_v4, %v4310_v16  ;;  %v4329_v26 = vrot.slane %v4328_v12, 4  ;;  %v4287_v48 = vpop.f32.mrf.mxu2  ;;  %v4307_v13 = vpop.f32.mrf.mxu3  ;;  %v4407_v16 = vld [vmem:[#allocation35 + $0x28] sm:$0xff]  ;;  %4468 = vmatpush.msra.mxu1 %v4423_v63 }
 0x936   : > { %v4288_v56 = vadd.f32 %v4287_v48, %v4268_v52  ;;  %4448 = vmatpush.msra.mxu0 %v4407_v16  ;;  %v4422_v52 = vld [vmem:[#allocation35 + $0xa0] sm:$0xff]  ;;  %v4405_v48 = vld [vmem:[#allocation35 + $0x18] sm:$0xff] }
 0x937   : > { %v4313_v46 = vrot.slane %v4312_v38, 2  ;;  %v4330_v21 = vadd.f32 %v4329_v26, %v4328_v12  ;;  %v4406_v12 = vld [vmem:[#allocation35 + $0x20] sm:$0xff]  ;;  %4469 = vmatpush.msra.mxu1 %v4422_v52 }
 0x938   : > { %v6729_v37 = vadd.f32 %v4307_v13, %v4288_v56  ;;  %4449 = vmatpush.msra.mxu0 %v4406_v12  ;;  %v4404_v56 = vld [vmem:[#allocation35 + $0x10] sm:$0xff]  ;;  %v4419_v13 = vld [vmem:[#allocation35 + $0x88] sm:$0xff] }
 0x939   : > { %v4314_v40 = vadd.f32 %v4313_v46, %v4312_v38  ;;  %v4331_v59 = vrot.slane %v4330_v21, 2  ;;  %4470 = vmatpush.msra.mxu1 %v4421_v17  ;;  %v4420_v46 = vld [vmem:[#allocation35 + $0x90] sm:$0xff] }
 0x93a   : > { %v4317_v36 = vsel %vm2602_vm15, %v6729_v37, 0.0  ;;  %v4327_v62 = vmul.f32 %v6729_v37, %v6729_v37  ;;  %4450 = vmatpush.msra.mxu0 %v4405_v48 }
 0x93b   : > { %v4315_v39 = vrot.slane %v4314_v40, 1  ;;  %v4332_v24 = vadd.f32 %v4331_v59, %v4330_v21  ;;  %v4318_v0 = vrot.slane %v4317_v36, 4  ;;  %4471 = vmatpush.msra.mxu1 %v4420_v46  ;;  %v4403_v21 = vld [vmem:[#allocation35 + $0x8] sm:$0xff] }
 0x93c   : > { %v4335_v44 = vsel %vm2602_vm15, %v4327_v62, 0.0  ;;  %4451 = vmatpush.msra.mxu0 %v4404_v56 }
 0x93d   : > { %v4316_v35 = vadd.f32 %v4315_v39, %v4314_v40  ;;  %v4333_v25 = vrot.slane %v4332_v24, 1  ;;  %v4319_v47 = vadd.f32 %v4318_v0, %v4317_v36  ;;  %v4336_v2 = vrot.slane %v4335_v44, 4  ;;  %4472 = vmatpush.msra.mxu1 %v4419_v13  ;;  %v4418_v40 = vld [vmem:[#allocation35 + $0x80] sm:$0xff] }
 0x93e   : > { %4452 = vmatpush.msra.mxu0 %v4403_v21 }
 0x93f   : > { %v6736_v23 = vmul.f32 0.25, %v4316_v35  ;;  %v4334_v22 = vadd.f32 %v4333_v25, %v4332_v24  ;;  %v4320_v20 = vrot.slane %v4319_v47, 2  ;;  %v4337_v14 = vadd.f32 %v4336_v2, %v4335_v44  ;;  %4473 = vmatpush.msra.mxu1 %v4418_v40  ;;  %v4348_v44 = vld [vmem:[#allocation32] sm:$0x3] }
 0x940   : > { %4453 = vmatpush.msra.mxu0 %v4402_v60 }
 0x941   : > { %v4342_v58 = vmul.f32 0.25, %v4334_v22  ;;  %v4344_v49 = vmul.f32 %v6736_v23, %v6736_v23  ;;  %v4321_v31 = vadd.f32 %v4320_v20, %v4319_v47  ;;  %v4338_v18 = vrot.slane %v4337_v14, 2  ;;  %v4377_v20 = vld [vmem:[#allocation34] sm:$0x3] }
 0x943   : > { %v4346_v10 = vsub.f32 %v4342_v58, %v4344_v49  ;;  %v4322_v42 = vrot.slane %v4321_v31, 1  ;;  %v4339_v53 = vadd.f32 %v4338_v18, %v4337_v14 }
 0x945   : > { %v4349_v57 = vadd.f32 1e-05, %v4346_v10  ;;  %v4323_v11 = vadd.f32 %v4322_v42, %v4321_v31  ;;  %v4340_v41 = vrot.slane %v4339_v53, 1 }
 0x947   : > { %5057 = vrsqrt.f32 %v4349_v57  ;;  %v4325_v8 = vmul.f32 0.25, %v4323_v11  ;;  %v4341_v5 = vadd.f32 %v4340_v41, %v4339_v53  ;;  %vm4357_vm3 = vweird.f32 %v4349_v57 }
 0x949   : > { %v4343_v3 = vmul.f32 0.25, %v4341_v5  ;;  %v4345_v6 = vmul.f32 %v4325_v8, %v4325_v8 }
 0x94b   : > { %v4347_v4 = vsub.f32 %v4343_v3, %v4345_v6 }
 0x94d   : > { %v5058_v38 = vpop.eup %5057  ;;  %v4350_v26 = vadd.f32 1e-05, %v4347_v4 }
 0x94e   : > { %v4352_v29 = vmul.f32 %v5058_v38, %v4349_v57  ;;  %vm4358_vm0 = vweird.f32 %v5058_v38 }
 0x94f   : > { %5059 = vrsqrt.f32 %v4350_v26  ;;  %vm4367_vm1 = vweird.f32 %v4350_v26  ;;  %vm4359_vm4 = vmor %vm4357_vm3, %vm4358_vm0 }
 0x950   : > { %v4353_v15 = vmul.f32 %v5058_v38, %v4352_v29 }
 0x952   : > { %v4354_v61 = vmul.f32 0.5, %v4353_v15 }
 0x954   : > { %v4355_v62 = vsub.f32 1.5, %v4354_v61 }
 0x955   : > { %v5060_v59 = vpop.eup %5059 }
 0x956   : > { %v4362_v9 = vmul.f32 %v5060_v59, %v4350_v26  ;;  %vm4368_vm15 = vweird.f32 %v5060_v59  ;;  %v4356_v0 = vmul.f32 %v5058_v38, %v4355_v62 }
 0x957   : > { %vm4369_vm2 = vmor %vm4367_vm1, %vm4368_vm15 }
 0x958   : > { %v4363_v36 = vmul.f32 %v5060_v59, %v4362_v9  ;;  %v4360_v25 = vsel %vm4359_vm4, %v5058_v38, %v4356_v0 }
 0x95a   : > { %v4364_v39 = vmul.f32 0.5, %v4363_v36 }
 0x95c   : > { %v4365_v24 = vsub.f32 1.5, %v4364_v39 }
 0x95e   : > { %v4366_v19 = vmul.f32 %v5060_v59, %v4365_v24 }
 0x960   : > { %v4370_v34 = vsel %vm4369_vm2, %v5060_v59, %v4366_v19 }
 0x961   : > { %v4373_v35 = vrot.slane %v4370_v34, 7 }
 0x963   : > { %v4374_v47 = vsel %vm3967_vm11, %v4360_v25, %v4373_v35 }
 0x964   : > { %v4376_v2 = vmul.f32 %v4374_v47, %v4348_v44 }
 0x966   : > { %v4379_v32 = vperm.slane %v4376_v2, 0  ;;  %v4380_v50 = vperm.slane %v4376_v2, 1 }
 0x968   : > { %v4384_v22 = vmul.f32 %v4380_v50, %v4325_v8  ;;  %v4383_v14 = vmul.f32 %v4379_v32, %v6736_v23  ;;  %v4392_v49 = vmul.f32 %v4380_v50, %v6729_v37  ;;  %v4391_v18 = vmul.f32 %v4379_v32, %v6722_v45 }
 0x96a   : > { %v4387_v27 = vrot.slane %v4384_v22, 7 }
 0x96c   : > { %v4388_v1 = vsel %vm3967_vm11, %v4383_v14, %v4387_v27 }
 0x96d   : > { %v4390_v58 = vsub.f32 %v4377_v20, %v4388_v1 }
 0x96f   : > { %v4395_v31 = vperm.slane %v4390_v58, 1  ;;  %v4394_v7 = vperm.slane %v4390_v58, 0 }
 0x971   : > { %v4399_v33 = vadd.f32 %v4395_v31, %v4392_v49  ;;  %v4398_v10 = vadd.f32 %v4394_v7, %v4391_v18 }
 0x973   : > { %v4400_v42 = vmax.f32 %v4398_v10, 0.0  ;;  %v4401_v53 = vmax.f32 %v4399_v33, 0.0 }
 0x975   : > { %4454 = vmatmul.f32.vlgmr.msra.gmra.mxu0 %v4400_v42  ;;  %4474 = vmatmul.f32.vlgmr.msra.gmra.mxu1 %v4401_v53 }
 0x9f2   : > { %v4455_v54 = vpop.f32.mrf.mxu0  ;;  %v4475_v23 = vpop.f32.mrf.mxu1 }
 0x9f3   : > { %v4456_v57 = vadd.f32 %v5046_v51, %v4455_v54 }
 0x9f5   : > { %v4476_v11 = vadd.f32 %v4475_v23, %v4456_v57 }
 0x9f7   : > { %4478 = vst [vmem:[%s6856_s4] sm:$0xf] %v4476_v11 }
 0x9f8 PF: > { %s6857_s26 = sld [smem:[#allocation50_spill]]  ;;  %s6858_s24 = smov %s6871_s28 }
 0x9f9   : > { %s6859_s27 = smov %s5657_s30  ;;  %s6860_s28 = smov %s5661_s0 }
 0x9fa   : > { %s6861_s29 = smov %s5665_s19  ;;  %s6862_s30 = smov %s6867_s1 }
 0x9fb   : > { %s6863_s0 = smov %s6858_s24  ;;  %s6864_s19 = smov %s6875_s2 }
 0x9fe   : > { %s37_s7 = sadd.s32 1, %s6857_s26  }
 0x9ff   : > { %p34_p1 = scmp.ge.s32.totalorder %s37_s7, 38   ;;  %s6865_s1 = smov %s37_s7 }
 0xa01   :  { %36 = sbr.rel (!%p34_p1) target bundleno = 23 (0x17), region = 228 }
 0xa06   :  { %4490 = vsyncpa [#allocation13], 1 }
 0xa07   :  { %4492 = vsyncpa [#allocation13 + $0x1], 1 }
 0xa08   :  { %4493 = vsyncpa [#allocation15], 1 }
 0xa09   :  { %4494 = vsyncpa [#allocation18], 1 }
 0xa0a   :  { %4495 = vsyncpa [#allocation21], 1 }
 0xa0b   :  { %4496 = vsyncpa [#allocation24], 1 }
 0xa0c   :  { %4497 = vsyncpa [#allocation27], 1 }
 0xa0d   :  { %4498 = vsyncpa [#allocation30], 1 }
 0xa0e   :  { %4499 = vsyncpa [#allocation33], 1 }
 0xa0f   :  { %4500 = vsyncpa [#allocation36], 1 }

</bundles_post_ra>
